<compile_context>
chip_gen: v7x
topology: tpu7x:2x2x1
jax: 0.10.0
libtpu: 0.0.40
codegen_flags: <defaults>
</compile_context>

<pallas_src>
import functools

import jax
import jax.numpy as jnp
from jax.experimental import pallas as pl
from jax.experimental.pallas import tpu as pltpu


# ---------------------------------------------------------------------------
# Fused decoder kernel (one grid step per batch item).  Static Python loop over
# layers: [skip add] -> [height-upsample matmul] -> banded 3x3x3 conv (3 bf16
# matmuls) -> BN shift -> tanh/sigmoid gates -> depth-wise QRNN f-pool.
# ---------------------------------------------------------------------------
def _fused_decoder_kernel(*refs, D, metas):
    n_layers = len(metas)
    n_up = sum(1 for m in metas if m["up"])
    it = iter(refs)
    x_ref = next(it)                                     # (1, D*H0, K0) f32
    skip_refs = [next(it) for _ in range(n_layers - 1)]  # (1, D*H, K) f32
    band_refs = [next(it) for _ in range(n_layers)]      # (3, 3*K, 2*WCo) bf16
    shift_refs = [next(it) for _ in range(n_layers)]     # (1, 2*WCo) f32
    ah_refs = [next(it) for _ in range(n_up)]            # (D*H, D*H_in) bf16
    o_ref = next(it)                                     # (1, D*H_last, WCo_last) f32
    acc_ref = next(it)                                   # scratch (max_M, max_2WCo) f32

    a = x_ref[0]                                         # (D*H_in0, K0) f32
    up_i = 0
    for li, m in enumerate(metas):
        H, K, WCo, rev = m["H"], m["K"], m["WCo"], m["rev"]
        M = D * H
        last = li == n_layers - 1

        # ---- skip connection (decoder adds xs.pop() before layers 1..n-1) ----
        if li > 0:
            a = a + skip_refs[li - 1][0]

        # ---- trilinear (1,2,2) upsample: height half as ONE matmul; width half
        #      folded into the banded conv weights host-side. ----
        if m["up"]:
            a = jnp.dot(ah_refs[up_i][...], a.astype(jnp.bfloat16),
                        preferred_element_type=jnp.float32)          # (M, K) f32
            up_i += 1

        # ---- kh-shifted slab [kh=0 | kh=1 | kh=2] along lanes (height zero-pad) ----
        a3 = a.reshape(D, H, K)
        zrow = jnp.zeros((D, 1, K), jnp.float32)
        s0 = jnp.concatenate([zrow, a3[:, :H - 1, :]], axis=1)       # row h -> a[h-1]
        s2 = jnp.concatenate([a3[:, 1:, :], zrow], axis=1)           # row h -> a[h+1]
        s_mid = jnp.concatenate([s0, a3, s2], axis=2).reshape(M, 3 * K)

        # ---- 3x3x3 conv as 3 lane-dense bf16 matmuls (kd taps via aligned
        #      H-row shifted operands with zero depth padding), f32 accumulation ----
        acc_ref[0:M, 0:2 * WCo] = jnp.dot(
            s_mid.astype(jnp.bfloat16), band_refs[li][1],
            preferred_element_type=jnp.float32)
        zblk = jnp.zeros((H, 3 * K), jnp.float32)
        a_kd0 = jnp.concatenate([zblk, s_mid[:M - H]], axis=0)       # (d,h) -> (d-1,h)
        acc_ref[0:M, 0:2 * WCo] += jnp.dot(
            a_kd0.astype(jnp.bfloat16), band_refs[li][0],
            preferred_element_type=jnp.float32)
        a_kd2 = jnp.concatenate([s_mid[H:], zblk], axis=0)           # (d,h) -> (d+1,h)
        acc_ref[0:M, 0:2 * WCo] += jnp.dot(
            a_kd2.astype(jnp.bfloat16), band_refs[li][2],
            preferred_element_type=jnp.float32)

        # ---- folded BatchNorm (eval; scale folded into weights) + gates ----
        g = acc_ref[0:M, 0:2 * WCo] + shift_refs[li][...]
        z = jnp.tanh(g[:, 0:WCo])                                    # (M, WCo)
        f = jax.nn.sigmoid(g[:, WCo:2 * WCo])                        # (M, WCo)

        # ---- QRNN f-pooling recurrence along depth (direction = rev) ----
        #   h[d] = f[d]*h[d-1] + (1-f[d])*z[d],  h[-1] = 0
        h = jnp.zeros((H, WCo), jnp.float32)
        outs = [None] * D
        for step in range(D):
            d = D - 1 - step if rev else step
            fd = f[d * H:(d + 1) * H, :]
            zd = z[d * H:(d + 1) * H, :]
            h = fd * h + (1.0 - fd) * zd
            if last:
                o_ref[0, d * H:(d + 1) * H, :] = h                   # lane-dense store
            else:
                outs[d] = h
        if not last:
            a = jnp.concatenate(outs, axis=0)                        # (M, WCo) f32


# ---------------------------------------------------------------------------
# Host-side weight preparation
# ---------------------------------------------------------------------------
def _interp_matrix(out_size, in_size):
    """Linear interpolation matrix, shape (out, in).
    TODO(synk): align_corners=True as in the qrnn3d reference upsample."""
    if in_size == 1:
        return jnp.ones((out_size, 1), jnp.float32)
    pos = jnp.arange(out_size, dtype=jnp.float32) * (in_size - 1) / (out_size - 1)
    lo = jnp.clip(jnp.floor(pos).astype(jnp.int32), 0, in_size - 2)
    frac = pos - lo.astype(jnp.float32)
    m = jnp.zeros((out_size, in_size), jnp.float32)
    rows = jnp.arange(out_size)
    m = m.at[rows, lo].set(1.0 - frac)
    m = m.at[rows, lo + 1].add(frac)
    return m


def _prep_layer(params, D, H_in, W_in):
    """Fold the kw and kh taps (and, for upsample layers, the width interpolation
    and the BN scale) into per-kd banded weight matrices of shape (3*K, 2*W*Co).
    Row order: (kh, wi, cin); column order: (gate, wo, co)."""
    w = params["w"]                                   # (3,3,3,Cin,2*Co) cross-corr taps
    Cin, Co = w.shape[3], w.shape[4] // 2
    upsample = params["kind"] == "upsample"
    W = 2 * W_in if upsample else W_in
    H = 2 * H_in if upsample else H_in

    # width-banded fold (pad rows dropped: they only ever see zero padding)
    w6 = w.reshape(3, 3, 3, Cin, 2, Co)
    wi = jnp.arange(W)[:, None]
    wo = jnp.arange(W)[None, :]
    kw = wi - wo + 1                                  # tap index, valid in [0, 2]
    valid = ((kw >= 0) & (kw <= 2)).astype(w.dtype)
    sel = w6[:, :, jnp.clip(kw, 0, 2)]                # (3,3,W,W,Cin,2,Co)
    sel = sel * valid[None, None, :, :, None, None, None]
    band = jnp.transpose(sel, (0, 1, 2, 4, 5, 3, 6)).reshape(3, 3, W * Cin, 2 * W * Co)

    ah_big = None
    if upsample:
        aw = _interp_matrix(W, W_in)                                  # (W, W_in)
        mw = jnp.kron(aw.T, jnp.eye(Cin, dtype=jnp.float32))          # (W_in*Cin, W*Cin)
        band = jnp.einsum('pq,abqn->abpn', mw, band)                  # fold width interp
        ah = _interp_matrix(H, H_in)                                  # (H, H_in)
        ah_big = jnp.kron(jnp.eye(D, dtype=jnp.float32), ah).astype(jnp.bfloat16)

    # fold BN (eval) scale into the weight columns; keep only the shift in-kernel
    scale_cols = jnp.broadcast_to(params["scale"].reshape(2, 1, Co),
                                  (2, W, Co)).reshape(1, 1, 1, 2 * W * Co)
    band = band * scale_cols
    K = band.shape[2]
    band = band.reshape(3, 3 * K, 2 * W * Co).astype(jnp.bfloat16)
    shift_cols = jnp.broadcast_to(params["shift"].reshape(2, 1, Co),
                                  (2, W, Co)).reshape(1, 2 * W * Co).astype(jnp.float32)

    meta = {"H": H, "K": K, "WCo": W * Co, "up": upsample, "rev": False}
    return band, shift_cols, ah_big, meta, (H, W, Co)


# ---------------------------------------------------------------------------
# Fused decoder wrapper (single pallas_call for all layers)
# ---------------------------------------------------------------------------
def qrnn3d_decoder(x, xs, layers, reverse=False, enable_ad=True):
    """x: (N, D, H, W*C) merged-lane layout; xs: skip tensors (same layout),
    consumed with .pop() exactly like the PyTorch forward."""
    xs = list(xs)
    N, D, H, WC = x.shape
    n_layers = len(layers)
    C = layers[0]["w"].shape[3]
    W = WC // C

    inputs = [x.reshape(N, D * H, WC)]
    in_specs = [pl.BlockSpec((1, D * H, WC), lambda n: (n, 0, 0))]
    skip_inputs, skip_specs = [], []
    bands, shifts, ahs, metas = [], [], [], []

    rev = reverse
    H_cur, W_cur, C_cur = H, W, C
    for i, p in enumerate(layers):
        if i > 0:                                      # skip added before layers 1..
            s = xs.pop()
            rows, cols = D * H_cur, W_cur * C_cur
            skip_inputs.append(s.reshape(N, rows, cols))
            skip_specs.append(pl.BlockSpec((1, rows, cols), lambda n: (n, 0, 0)))
        band, shift, ah_big, meta, (H_out, W_out, Co) = _prep_layer(p, D, H_cur, W_cur)
        meta["rev"] = bool(rev) if enable_ad else False
        if enable_ad:
            rev = not rev
        bands.append(band)
        shifts.append(shift)
        metas.append(meta)
        if ah_big is not None:
            ahs.append(ah_big)
        H_cur, W_cur, C_cur = H_out, W_out, Co

    inputs += skip_inputs + bands + shifts + ahs
    in_specs += skip_specs
    in_specs += [pl.BlockSpec(b.shape, lambda n: (0, 0, 0)) for b in bands]
    in_specs += [pl.BlockSpec(sh.shape, lambda n: (0, 0)) for sh in shifts]
    in_specs += [pl.BlockSpec(a.shape, lambda n: (0, 0)) for a in ahs]

    out_rows, out_cols = D * H_cur, W_cur * C_cur
    max_m = max(D * m["H"] for m in metas)
    max_n = max(2 * m["WCo"] for m in metas)

    kern = functools.partial(_fused_decoder_kernel, D=D, metas=tuple(metas))
    out = pl.pallas_call(
        kern,
        out_shape=jax.ShapeDtypeStruct((N, out_rows, out_cols), jnp.float32),
        grid=(N,),
        in_specs=in_specs,
        out_specs=pl.BlockSpec((1, out_rows, out_cols), lambda n: (n, 0, 0)),
        scratch_shapes=[pltpu.VMEM((max_m, max_n), jnp.float32)],
        compiler_params=pltpu.CompilerParams(
            dimension_semantics=("parallel",),         # batch sharded across v7x's 2 TCs
            vmem_limit_bytes=32 * 1024 * 1024),
    )(*inputs)
    return out.reshape(N, D, H_cur, W_cur * C_cur)


# ---------------------------------------------------------------------------
# Parameter setup (synthetic weights, BN folded to eval-mode scale/shift)
# ---------------------------------------------------------------------------
def make_decoder_params(key, channels, num_half_layer, sample_idx):
    layers = []
    ch = channels
    for i in reversed(range(num_half_layer)):
        key, k1, k2, k3, k4, k5 = jax.random.split(key, 6)
        if i not in sample_idx:
            cin, cout, kind = ch, ch, "deconv"
        else:
            cin, cout, kind = ch, ch // 2, "upsample"
            ch //= 2
        w = jax.random.normal(k1, (3, 3, 3, cin, 2 * cout), jnp.float32)
        w = w * (0.2 / (27.0 * cin) ** 0.5)
        gamma = 1.0 + 0.1 * jax.random.normal(k2, (2 * cout,), jnp.float32)
        beta = 0.1 * jax.random.normal(k3, (2 * cout,), jnp.float32)
        rmean = 0.05 * jax.random.normal(k4, (2 * cout,), jnp.float32)
        rvar = 1.0 + 0.1 * jax.random.uniform(k5, (2 * cout,), jnp.float32)
        eps = 1e-5
        scale = gamma / jnp.sqrt(rvar + eps)
        shift = beta - rmean * scale
        layers.append({"kind": kind, "w": w, "scale": scale, "shift": shift})
    return layers


if __name__ == "__main__":
    key = jax.random.PRNGKey(0)
    kx, ka, kb, kp = jax.random.split(key, 4)

    # Config: channels=16, num_half_layer=3, sample_idx=[1]  (torch x: (2,16,8,8,8) NCDHW)
    N, C, D, H, W = 2, 16, 8, 8, 8
    num_half_layer, sample_idx = 3, (1,)

    x = jax.random.normal(kx, (N, D, H, W, C), jnp.float32)                      # NDHWC
    skip_hi = jax.random.normal(ka, (N, D, H, W, C), jnp.float32)                # before layer 1
    skip_lo = jax.random.normal(kb, (N, D, 2 * H, 2 * W, C // 2), jnp.float32)   # before layer 2

    # merged-lane (N, D, H, W*C) layout (free reshape of contiguous NDHWC)
    xm = x.reshape(N, D, H, W * C)
    xs = [skip_lo.reshape(N, D, 2 * H, 2 * W * (C // 2)),
          skip_hi.reshape(N, D, H, W * C)]            # .pop() order == PyTorch list semantics

    layers = make_decoder_params(kp, C, num_half_layer, sample_idx)

    @jax.jit
    def fwd(xm, xs):
        return qrnn3d_decoder(xm, xs, layers, reverse=False, enable_ad=True)

    out = fwd(xm, xs)
    out = jax.block_until_ready(out)
    out = out.reshape(N, D, 2 * H, 2 * W, C // 2)     # back to NDHWC
    assert out.shape == (N, D, 2 * H, 2 * W, C // 2), out.shape
    assert bool(jnp.all(jnp.isfinite(out)))
    print("KERNEL_OK")
</pallas_src>

<mosaic_0001>
module attributes {stable_mosaic.version = 11 : i64} {
  func.func private @main(%arg0: i32) attributes {dimension_semantics = [#tpu.dimension_semantics<core_parallel>], iteration_bounds = array<i64: 2>, tpu.core_type = #tpu.core_type<sc_scalar_subcore>, window_params = []} {
    return
  }
}

module attributes {stable_mosaic.version = 11 : i64} {
  func.func private @main(%arg0: i32) attributes {dimension_semantics = [#tpu.dimension_semantics<core_parallel>], iteration_bounds = array<i64: 2>, tpu.core_type = #tpu.core_type<sc_scalar_subcore>, window_params = []} {
    return
  }
}

module attributes {stable_mosaic.version = 11 : i64} {
  func.func @_fused_decoder_kernel(%arg0: i32, %arg1: memref<1x64x128xf32, #tpu.memory_space<vmem>>, %arg2: memref<1x64x128xf32, #tpu.memory_space<vmem>>, %arg3: memref<1x128x128xf32, #tpu.memory_space<vmem>>, %arg4: memref<3x384x256xbf16, #tpu.memory_space<vmem>>, %arg5: memref<3x384x256xbf16, #tpu.memory_space<vmem>>, %arg6: memref<3x384x256xbf16, #tpu.memory_space<vmem>>, %arg7: memref<1x256xf32, #tpu.memory_space<vmem>>, %arg8: memref<1x256xf32, #tpu.memory_space<vmem>>, %arg9: memref<1x256xf32, #tpu.memory_space<vmem>>, %arg10: memref<128x64xbf16, #tpu.memory_space<vmem>>, %arg11: memref<1x128x128xf32, #tpu.memory_space<vmem>>, %arg12: memref<128x256xf32, #tpu.memory_space<vmem>>) attributes {dimension_semantics = [#tpu.dimension_semantics<parallel>], iteration_bounds = array<i64: 2>, scalar_prefetch = 0 : i64, scratch_operands = 1 : i64, tpu.core_type = #tpu.core_type<tc>, window_params = [{transform_indices = @transform_0, window_bounds = array<i64: 1, 64, 128>}, {transform_indices = @transform_1, window_bounds = array<i64: 1, 64, 128>}, {transform_indices = @transform_2, window_bounds = array<i64: 1, 128, 128>}, {pipeline_mode = #tpu.pipeline_mode<synchronous>, transform_indices = @transform_3, window_bounds = array<i64: 3, 384, 256>}, {pipeline_mode = #tpu.pipeline_mode<synchronous>, transform_indices = @transform_4, window_bounds = array<i64: 3, 384, 256>}, {pipeline_mode = #tpu.pipeline_mode<synchronous>, transform_indices = @transform_5, window_bounds = array<i64: 3, 384, 256>}, {pipeline_mode = #tpu.pipeline_mode<synchronous>, transform_indices = @transform_6, window_bounds = array<i64: 1, 256>}, {pipeline_mode = #tpu.pipeline_mode<synchronous>, transform_indices = @transform_7, window_bounds = array<i64: 1, 256>}, {pipeline_mode = #tpu.pipeline_mode<synchronous>, transform_indices = @transform_8, window_bounds = array<i64: 1, 256>}, {pipeline_mode = #tpu.pipeline_mode<synchronous>, transform_indices = @transform_9, window_bounds = array<i64: 128, 64>}, {transform_indices = @transform_10, window_bounds = array<i64: 1, 128, 128>}]} {
    %c0 = arith.constant 0 : index
    %c0_0 = arith.constant 0 : index
    %c0_1 = arith.constant 0 : index
    %0 = vector.load %arg1[%c0, %c0_0, %c0_1] : memref<1x64x128xf32, #tpu.memory_space<vmem>>, vector<1x64x128xf32>
    %1 = vector.shape_cast %0 : vector<1x64x128xf32> to vector<64x128xf32>
    %2 = vector.shape_cast %1 : vector<64x128xf32> to vector<8x8x128xf32>
    %cst = arith.constant 0.000000e+00 : f32
    %3 = vector.broadcast %cst : f32 to vector<8x1x128xf32>
    %4 = vector.extract_strided_slice %2 {offsets = [0, 0, 0], sizes = [8, 7, 128], strides = [1, 1, 1]} : vector<8x8x128xf32> to vector<8x7x128xf32>
    %5 = tpu.concatenate %3, %4 in 1 : vector<8x1x128xf32>, vector<8x7x128xf32> -> vector<8x8x128xf32>
    %6 = vector.extract_strided_slice %2 {offsets = [0, 1, 0], sizes = [8, 7, 128], strides = [1, 1, 1]} : vector<8x8x128xf32> to vector<8x7x128xf32>
    %7 = tpu.concatenate %6, %3 in 1 : vector<8x7x128xf32>, vector<8x1x128xf32> -> vector<8x8x128xf32>
    %8 = tpu.concatenate %5, %2, %7 in 2 : vector<8x8x128xf32>, vector<8x8x128xf32>, vector<8x8x128xf32> -> vector<8x8x384xf32>
    %9 = vector.shape_cast %8 : vector<8x8x384xf32> to vector<64x384xf32>
    %10 = arith.truncf %9 : vector<64x384xf32> to vector<64x384xbf16>
    %c1 = arith.constant 1 : index
    %c0_2 = arith.constant 0 : index
    %c0_3 = arith.constant 0 : index
    %11 = vector.load %arg4[%c1, %c0_2, %c0_3] : memref<3x384x256xbf16, #tpu.memory_space<vmem>>, vector<1x384x256xbf16>
    %12 = vector.shape_cast %11 : vector<1x384x256xbf16> to vector<384x256xbf16>
    %cst_4 = arith.constant dense<0.000000e+00> : vector<64x256xf32>
    %13 = tpu.matmul %10, %12, %cst_4 {dimension_numbers = #tpu.dot_dimension_numbers<[1], [0], [0], [1], [0, 0, 1, 1], [], []>} : vector<64x384xbf16>, vector<384x256xbf16>, vector<64x256xf32> -> vector<64x256xf32>
    %c0_5 = arith.constant 0 : index
    %c0_6 = arith.constant 0 : index
    %14 = vector.load %arg12[%c0_5, %c0_6] : memref<128x256xf32, #tpu.memory_space<vmem>>, vector<64x256xf32>
    tpu.vector_store %arg12[%c0_5, %c0_6], %13 {strides = array<i32>} : memref<128x256xf32, #tpu.memory_space<vmem>>, vector<64x256xf32>,
    %cst_7 = arith.constant 0.000000e+00 : f32
    %15 = vector.broadcast %cst_7 : f32 to vector<8x384xf32>
    %16 = vector.extract_strided_slice %9 {offsets = [0, 0], sizes = [56, 384], strides = [1, 1]} : vector<64x384xf32> to vector<56x384xf32>
    %17 = tpu.concatenate %15, %16 in 0 : vector<8x384xf32>, vector<56x384xf32> -> vector<64x384xf32>
    %c0_8 = arith.constant 0 : index
    %c0_9 = arith.constant 0 : index
    %18 = vector.load %arg12[%c0_8, %c0_9] : memref<128x256xf32, #tpu.memory_space<vmem>>, vector<64x256xf32>
    %19 = arith.truncf %17 : vector<64x384xf32> to vector<64x384xbf16>
    %c0_10 = arith.constant 0 : index
    %c0_11 = arith.constant 0 : index
    %c0_12 = arith.constant 0 : index
    %20 = vector.load %arg4[%c0_10, %c0_11, %c0_12] : memref<3x384x256xbf16, #tpu.memory_space<vmem>>, vector<1x384x256xbf16>
    %21 = vector.shape_cast %20 : vector<1x384x256xbf16> to vector<384x256xbf16>
    %cst_13 = arith.constant dense<0.000000e+00> : vector<64x256xf32>
    %22 = tpu.matmul %19, %21, %cst_13 {dimension_numbers = #tpu.dot_dimension_numbers<[1], [0], [0], [1], [0, 0, 1, 1], [], []>} : vector<64x384xbf16>, vector<384x256xbf16>, vector<64x256xf32> -> vector<64x256xf32>
    %23 = arith.addf %18, %22 : vector<64x256xf32>
    %c0_14 = arith.constant 0 : index
    %c0_15 = arith.constant 0 : index
    %24 = vector.load %arg12[%c0_14, %c0_15] : memref<128x256xf32, #tpu.memory_space<vmem>>, vector<64x256xf32>
    tpu.vector_store %arg12[%c0_14, %c0_15], %23 {strides = array<i32>} : memref<128x256xf32, #tpu.memory_space<vmem>>, vector<64x256xf32>,
    %25 = vector.extract_strided_slice %9 {offsets = [8, 0], sizes = [56, 384], strides = [1, 1]} : vector<64x384xf32> to vector<56x384xf32>
    %26 = tpu.concatenate %25, %15 in 0 : vector<56x384xf32>, vector<8x384xf32> -> vector<64x384xf32>
    %c0_16 = arith.constant 0 : index
    %c0_17 = arith.constant 0 : index
    %27 = vector.load %arg12[%c0_16, %c0_17] : memref<128x256xf32, #tpu.memory_space<vmem>>, vector<64x256xf32>
    %28 = arith.truncf %26 : vector<64x384xf32> to vector<64x384xbf16>
    %c2 = arith.constant 2 : index
    %c0_18 = arith.constant 0 : index
    %c0_19 = arith.constant 0 : index
    %29 = vector.load %arg4[%c2, %c0_18, %c0_19] : memref<3x384x256xbf16, #tpu.memory_space<vmem>>, vector<1x384x256xbf16>
    %30 = vector.shape_cast %29 : vector<1x384x256xbf16> to vector<384x256xbf16>
    %cst_20 = arith.constant dense<0.000000e+00> : vector<64x256xf32>
    %31 = tpu.matmul %28, %30, %cst_20 {dimension_numbers = #tpu.dot_dimension_numbers<[1], [0], [0], [1], [0, 0, 1, 1], [], []>} : vector<64x384xbf16>, vector<384x256xbf16>, vector<64x256xf32> -> vector<64x256xf32>
    %32 = arith.addf %27, %31 : vector<64x256xf32>
    %c0_21 = arith.constant 0 : index
    %c0_22 = arith.constant 0 : index
    %33 = vector.load %arg12[%c0_21, %c0_22] : memref<128x256xf32, #tpu.memory_space<vmem>>, vector<64x256xf32>
    tpu.vector_store %arg12[%c0_21, %c0_22], %32 {strides = array<i32>} : memref<128x256xf32, #tpu.memory_space<vmem>>, vector<64x256xf32>,
    %c0_23 = arith.constant 0 : index
    %c0_24 = arith.constant 0 : index
    %34 = vector.load %arg12[%c0_23, %c0_24] : memref<128x256xf32, #tpu.memory_space<vmem>>, vector<64x256xf32>
    %c0_25 = arith.constant 0 : index
    %c0_26 = arith.constant 0 : index
    %35 = vector.load %arg7[%c0_25, %c0_26] : memref<1x256xf32, #tpu.memory_space<vmem>>, vector<1x256xf32>
    %36 = vector.broadcast %35 : vector<1x256xf32> to vector<64x256xf32>
    %37 = arith.addf %34, %36 : vector<64x256xf32>
    %38 = vector.extract_strided_slice %37 {offsets = [0, 0], sizes = [64, 128], strides = [1, 1]} : vector<64x256xf32> to vector<64x128xf32>
    %39 = math.tanh %38 : vector<64x128xf32>
    %40 = vector.extract_strided_slice %37 {offsets = [0, 128], sizes = [64, 128], strides = [1, 1]} : vector<64x256xf32> to vector<64x128xf32>
    %41 = arith.negf %40 : vector<64x128xf32>
    %42 = math.exp %41 : vector<64x128xf32>
    %cst_27 = arith.constant 1.000000e+00 : f32
    %43 = vector.broadcast %cst_27 : f32 to vector<64x128xf32>
    %44 = arith.addf %43, %42 : vector<64x128xf32>
    %45 = arith.divf %43, %44 : vector<64x128xf32>
    %cst_28 = arith.constant 0.000000e+00 : f32
    %46 = vector.broadcast %cst_28 : f32 to vector<8x128xf32>
    %47 = vector.extract_strided_slice %45 {offsets = [0, 0], sizes = [8, 128], strides = [1, 1]} : vector<64x128xf32> to vector<8x128xf32>
    %48 = vector.extract_strided_slice %39 {offsets = [0, 0], sizes = [8, 128], strides = [1, 1]} : vector<64x128xf32> to vector<8x128xf32>
    %49 = arith.mulf %47, %46 : vector<8x128xf32>
    %cst_29 = arith.constant 1.000000e+00 : f32
    %50 = vector.broadcast %cst_29 : f32 to vector<8x128xf32>
    %51 = arith.subf %50, %47 : vector<8x128xf32>
    %52 = arith.mulf %51, %48 : vector<8x128xf32>
    %53 = arith.addf %49, %52 : vector<8x128xf32>
    %54 = vector.extract_strided_slice %45 {offsets = [8, 0], sizes = [8, 128], strides = [1, 1]} : vector<64x128xf32> to vector<8x128xf32>
    %55 = vector.extract_strided_slice %39 {offsets = [8, 0], sizes = [8, 128], strides = [1, 1]} : vector<64x128xf32> to vector<8x128xf32>
    %56 = arith.mulf %54, %53 : vector<8x128xf32>
    %cst_30 = arith.constant 1.000000e+00 : f32
    %57 = vector.broadcast %cst_30 : f32 to vector<8x128xf32>
    %58 = arith.subf %57, %54 : vector<8x128xf32>
    %59 = arith.mulf %58, %55 : vector<8x128xf32>
    %60 = arith.addf %56, %59 : vector<8x128xf32>
    %61 = vector.extract_strided_slice %45 {offsets = [16, 0], sizes = [8, 128], strides = [1, 1]} : vector<64x128xf32> to vector<8x128xf32>
    %62 = vector.extract_strided_slice %39 {offsets = [16, 0], sizes = [8, 128], strides = [1, 1]} : vector<64x128xf32> to vector<8x128xf32>
    %63 = arith.mulf %61, %60 : vector<8x128xf32>
    %cst_31 = arith.constant 1.000000e+00 : f32
    %64 = vector.broadcast %cst_31 : f32 to vector<8x128xf32>
    %65 = arith.subf %64, %61 : vector<8x128xf32>
    %66 = arith.mulf %65, %62 : vector<8x128xf32>
    %67 = arith.addf %63, %66 : vector<8x128xf32>
    %68 = vector.extract_strided_slice %45 {offsets = [24, 0], sizes = [8, 128], strides = [1, 1]} : vector<64x128xf32> to vector<8x128xf32>
    %69 = vector.extract_strided_slice %39 {offsets = [24, 0], sizes = [8, 128], strides = [1, 1]} : vector<64x128xf32> to vector<8x128xf32>
    %70 = arith.mulf %68, %67 : vector<8x128xf32>
    %cst_32 = arith.constant 1.000000e+00 : f32
    %71 = vector.broadcast %cst_32 : f32 to vector<8x128xf32>
    %72 = arith.subf %71, %68 : vector<8x128xf32>
    %73 = arith.mulf %72, %69 : vector<8x128xf32>
    %74 = arith.addf %70, %73 : vector<8x128xf32>
    %75 = vector.extract_strided_slice %45 {offsets = [32, 0], sizes = [8, 128], strides = [1, 1]} : vector<64x128xf32> to vector<8x128xf32>
    %76 = vector.extract_strided_slice %39 {offsets = [32, 0], sizes = [8, 128], strides = [1, 1]} : vector<64x128xf32> to vector<8x128xf32>
    %77 = arith.mulf %75, %74 : vector<8x128xf32>
    %cst_33 = arith.constant 1.000000e+00 : f32
    %78 = vector.broadcast %cst_33 : f32 to vector<8x128xf32>
    %79 = arith.subf %78, %75 : vector<8x128xf32>
    %80 = arith.mulf %79, %76 : vector<8x128xf32>
    %81 = arith.addf %77, %80 : vector<8x128xf32>
    %82 = vector.extract_strided_slice %45 {offsets = [40, 0], sizes = [8, 128], strides = [1, 1]} : vector<64x128xf32> to vector<8x128xf32>
    %83 = vector.extract_strided_slice %39 {offsets = [40, 0], sizes = [8, 128], strides = [1, 1]} : vector<64x128xf32> to vector<8x128xf32>
    %84 = arith.mulf %82, %81 : vector<8x128xf32>
    %cst_34 = arith.constant 1.000000e+00 : f32
    %85 = vector.broadcast %cst_34 : f32 to vector<8x128xf32>
    %86 = arith.subf %85, %82 : vector<8x128xf32>
    %87 = arith.mulf %86, %83 : vector<8x128xf32>
    %88 = arith.addf %84, %87 : vector<8x128xf32>
    %89 = vector.extract_strided_slice %45 {offsets = [48, 0], sizes = [8, 128], strides = [1, 1]} : vector<64x128xf32> to vector<8x128xf32>
    %90 = vector.extract_strided_slice %39 {offsets = [48, 0], sizes = [8, 128], strides = [1, 1]} : vector<64x128xf32> to vector<8x128xf32>
    %91 = arith.mulf %89, %88 : vector<8x128xf32>
    %cst_35 = arith.constant 1.000000e+00 : f32
    %92 = vector.broadcast %cst_35 : f32 to vector<8x128xf32>
    %93 = arith.subf %92, %89 : vector<8x128xf32>
    %94 = arith.mulf %93, %90 : vector<8x128xf32>
    %95 = arith.addf %91, %94 : vector<8x128xf32>
    %96 = vector.extract_strided_slice %45 {offsets = [56, 0], sizes = [8, 128], strides = [1, 1]} : vector<64x128xf32> to vector<8x128xf32>
    %97 = vector.extract_strided_slice %39 {offsets = [56, 0], sizes = [8, 128], strides = [1, 1]} : vector<64x128xf32> to vector<8x128xf32>
    %98 = arith.mulf %96, %95 : vector<8x128xf32>
    %cst_36 = arith.constant 1.000000e+00 : f32
    %99 = vector.broadcast %cst_36 : f32 to vector<8x128xf32>
    %100 = arith.subf %99, %96 : vector<8x128xf32>
    %101 = arith.mulf %100, %97 : vector<8x128xf32>
    %102 = arith.addf %98, %101 : vector<8x128xf32>
    %103 = tpu.concatenate %53, %60, %67, %74, %81, %88, %95, %102 in 0 : vector<8x128xf32>, vector<8x128xf32>, vector<8x128xf32>, vector<8x128xf32>, vector<8x128xf32>, vector<8x128xf32>, vector<8x128xf32>, vector<8x128xf32> -> vector<64x128xf32>
    %c0_37 = arith.constant 0 : index
    %c0_38 = arith.constant 0 : index
    %c0_39 = arith.constant 0 : index
    %104 = vector.load %arg2[%c0_37, %c0_38, %c0_39] : memref<1x64x128xf32, #tpu.memory_space<vmem>>, vector<1x64x128xf32>
    %105 = vector.shape_cast %104 : vector<1x64x128xf32> to vector<64x128xf32>
    %106 = arith.addf %103, %105 : vector<64x128xf32>
    %c0_40 = arith.constant 0 : index
    %c0_41 = arith.constant 0 : index
    %107 = vector.load %arg10[%c0_40, %c0_41] : memref<128x64xbf16, #tpu.memory_space<vmem>>, vector<128x64xbf16>
    %108 = arith.truncf %106 : vector<64x128xf32> to vector<64x128xbf16>
    %cst_42 = arith.constant dense<0.000000e+00> : vector<128x128xf32>
    %109 = tpu.matmul %107, %108, %cst_42 {dimension_numbers = #tpu.dot_dimension_numbers<[1], [0], [0], [1], [0, 0, 1, 1], [], []>} : vector<128x64xbf16>, vector<64x128xbf16>, vector<128x128xf32> -> vector<128x128xf32>
    %110 = vector.shape_cast %109 : vector<128x128xf32> to vector<8x16x128xf32>
    %cst_43 = arith.constant 0.000000e+00 : f32
    %111 = vector.broadcast %cst_43 : f32 to vector<8x1x128xf32>
    %112 = vector.extract_strided_slice %110 {offsets = [0, 0, 0], sizes = [8, 15, 128], strides = [1, 1, 1]} : vector<8x16x128xf32> to vector<8x15x128xf32>
    %113 = tpu.concatenate %111, %112 in 1 : vector<8x1x128xf32>, vector<8x15x128xf32> -> vector<8x16x128xf32>
    %114 = vector.extract_strided_slice %110 {offsets = [0, 1, 0], sizes = [8, 15, 128], strides = [1, 1, 1]} : vector<8x16x128xf32> to vector<8x15x128xf32>
    %115 = tpu.concatenate %114, %111 in 1 : vector<8x15x128xf32>, vector<8x1x128xf32> -> vector<8x16x128xf32>
    %116 = tpu.concatenate %113, %110, %115 in 2 : vector<8x16x128xf32>, vector<8x16x128xf32>, vector<8x16x128xf32> -> vector<8x16x384xf32>
    %117 = vector.shape_cast %116 : vector<8x16x384xf32> to vector<128x384xf32>
    %118 = arith.truncf %117 : vector<128x384xf32> to vector<128x384xbf16>
    %c1_44 = arith.constant 1 : index
    %c0_45 = arith.constant 0 : index
    %c0_46 = arith.constant 0 : index
    %119 = vector.load %arg5[%c1_44, %c0_45, %c0_46] : memref<3x384x256xbf16, #tpu.memory_space<vmem>>, vector<1x384x256xbf16>
    %120 = vector.shape_cast %119 : vector<1x384x256xbf16> to vector<384x256xbf16>
    %cst_47 = arith.constant dense<0.000000e+00> : vector<128x256xf32>
    %121 = tpu.matmul %118, %120, %cst_47 {dimension_numbers = #tpu.dot_dimension_numbers<[1], [0], [0], [1], [0, 0, 1, 1], [], []>} : vector<128x384xbf16>, vector<384x256xbf16>, vector<128x256xf32> -> vector<128x256xf32>
    %c0_48 = arith.constant 0 : index
    %c0_49 = arith.constant 0 : index
    %122 = vector.load %arg12[%c0_48, %c0_49] : memref<128x256xf32, #tpu.memory_space<vmem>>, vector<128x256xf32>
    tpu.vector_store %arg12[%c0_48, %c0_49], %121 {strides = array<i32>} : memref<128x256xf32, #tpu.memory_space<vmem>>, vector<128x256xf32>,
    %cst_50 = arith.constant 0.000000e+00 : f32
    %123 = vector.broadcast %cst_50 : f32 to vector<16x384xf32>
    %124 = vector.extract_strided_slice %117 {offsets = [0, 0], sizes = [112, 384], strides = [1, 1]} : vector<128x384xf32> to vector<112x384xf32>
    %125 = tpu.concatenate %123, %124 in 0 : vector<16x384xf32>, vector<112x384xf32> -> vector<128x384xf32>
    %c0_51 = arith.constant 0 : index
    %c0_52 = arith.constant 0 : index
    %126 = vector.load %arg12[%c0_51, %c0_52] : memref<128x256xf32, #tpu.memory_space<vmem>>, vector<128x256xf32>
    %127 = arith.truncf %125 : vector<128x384xf32> to vector<128x384xbf16>
    %c0_53 = arith.constant 0 : index
    %c0_54 = arith.constant 0 : index
    %c0_55 = arith.constant 0 : index
    %128 = vector.load %arg5[%c0_53, %c0_54, %c0_55] : memref<3x384x256xbf16, #tpu.memory_space<vmem>>, vector<1x384x256xbf16>
    %129 = vector.shape_cast %128 : vector<1x384x256xbf16> to vector<384x256xbf16>
    %cst_56 = arith.constant dense<0.000000e+00> : vector<128x256xf32>
    %130 = tpu.matmul %127, %129, %cst_56 {dimension_numbers = #tpu.dot_dimension_numbers<[1], [0], [0], [1], [0, 0, 1, 1], [], []>} : vector<128x384xbf16>, vector<384x256xbf16>, vector<128x256xf32> -> vector<128x256xf32>
    %131 = arith.addf %126, %130 : vector<128x256xf32>
    %c0_57 = arith.constant 0 : index
    %c0_58 = arith.constant 0 : index
    %132 = vector.load %arg12[%c0_57, %c0_58] : memref<128x256xf32, #tpu.memory_space<vmem>>, vector<128x256xf32>
    tpu.vector_store %arg12[%c0_57, %c0_58], %131 {strides = array<i32>} : memref<128x256xf32, #tpu.memory_space<vmem>>, vector<128x256xf32>,
    %133 = vector.extract_strided_slice %117 {offsets = [16, 0], sizes = [112, 384], strides = [1, 1]} : vector<128x384xf32> to vector<112x384xf32>
    %134 = tpu.concatenate %133, %123 in 0 : vector<112x384xf32>, vector<16x384xf32> -> vector<128x384xf32>
    %c0_59 = arith.constant 0 : index
    %c0_60 = arith.constant 0 : index
    %135 = vector.load %arg12[%c0_59, %c0_60] : memref<128x256xf32, #tpu.memory_space<vmem>>, vector<128x256xf32>
    %136 = arith.truncf %134 : vector<128x384xf32> to vector<128x384xbf16>
    %c2_61 = arith.constant 2 : index
    %c0_62 = arith.constant 0 : index
    %c0_63 = arith.constant 0 : index
    %137 = vector.load %arg5[%c2_61, %c0_62, %c0_63] : memref<3x384x256xbf16, #tpu.memory_space<vmem>>, vector<1x384x256xbf16>
    %138 = vector.shape_cast %137 : vector<1x384x256xbf16> to vector<384x256xbf16>
    %cst_64 = arith.constant dense<0.000000e+00> : vector<128x256xf32>
    %139 = tpu.matmul %136, %138, %cst_64 {dimension_numbers = #tpu.dot_dimension_numbers<[1], [0], [0], [1], [0, 0, 1, 1], [], []>} : vector<128x384xbf16>, vector<384x256xbf16>, vector<128x256xf32> -> vector<128x256xf32>
    %140 = arith.addf %135, %139 : vector<128x256xf32>
    %c0_65 = arith.constant 0 : index
    %c0_66 = arith.constant 0 : index
    %141 = vector.load %arg12[%c0_65, %c0_66] : memref<128x256xf32, #tpu.memory_space<vmem>>, vector<128x256xf32>
    tpu.vector_store %arg12[%c0_65, %c0_66], %140 {strides = array<i32>} : memref<128x256xf32, #tpu.memory_space<vmem>>, vector<128x256xf32>,
    %c0_67 = arith.constant 0 : index
    %c0_68 = arith.constant 0 : index
    %142 = vector.load %arg12[%c0_67, %c0_68] : memref<128x256xf32, #tpu.memory_space<vmem>>, vector<128x256xf32>
    %c0_69 = arith.constant 0 : index
    %c0_70 = arith.constant 0 : index
    %143 = vector.load %arg8[%c0_69, %c0_70] : memref<1x256xf32, #tpu.memory_space<vmem>>, vector<1x256xf32>
    %144 = vector.broadcast %143 : vector<1x256xf32> to vector<128x256xf32>
    %145 = arith.addf %142, %144 : vector<128x256xf32>
    %146 = vector.extract_strided_slice %145 {offsets = [0, 0], sizes = [128, 128], strides = [1, 1]} : vector<128x256xf32> to vector<128x128xf32>
    %147 = math.tanh %146 : vector<128x128xf32>
    %148 = vector.extract_strided_slice %145 {offsets = [0, 128], sizes = [128, 128], strides = [1, 1]} : vector<128x256xf32> to vector<128x128xf32>
    %149 = arith.negf %148 : vector<128x128xf32>
    %150 = math.exp %149 : vector<128x128xf32>
    %cst_71 = arith.constant 1.000000e+00 : f32
    %151 = vector.broadcast %cst_71 : f32 to vector<128x128xf32>
    %152 = arith.addf %151, %150 : vector<128x128xf32>
    %153 = arith.divf %151, %152 : vector<128x128xf32>
    %cst_72 = arith.constant 0.000000e+00 : f32
    %154 = vector.broadcast %cst_72 : f32 to vector<16x128xf32>
    %155 = vector.extract_strided_slice %153 {offsets = [112, 0], sizes = [16, 128], strides = [1, 1]} : vector<128x128xf32> to vector<16x128xf32>
    %156 = vector.extract_strided_slice %147 {offsets = [112, 0], sizes = [16, 128], strides = [1, 1]} : vector<128x128xf32> to vector<16x128xf32>
    %157 = arith.mulf %155, %154 : vector<16x128xf32>
    %cst_73 = arith.constant 1.000000e+00 : f32
    %158 = vector.broadcast %cst_73 : f32 to vector<16x128xf32>
    %159 = arith.subf %158, %155 : vector<16x128xf32>
    %160 = arith.mulf %159, %156 : vector<16x128xf32>
    %161 = arith.addf %157, %160 : vector<16x128xf32>
    %162 = vector.extract_strided_slice %153 {offsets = [96, 0], sizes = [16, 128], strides = [1, 1]} : vector<128x128xf32> to vector<16x128xf32>
    %163 = vector.extract_strided_slice %147 {offsets = [96, 0], sizes = [16, 128], strides = [1, 1]} : vector<128x128xf32> to vector<16x128xf32>
    %164 = arith.mulf %162, %161 : vector<16x128xf32>
    %cst_74 = arith.constant 1.000000e+00 : f32
    %165 = vector.broadcast %cst_74 : f32 to vector<16x128xf32>
    %166 = arith.subf %165, %162 : vector<16x128xf32>
    %167 = arith.mulf %166, %163 : vector<16x128xf32>
    %168 = arith.addf %164, %167 : vector<16x128xf32>
    %169 = vector.extract_strided_slice %153 {offsets = [80, 0], sizes = [16, 128], strides = [1, 1]} : vector<128x128xf32> to vector<16x128xf32>
    %170 = vector.extract_strided_slice %147 {offsets = [80, 0], sizes = [16, 128], strides = [1, 1]} : vector<128x128xf32> to vector<16x128xf32>
    %171 = arith.mulf %169, %168 : vector<16x128xf32>
    %cst_75 = arith.constant 1.000000e+00 : f32
    %172 = vector.broadcast %cst_75 : f32 to vector<16x128xf32>
    %173 = arith.subf %172, %169 : vector<16x128xf32>
    %174 = arith.mulf %173, %170 : vector<16x128xf32>
    %175 = arith.addf %171, %174 : vector<16x128xf32>
    %176 = vector.extract_strided_slice %153 {offsets = [64, 0], sizes = [16, 128], strides = [1, 1]} : vector<128x128xf32> to vector<16x128xf32>
    %177 = vector.extract_strided_slice %147 {offsets = [64, 0], sizes = [16, 128], strides = [1, 1]} : vector<128x128xf32> to vector<16x128xf32>
    %178 = arith.mulf %176, %175 : vector<16x128xf32>
    %cst_76 = arith.constant 1.000000e+00 : f32
    %179 = vector.broadcast %cst_76 : f32 to vector<16x128xf32>
    %180 = arith.subf %179, %176 : vector<16x128xf32>
    %181 = arith.mulf %180, %177 : vector<16x128xf32>
    %182 = arith.addf %178, %181 : vector<16x128xf32>
    %183 = vector.extract_strided_slice %153 {offsets = [48, 0], sizes = [16, 128], strides = [1, 1]} : vector<128x128xf32> to vector<16x128xf32>
    %184 = vector.extract_strided_slice %147 {offsets = [48, 0], sizes = [16, 128], strides = [1, 1]} : vector<128x128xf32> to vector<16x128xf32>
    %185 = arith.mulf %183, %182 : vector<16x128xf32>
    %cst_77 = arith.constant 1.000000e+00 : f32
    %186 = vector.broadcast %cst_77 : f32 to vector<16x128xf32>
    %187 = arith.subf %186, %183 : vector<16x128xf32>
    %188 = arith.mulf %187, %184 : vector<16x128xf32>
    %189 = arith.addf %185, %188 : vector<16x128xf32>
    %190 = vector.extract_strided_slice %153 {offsets = [32, 0], sizes = [16, 128], strides = [1, 1]} : vector<128x128xf32> to vector<16x128xf32>
    %191 = vector.extract_strided_slice %147 {offsets = [32, 0], sizes = [16, 128], strides = [1, 1]} : vector<128x128xf32> to vector<16x128xf32>
    %192 = arith.mulf %190, %189 : vector<16x128xf32>
    %cst_78 = arith.constant 1.000000e+00 : f32
    %193 = vector.broadcast %cst_78 : f32 to vector<16x128xf32>
    %194 = arith.subf %193, %190 : vector<16x128xf32>
    %195 = arith.mulf %194, %191 : vector<16x128xf32>
    %196 = arith.addf %192, %195 : vector<16x128xf32>
    %197 = vector.extract_strided_slice %153 {offsets = [16, 0], sizes = [16, 128], strides = [1, 1]} : vector<128x128xf32> to vector<16x128xf32>
    %198 = vector.extract_strided_slice %147 {offsets = [16, 0], sizes = [16, 128], strides = [1, 1]} : vector<128x128xf32> to vector<16x128xf32>
    %199 = arith.mulf %197, %196 : vector<16x128xf32>
    %cst_79 = arith.constant 1.000000e+00 : f32
    %200 = vector.broadcast %cst_79 : f32 to vector<16x128xf32>
    %201 = arith.subf %200, %197 : vector<16x128xf32>
    %202 = arith.mulf %201, %198 : vector<16x128xf32>
    %203 = arith.addf %199, %202 : vector<16x128xf32>
    %204 = vector.extract_strided_slice %153 {offsets = [0, 0], sizes = [16, 128], strides = [1, 1]} : vector<128x128xf32> to vector<16x128xf32>
    %205 = vector.extract_strided_slice %147 {offsets = [0, 0], sizes = [16, 128], strides = [1, 1]} : vector<128x128xf32> to vector<16x128xf32>
    %206 = arith.mulf %204, %203 : vector<16x128xf32>
    %cst_80 = arith.constant 1.000000e+00 : f32
    %207 = vector.broadcast %cst_80 : f32 to vector<16x128xf32>
    %208 = arith.subf %207, %204 : vector<16x128xf32>
    %209 = arith.mulf %208, %205 : vector<16x128xf32>
    %210 = arith.addf %206, %209 : vector<16x128xf32>
    %211 = tpu.concatenate %210, %203, %196, %189, %182, %175, %168, %161 in 0 : vector<16x128xf32>, vector<16x128xf32>, vector<16x128xf32>, vector<16x128xf32>, vector<16x128xf32>, vector<16x128xf32>, vector<16x128xf32>, vector<16x128xf32> -> vector<128x128xf32>
    %c0_81 = arith.constant 0 : index
    %c0_82 = arith.constant 0 : index
    %c0_83 = arith.constant 0 : index
    %212 = vector.load %arg3[%c0_81, %c0_82, %c0_83] : memref<1x128x128xf32, #tpu.memory_space<vmem>>, vector<1x128x128xf32>
    %213 = vector.shape_cast %212 : vector<1x128x128xf32> to vector<128x128xf32>
    %214 = arith.addf %211, %213 : vector<128x128xf32>
    %215 = vector.shape_cast %214 : vector<128x128xf32> to vector<8x16x128xf32>
    %cst_84 = arith.constant 0.000000e+00 : f32
    %216 = vector.broadcast %cst_84 : f32 to vector<8x1x128xf32>
    %217 = vector.extract_strided_slice %215 {offsets = [0, 0, 0], sizes = [8, 15, 128], strides = [1, 1, 1]} : vector<8x16x128xf32> to vector<8x15x128xf32>
    %218 = tpu.concatenate %216, %217 in 1 : vector<8x1x128xf32>, vector<8x15x128xf32> -> vector<8x16x128xf32>
    %219 = vector.extract_strided_slice %215 {offsets = [0, 1, 0], sizes = [8, 15, 128], strides = [1, 1, 1]} : vector<8x16x128xf32> to vector<8x15x128xf32>
    %220 = tpu.concatenate %219, %216 in 1 : vector<8x15x128xf32>, vector<8x1x128xf32> -> vector<8x16x128xf32>
    %221 = tpu.concatenate %218, %215, %220 in 2 : vector<8x16x128xf32>, vector<8x16x128xf32>, vector<8x16x128xf32> -> vector<8x16x384xf32>
    %222 = vector.shape_cast %221 : vector<8x16x384xf32> to vector<128x384xf32>
    %223 = arith.truncf %222 : vector<128x384xf32> to vector<128x384xbf16>
    %c1_85 = arith.constant 1 : index
    %c0_86 = arith.constant 0 : index
    %c0_87 = arith.constant 0 : index
    %224 = vector.load %arg6[%c1_85, %c0_86, %c0_87] : memref<3x384x256xbf16, #tpu.memory_space<vmem>>, vector<1x384x256xbf16>
    %225 = vector.shape_cast %224 : vector<1x384x256xbf16> to vector<384x256xbf16>
    %cst_88 = arith.constant dense<0.000000e+00> : vector<128x256xf32>
    %226 = tpu.matmul %223, %225, %cst_88 {dimension_numbers = #tpu.dot_dimension_numbers<[1], [0], [0], [1], [0, 0, 1, 1], [], []>} : vector<128x384xbf16>, vector<384x256xbf16>, vector<128x256xf32> -> vector<128x256xf32>
    %c0_89 = arith.constant 0 : index
    %c0_90 = arith.constant 0 : index
    %227 = vector.load %arg12[%c0_89, %c0_90] : memref<128x256xf32, #tpu.memory_space<vmem>>, vector<128x256xf32>
    tpu.vector_store %arg12[%c0_89, %c0_90], %226 {strides = array<i32>} : memref<128x256xf32, #tpu.memory_space<vmem>>, vector<128x256xf32>,
    %cst_91 = arith.constant 0.000000e+00 : f32
    %228 = vector.broadcast %cst_91 : f32 to vector<16x384xf32>
    %229 = vector.extract_strided_slice %222 {offsets = [0, 0], sizes = [112, 384], strides = [1, 1]} : vector<128x384xf32> to vector<112x384xf32>
    %230 = tpu.concatenate %228, %229 in 0 : vector<16x384xf32>, vector<112x384xf32> -> vector<128x384xf32>
    %c0_92 = arith.constant 0 : index
    %c0_93 = arith.constant 0 : index
    %231 = vector.load %arg12[%c0_92, %c0_93] : memref<128x256xf32, #tpu.memory_space<vmem>>, vector<128x256xf32>
    %232 = arith.truncf %230 : vector<128x384xf32> to vector<128x384xbf16>
    %c0_94 = arith.constant 0 : index
    %c0_95 = arith.constant 0 : index
    %c0_96 = arith.constant 0 : index
    %233 = vector.load %arg6[%c0_94, %c0_95, %c0_96] : memref<3x384x256xbf16, #tpu.memory_space<vmem>>, vector<1x384x256xbf16>
    %234 = vector.shape_cast %233 : vector<1x384x256xbf16> to vector<384x256xbf16>
    %cst_97 = arith.constant dense<0.000000e+00> : vector<128x256xf32>
    %235 = tpu.matmul %232, %234, %cst_97 {dimension_numbers = #tpu.dot_dimension_numbers<[1], [0], [0], [1], [0, 0, 1, 1], [], []>} : vector<128x384xbf16>, vector<384x256xbf16>, vector<128x256xf32> -> vector<128x256xf32>
    %236 = arith.addf %231, %235 : vector<128x256xf32>
    %c0_98 = arith.constant 0 : index
    %c0_99 = arith.constant 0 : index
    %237 = vector.load %arg12[%c0_98, %c0_99] : memref<128x256xf32, #tpu.memory_space<vmem>>, vector<128x256xf32>
    tpu.vector_store %arg12[%c0_98, %c0_99], %236 {strides = array<i32>} : memref<128x256xf32, #tpu.memory_space<vmem>>, vector<128x256xf32>,
    %238 = vector.extract_strided_slice %222 {offsets = [16, 0], sizes = [112, 384], strides = [1, 1]} : vector<128x384xf32> to vector<112x384xf32>
    %239 = tpu.concatenate %238, %228 in 0 : vector<112x384xf32>, vector<16x384xf32> -> vector<128x384xf32>
    %c0_100 = arith.constant 0 : index
    %c0_101 = arith.constant 0 : index
    %240 = vector.load %arg12[%c0_100, %c0_101] : memref<128x256xf32, #tpu.memory_space<vmem>>, vector<128x256xf32>
    %241 = arith.truncf %239 : vector<128x384xf32> to vector<128x384xbf16>
    %c2_102 = arith.constant 2 : index
    %c0_103 = arith.constant 0 : index
    %c0_104 = arith.constant 0 : index
    %242 = vector.load %arg6[%c2_102, %c0_103, %c0_104] : memref<3x384x256xbf16, #tpu.memory_space<vmem>>, vector<1x384x256xbf16>
    %243 = vector.shape_cast %242 : vector<1x384x256xbf16> to vector<384x256xbf16>
    %cst_105 = arith.constant dense<0.000000e+00> : vector<128x256xf32>
    %244 = tpu.matmul %241, %243, %cst_105 {dimension_numbers = #tpu.dot_dimension_numbers<[1], [0], [0], [1], [0, 0, 1, 1], [], []>} : vector<128x384xbf16>, vector<384x256xbf16>, vector<128x256xf32> -> vector<128x256xf32>
    %245 = arith.addf %240, %244 : vector<128x256xf32>
    %c0_106 = arith.constant 0 : index
    %c0_107 = arith.constant 0 : index
    %246 = vector.load %arg12[%c0_106, %c0_107] : memref<128x256xf32, #tpu.memory_space<vmem>>, vector<128x256xf32>
    tpu.vector_store %arg12[%c0_106, %c0_107], %245 {strides = array<i32>} : memref<128x256xf32, #tpu.memory_space<vmem>>, vector<128x256xf32>,
    %c0_108 = arith.constant 0 : index
    %c0_109 = arith.constant 0 : index
    %247 = vector.load %arg12[%c0_108, %c0_109] : memref<128x256xf32, #tpu.memory_space<vmem>>, vector<128x256xf32>
    %c0_110 = arith.constant 0 : index
    %c0_111 = arith.constant 0 : index
    %248 = vector.load %arg9[%c0_110, %c0_111] : memref<1x256xf32, #tpu.memory_space<vmem>>, vector<1x256xf32>
    %249 = vector.broadcast %248 : vector<1x256xf32> to vector<128x256xf32>
    %250 = arith.addf %247, %249 : vector<128x256xf32>
    %251 = vector.extract_strided_slice %250 {offsets = [0, 0], sizes = [128, 128], strides = [1, 1]} : vector<128x256xf32> to vector<128x128xf32>
    %252 = math.tanh %251 : vector<128x128xf32>
    %253 = vector.extract_strided_slice %250 {offsets = [0, 128], sizes = [128, 128], strides = [1, 1]} : vector<128x256xf32> to vector<128x128xf32>
    %254 = arith.negf %253 : vector<128x128xf32>
    %255 = math.exp %254 : vector<128x128xf32>
    %cst_112 = arith.constant 1.000000e+00 : f32
    %256 = vector.broadcast %cst_112 : f32 to vector<128x128xf32>
    %257 = arith.addf %256, %255 : vector<128x128xf32>
    %258 = arith.divf %256, %257 : vector<128x128xf32>
    %cst_113 = arith.constant 0.000000e+00 : f32
    %259 = vector.broadcast %cst_113 : f32 to vector<16x128xf32>
    %260 = vector.extract_strided_slice %258 {offsets = [0, 0], sizes = [16, 128], strides = [1, 1]} : vector<128x128xf32> to vector<16x128xf32>
    %261 = vector.extract_strided_slice %252 {offsets = [0, 0], sizes = [16, 128], strides = [1, 1]} : vector<128x128xf32> to vector<16x128xf32>
    %262 = arith.mulf %260, %259 : vector<16x128xf32>
    %cst_114 = arith.constant 1.000000e+00 : f32
    %263 = vector.broadcast %cst_114 : f32 to vector<16x128xf32>
    %264 = arith.subf %263, %260 : vector<16x128xf32>
    %265 = arith.mulf %264, %261 : vector<16x128xf32>
    %266 = arith.addf %262, %265 : vector<16x128xf32>
    %c0_115 = arith.constant 0 : index
    %c0_116 = arith.constant 0 : index
    %c0_117 = arith.constant 0 : index
    %267 = vector.load %arg11[%c0_115, %c0_116, %c0_117] : memref<1x128x128xf32, #tpu.memory_space<vmem>>, vector<1x16x128xf32>
    %268 = vector.shape_cast %267 : vector<1x16x128xf32> to vector<16x128xf32>
    %269 = vector.shape_cast %266 : vector<16x128xf32> to vector<1x16x128xf32>
    tpu.vector_store %arg11[%c0_115, %c0_116, %c0_117], %269 {strides = array<i32>} : memref<1x128x128xf32, #tpu.memory_space<vmem>>, vector<1x16x128xf32>,
    %270 = vector.extract_strided_slice %258 {offsets = [16, 0], sizes = [16, 128], strides = [1, 1]} : vector<128x128xf32> to vector<16x128xf32>
    %271 = vector.extract_strided_slice %252 {offsets = [16, 0], sizes = [16, 128], strides = [1, 1]} : vector<128x128xf32> to vector<16x128xf32>
    %272 = arith.mulf %270, %266 : vector<16x128xf32>
    %cst_118 = arith.constant 1.000000e+00 : f32
    %273 = vector.broadcast %cst_118 : f32 to vector<16x128xf32>
    %274 = arith.subf %273, %270 : vector<16x128xf32>
    %275 = arith.mulf %274, %271 : vector<16x128xf32>
    %276 = arith.addf %272, %275 : vector<16x128xf32>
    %c0_119 = arith.constant 0 : index
    %c16 = arith.constant 16 : index
    %c0_120 = arith.constant 0 : index
    %277 = vector.load %arg11[%c0_119, %c16, %c0_120] : memref<1x128x128xf32, #tpu.memory_space<vmem>>, vector<1x16x128xf32>
    %278 = vector.shape_cast %277 : vector<1x16x128xf32> to vector<16x128xf32>
    %279 = vector.shape_cast %276 : vector<16x128xf32> to vector<1x16x128xf32>
    tpu.vector_store %arg11[%c0_119, %c16, %c0_120], %279 {strides = array<i32>} : memref<1x128x128xf32, #tpu.memory_space<vmem>>, vector<1x16x128xf32>,
    %280 = vector.extract_strided_slice %258 {offsets = [32, 0], sizes = [16, 128], strides = [1, 1]} : vector<128x128xf32> to vector<16x128xf32>
    %281 = vector.extract_strided_slice %252 {offsets = [32, 0], sizes = [16, 128], strides = [1, 1]} : vector<128x128xf32> to vector<16x128xf32>
    %282 = arith.mulf %280, %276 : vector<16x128xf32>
    %cst_121 = arith.constant 1.000000e+00 : f32
    %283 = vector.broadcast %cst_121 : f32 to vector<16x128xf32>
    %284 = arith.subf %283, %280 : vector<16x128xf32>
    %285 = arith.mulf %284, %281 : vector<16x128xf32>
    %286 = arith.addf %282, %285 : vector<16x128xf32>
    %c0_122 = arith.constant 0 : index
    %c32 = arith.constant 32 : index
    %c0_123 = arith.constant 0 : index
    %287 = vector.load %arg11[%c0_122, %c32, %c0_123] : memref<1x128x128xf32, #tpu.memory_space<vmem>>, vector<1x16x128xf32>
    %288 = vector.shape_cast %287 : vector<1x16x128xf32> to vector<16x128xf32>
    %289 = vector.shape_cast %286 : vector<16x128xf32> to vector<1x16x128xf32>
    tpu.vector_store %arg11[%c0_122, %c32, %c0_123], %289 {strides = array<i32>} : memref<1x128x128xf32, #tpu.memory_space<vmem>>, vector<1x16x128xf32>,
    %290 = vector.extract_strided_slice %258 {offsets = [48, 0], sizes = [16, 128], strides = [1, 1]} : vector<128x128xf32> to vector<16x128xf32>
    %291 = vector.extract_strided_slice %252 {offsets = [48, 0], sizes = [16, 128], strides = [1, 1]} : vector<128x128xf32> to vector<16x128xf32>
    %292 = arith.mulf %290, %286 : vector<16x128xf32>
    %cst_124 = arith.constant 1.000000e+00 : f32
    %293 = vector.broadcast %cst_124 : f32 to vector<16x128xf32>
    %294 = arith.subf %293, %290 : vector<16x128xf32>
    %295 = arith.mulf %294, %291 : vector<16x128xf32>
    %296 = arith.addf %292, %295 : vector<16x128xf32>
    %c0_125 = arith.constant 0 : index
    %c48 = arith.constant 48 : index
    %c0_126 = arith.constant 0 : index
    %297 = vector.load %arg11[%c0_125, %c48, %c0_126] : memref<1x128x128xf32, #tpu.memory_space<vmem>>, vector<1x16x128xf32>
    %298 = vector.shape_cast %297 : vector<1x16x128xf32> to vector<16x128xf32>
    %299 = vector.shape_cast %296 : vector<16x128xf32> to vector<1x16x128xf32>
    tpu.vector_store %arg11[%c0_125, %c48, %c0_126], %299 {strides = array<i32>} : memref<1x128x128xf32, #tpu.memory_space<vmem>>, vector<1x16x128xf32>,
    %300 = vector.extract_strided_slice %258 {offsets = [64, 0], sizes = [16, 128], strides = [1, 1]} : vector<128x128xf32> to vector<16x128xf32>
    %301 = vector.extract_strided_slice %252 {offsets = [64, 0], sizes = [16, 128], strides = [1, 1]} : vector<128x128xf32> to vector<16x128xf32>
    %302 = arith.mulf %300, %296 : vector<16x128xf32>
    %cst_127 = arith.constant 1.000000e+00 : f32
    %303 = vector.broadcast %cst_127 : f32 to vector<16x128xf32>
    %304 = arith.subf %303, %300 : vector<16x128xf32>
    %305 = arith.mulf %304, %301 : vector<16x128xf32>
    %306 = arith.addf %302, %305 : vector<16x128xf32>
    %c0_128 = arith.constant 0 : index
    %c64 = arith.constant 64 : index
    %c0_129 = arith.constant 0 : index
    %307 = vector.load %arg11[%c0_128, %c64, %c0_129] : memref<1x128x128xf32, #tpu.memory_space<vmem>>, vector<1x16x128xf32>
    %308 = vector.shape_cast %307 : vector<1x16x128xf32> to vector<16x128xf32>
    %309 = vector.shape_cast %306 : vector<16x128xf32> to vector<1x16x128xf32>
    tpu.vector_store %arg11[%c0_128, %c64, %c0_129], %309 {strides = array<i32>} : memref<1x128x128xf32, #tpu.memory_space<vmem>>, vector<1x16x128xf32>,
    %310 = vector.extract_strided_slice %258 {offsets = [80, 0], sizes = [16, 128], strides = [1, 1]} : vector<128x128xf32> to vector<16x128xf32>
    %311 = vector.extract_strided_slice %252 {offsets = [80, 0], sizes = [16, 128], strides = [1, 1]} : vector<128x128xf32> to vector<16x128xf32>
    %312 = arith.mulf %310, %306 : vector<16x128xf32>
    %cst_130 = arith.constant 1.000000e+00 : f32
    %313 = vector.broadcast %cst_130 : f32 to vector<16x128xf32>
    %314 = arith.subf %313, %310 : vector<16x128xf32>
    %315 = arith.mulf %314, %311 : vector<16x128xf32>
    %316 = arith.addf %312, %315 : vector<16x128xf32>
    %c0_131 = arith.constant 0 : index
    %c80 = arith.constant 80 : index
    %c0_132 = arith.constant 0 : index
    %317 = vector.load %arg11[%c0_131, %c80, %c0_132] : memref<1x128x128xf32, #tpu.memory_space<vmem>>, vector<1x16x128xf32>
    %318 = vector.shape_cast %317 : vector<1x16x128xf32> to vector<16x128xf32>
    %319 = vector.shape_cast %316 : vector<16x128xf32> to vector<1x16x128xf32>
    tpu.vector_store %arg11[%c0_131, %c80, %c0_132], %319 {strides = array<i32>} : memref<1x128x128xf32, #tpu.memory_space<vmem>>, vector<1x16x128xf32>,
    %320 = vector.extract_strided_slice %258 {offsets = [96, 0], sizes = [16, 128], strides = [1, 1]} : vector<128x128xf32> to vector<16x128xf32>
    %321 = vector.extract_strided_slice %252 {offsets = [96, 0], sizes = [16, 128], strides = [1, 1]} : vector<128x128xf32> to vector<16x128xf32>
    %322 = arith.mulf %320, %316 : vector<16x128xf32>
    %cst_133 = arith.constant 1.000000e+00 : f32
    %323 = vector.broadcast %cst_133 : f32 to vector<16x128xf32>
    %324 = arith.subf %323, %320 : vector<16x128xf32>
    %325 = arith.mulf %324, %321 : vector<16x128xf32>
    %326 = arith.addf %322, %325 : vector<16x128xf32>
    %c0_134 = arith.constant 0 : index
    %c96 = arith.constant 96 : index
    %c0_135 = arith.constant 0 : index
    %327 = vector.load %arg11[%c0_134, %c96, %c0_135] : memref<1x128x128xf32, #tpu.memory_space<vmem>>, vector<1x16x128xf32>
    %328 = vector.shape_cast %327 : vector<1x16x128xf32> to vector<16x128xf32>
    %329 = vector.shape_cast %326 : vector<16x128xf32> to vector<1x16x128xf32>
    tpu.vector_store %arg11[%c0_134, %c96, %c0_135], %329 {strides = array<i32>} : memref<1x128x128xf32, #tpu.memory_space<vmem>>, vector<1x16x128xf32>,
    %330 = vector.extract_strided_slice %258 {offsets = [112, 0], sizes = [16, 128], strides = [1, 1]} : vector<128x128xf32> to vector<16x128xf32>
    %331 = vector.extract_strided_slice %252 {offsets = [112, 0], sizes = [16, 128], strides = [1, 1]} : vector<128x128xf32> to vector<16x128xf32>
    %332 = arith.mulf %330, %326 : vector<16x128xf32>
    %cst_136 = arith.constant 1.000000e+00 : f32
    %333 = vector.broadcast %cst_136 : f32 to vector<16x128xf32>
    %334 = arith.subf %333, %330 : vector<16x128xf32>
    %335 = arith.mulf %334, %331 : vector<16x128xf32>
    %336 = arith.addf %332, %335 : vector<16x128xf32>
    %c0_137 = arith.constant 0 : index
    %c112 = arith.constant 112 : index
    %c0_138 = arith.constant 0 : index
    %337 = vector.load %arg11[%c0_137, %c112, %c0_138] : memref<1x128x128xf32, #tpu.memory_space<vmem>>, vector<1x16x128xf32>
    %338 = vector.shape_cast %337 : vector<1x16x128xf32> to vector<16x128xf32>
    %339 = vector.shape_cast %336 : vector<16x128xf32> to vector<1x16x128xf32>
    tpu.vector_store %arg11[%c0_137, %c112, %c0_138], %339 {strides = array<i32>} : memref<1x128x128xf32, #tpu.memory_space<vmem>>, vector<1x16x128xf32>,
    return
  }
  func.func @transform_0(%arg0: i32) -> (i32, i32, i32) {
    %c0_i32 = arith.constant 0 : i32
    %c0_i32_0 = arith.constant 0 : i32
    %c0_i32_1 = arith.constant 0 : i32
    return %arg0, %c0_i32, %c0_i32_0 : i32, i32, i32
  }
  func.func @transform_1(%arg0: i32) -> (i32, i32, i32) {
    %c0_i32 = arith.constant 0 : i32
    %c0_i32_0 = arith.constant 0 : i32
    %c0_i32_1 = arith.constant 0 : i32
    return %arg0, %c0_i32, %c0_i32_0 : i32, i32, i32
  }
  func.func @transform_2(%arg0: i32) -> (i32, i32, i32) {
    %c0_i32 = arith.constant 0 : i32
    %c0_i32_0 = arith.constant 0 : i32
    %c0_i32_1 = arith.constant 0 : i32
    return %arg0, %c0_i32, %c0_i32_0 : i32, i32, i32
  }
  func.func @transform_3(%arg0: i32) -> (i32, i32, i32) {
    %c0_i32 = arith.constant 0 : i32
    %c0_i32_0 = arith.constant 0 : i32
    %c0_i32_1 = arith.constant 0 : i32
    %c0_i32_2 = arith.constant 0 : i32
    return %c0_i32, %c0_i32_0, %c0_i32_1 : i32, i32, i32
  }
  func.func @transform_4(%arg0: i32) -> (i32, i32, i32) {
    %c0_i32 = arith.constant 0 : i32
    %c0_i32_0 = arith.constant 0 : i32
    %c0_i32_1 = arith.constant 0 : i32
    %c0_i32_2 = arith.constant 0 : i32
    return %c0_i32, %c0_i32_0, %c0_i32_1 : i32, i32, i32
  }
  func.func @transform_5(%arg0: i32) -> (i32, i32, i32) {
    %c0_i32 = arith.constant 0 : i32
    %c0_i32_0 = arith.constant 0 : i32
    %c0_i32_1 = arith.constant 0 : i32
    %c0_i32_2 = arith.constant 0 : i32
    return %c0_i32, %c0_i32_0, %c0_i32_1 : i32, i32, i32
  }
  func.func @transform_6(%arg0: i32) -> (i32, i32) {
    %c0_i32 = arith.constant 0 : i32
    %c0_i32_0 = arith.constant 0 : i32
    %c0_i32_1 = arith.constant 0 : i32
    return %c0_i32, %c0_i32_0 : i32, i32
  }
  func.func @transform_7(%arg0: i32) -> (i32, i32) {
    %c0_i32 = arith.constant 0 : i32
    %c0_i32_0 = arith.constant 0 : i32
    %c0_i32_1 = arith.constant 0 : i32
    return %c0_i32, %c0_i32_0 : i32, i32
  }
  func.func @transform_8(%arg0: i32) -> (i32, i32) {
    %c0_i32 = arith.constant 0 : i32
    %c0_i32_0 = arith.constant 0 : i32
    %c0_i32_1 = arith.constant 0 : i32
    return %c0_i32, %c0_i32_0 : i32, i32
  }
  func.func @transform_9(%arg0: i32) -> (i32, i32) {
    %c0_i32 = arith.constant 0 : i32
    %c0_i32_0 = arith.constant 0 : i32
    %c0_i32_1 = arith.constant 0 : i32
    return %c0_i32, %c0_i32_0 : i32, i32
  }
  func.func @transform_10(%arg0: i32) -> (i32, i32, i32) {
    %c0_i32 = arith.constant 0 : i32
    %c0_i32_0 = arith.constant 0 : i32
    %c0_i32_1 = arith.constant 0 : i32
    return %arg0, %c0_i32, %c0_i32_0 : i32, i32, i32
  }
}

</mosaic_0001>

<bundles_post_ra>
// kernel: mul.69
= control target key start
LH: loop header
LB: loop body
LE: loop exit
PB: predicated region body
PF: predicated region fallthrough
CT: control target
= control target key end

     0   :  { %s7_s6 = smov 3  ;;  %s21_s9 = smov 3  ;;  %vm4_vm0 = vcmask 64512   ;;  %vm11_vm1 = vcmask 1048512   ;;  %vm18_vm2 = vcmask 982912   ;;  %vm25_vm3 = vcmask 917312   ;;  %s223_s0 = inlined_call_operand.vmem [shape: f32[2,16,8], index: 0, kind: input, shape index: {}]   ;;  %s224_s1 = inlined_call_operand.vmem [shape: f32[256], index: 1, kind: output, shape index: {}]  }
   0x1   :  { %v117_v0 = vld [vmem:[%s223_s0 + $0xf] ss:$16 sm:%s7_s6]   ;;  %s147_s10 = smov 120   ;;  %v119_v1 = vld [vmem:[%s223_s0 + $0xd] ss:$16 sm:%s21_s9]   ;;  %s14_s13 = smov 3 }
   0x2   :  { %9 = vrot.lane.b32.xlu0 %v117_v0, %s147_s10  ;;  %s148_s14 = smov 104   ;;  %v118_v2 = vld [vmem:[%s223_s0 + $0xe] ss:$16 sm:%s14_s13]   ;;  %s28_s17 = smov 3  ;;  %vm32_vm4 = vcmask 851712   ;;  %vm39_vm5 = vcmask 786112  }
   0x3   :  { %23 = vrot.lane.b32.xlu1 %v119_v1, %s148_s14  ;;  %v120_v3 = vld [vmem:[%s223_s0 + $0xc] ss:$16 sm:%s28_s17]   ;;  %s35_s20 = smov 3  ;;  %s42_s21 = smov 3  ;;  %vm46_vm6 = vcmask 720512   ;;  %vm53_vm7 = vcmask 654912  }
   0x4   :  { %s149_s22 = smov 112   ;;  %s150_s23 = smov 96   ;;  %v121_v4 = vld [vmem:[%s223_s0 + $0xb] ss:$16 sm:%s35_s20]   ;;  %v122_v5 = vld [vmem:[%s223_s0 + $0xa] ss:$16 sm:%s42_s21]  }
   0x5   :  { %s49_s28 = smov 3  ;;  %s56_s29 = smov 3  ;;  %vm60_vm8 = vcmask 589312   ;;  %vm67_vm9 = vcmask 523712   ;;  %vm74_vm10 = vcmask 458112   ;;  %vm81_vm11 = vcmask 392512  }
   0x6   :  { %16 = vrot.lane.b32.xlu0 %v118_v2, %s149_s22  ;;  %s151_s30 = smov 88   ;;  %s152_s2 = smov 80   ;;  %v123_v6 = vld [vmem:[%s223_s0 + $0x9] ss:$16 sm:%s49_s28]   ;;  %vm88_vm12 = vcmask 326912   ;;  %vm95_vm13 = vcmask 261312  }
   0x7   :  { %30 = vrot.lane.b32.xlu1 %v120_v3, %s150_s23  ;;  %v124_v7 = vld [vmem:[%s223_s0 + $0x8] ss:$16 sm:%s56_s29]   ;;  %s63_s7 = smov 3  ;;  %s70_s8 = smov 3  ;;  %vm102_vm14 = vcmask 195712   ;;  %vm109_vm15 = vcmask 130112  }
   0x8   :  { %s153_s9 = smov 72   ;;  %s154_s10 = smov 64   ;;  %v125_v8 = vld [vmem:[%s223_s0 + $0x7] ss:$16 sm:%s63_s7]   ;;  %v126_v9 = vld [vmem:[%s223_s0 + $0x6] ss:$16 sm:%s70_s8]  }
   0x9   :  { %s2_s13 = smov 3  ;;  %s77_s16 = smov 3 }
   0xa   :  { %37 = vrot.lane.b32.xlu0 %v121_v4, %s151_s30  ;;  %v3_v10 = vld [vmem:[%s223_s0] ss:$16 sm:%s2_s13]   ;;  %s84_s19 = smov 3  ;;  %s155_s20 = smov 56  }
   0xb   :  { %44 = vrot.lane.b32.xlu1 %v122_v5, %s152_s2  ;;  %5 = vst.msk [vmem:[#allocation0] sm:$0x3] %vm4_vm0, %v3_v10   ;;  %s156_s21 = smov 48   ;;  %v127_v11 = vld [vmem:[%s223_s0 + $0x5] ss:$16 sm:%s77_s16]   ;;  %s91_s26 = smov 3 }
   0xc   :  { %v128_v12 = vld [vmem:[%s223_s0 + $0x4] ss:$16 sm:%s84_s19]   ;;  %s98_s27 = smov 3  ;;  %s157_s28 = smov 40   ;;  %v129_v13 = vld [vmem:[%s223_s0 + $0x3] ss:$16 sm:%s91_s26]  }
   0xd   :  { %s158_s29 = smov 32   ;;  %v130_v14 = vld [vmem:[%s223_s0 + $0x2] ss:$16 sm:%s98_s27]   ;;  %s105_s5 = smov 3 }
   0xe   :  { %51 = vrot.lane.b32.xlu0 %v123_v6, %s153_s9  ;;  %s159_s6 = smov 24   ;;  %s160_s7 = smov 16   ;;  %v131_v15 = vld [vmem:[%s223_s0 + $0x1] ss:$16 sm:%s105_s5]  }
   0xf   :  { %58 = vrot.lane.b32.xlu1 %v124_v7, %s154_s10  ;;  %s161_s0 = smov 8  }
  0x12   :  { %65 = vrot.lane.b32.xlu0 %v125_v8, %s155_s20 }
  0x13   :  { %72 = vrot.lane.b32.xlu1 %v126_v9, %s156_s21 }
  0x16   :  { %79 = vrot.lane.b32.xlu0 %v127_v11, %s157_s28 }
  0x17   :  { %86 = vrot.lane.b32.xlu1 %v128_v12, %s158_s29 }
  0x1a   :  { %93 = vrot.lane.b32.xlu0 %v129_v13, %s159_s6 }
  0x1b   :  { %100 = vrot.lane.b32.xlu1 %v130_v14, %s160_s7 }
  0x1e   :  { %107 = vrot.lane.b32.xlu0 %v131_v15, %s161_s0 }
  0x74   :  { %v10_v16 = vpop.permute.xlu0 %9  }
  0x75   :  { %12 = vst.msk [vmem:[#allocation0] sm:$0x3] %vm11_vm1, %v10_v16   ;;  %v24_v17 = vpop.permute.xlu1 %23  }
  0x78   :  { %v17_v18 = vpop.permute.xlu0 %16  }
  0x79   :  { %19 = vst.msk [vmem:[#allocation0] sm:$0x3] %vm18_vm2, %v17_v18   ;;  %v31_v19 = vpop.permute.xlu1 %30  }
  0x7a   :  { %26 = vst.msk [vmem:[#allocation0] sm:$0x3] %vm25_vm3, %v24_v17  }
  0x7b   :  { %33 = vst.msk [vmem:[#allocation0] sm:$0x3] %vm32_vm4, %v31_v19  }
  0x7c   :  { %v38_v20 = vpop.permute.xlu0 %37  }
  0x7d   :  { %40 = vst.msk [vmem:[#allocation0] sm:$0x3] %vm39_vm5, %v38_v20   ;;  %v45_v21 = vpop.permute.xlu1 %44  }
  0x7e   :  { %47 = vst.msk [vmem:[#allocation0] sm:$0x3] %vm46_vm6, %v45_v21  }
  0x80   :  { %v52_v22 = vpop.permute.xlu0 %51  }
  0x81   :  { %54 = vst.msk [vmem:[#allocation0] sm:$0x3] %vm53_vm7, %v52_v22   ;;  %v59_v23 = vpop.permute.xlu1 %58  }
  0x82   :  { %61 = vst.msk [vmem:[#allocation0] sm:$0x3] %vm60_vm8, %v59_v23  }
  0x84   :  { %v66_v24 = vpop.permute.xlu0 %65  }
  0x85   :  { %68 = vst.msk [vmem:[#allocation0] sm:$0x3] %vm67_vm9, %v66_v24   ;;  %v73_v25 = vpop.permute.xlu1 %72  }
  0x86   :  { %75 = vst.msk [vmem:[#allocation0] sm:$0x3] %vm74_vm10, %v73_v25  }
  0x88   :  { %v80_v26 = vpop.permute.xlu0 %79  }
  0x89   :  { %82 = vst.msk [vmem:[#allocation0] sm:$0x3] %vm81_vm11, %v80_v26   ;;  %v87_v27 = vpop.permute.xlu1 %86  }
  0x8a   :  { %89 = vst.msk [vmem:[#allocation0] sm:$0x3] %vm88_vm12, %v87_v27  }
  0x8c   :  { %v94_v28 = vpop.permute.xlu0 %93  }
  0x8d   :  { %96 = vst.msk [vmem:[#allocation0] sm:$0x3] %vm95_vm13, %v94_v28   ;;  %v101_v29 = vpop.permute.xlu1 %100  }
  0x8e   :  { %103 = vst.msk [vmem:[#allocation0] sm:$0x3] %vm102_vm14, %v101_v29  }
  0x90   :  { %v108_v30 = vpop.permute.xlu0 %107  }
  0x91   :  { %110 = vst.msk [vmem:[#allocation0] sm:$0x3] %vm109_vm15, %v108_v30  }
  0x98   :  { %v114_v31 = vld [vmem:[#allocation0] sm:$0x3] }
  0x99   :  { %116 = vst [vmem:[%s224_s1] sm:$0x3] %v114_v31 }

// kernel: mul.59
= control target key start
LH: loop header
LB: loop body
LE: loop exit
PB: predicated region body
PF: predicated region fallthrough
CT: control target
= control target key end

     0   :  { %s7_s6 = smov 3  ;;  %s21_s9 = smov 3  ;;  %vm4_vm0 = vcmask 130048   ;;  %vm11_vm1 = vcmask 1048448   ;;  %vm18_vm2 = vcmask 917248   ;;  %vm25_vm3 = vcmask 786048   ;;  %s119_s0 = inlined_call_operand.vmem [shape: f32[2,8,16], index: 0, kind: input, shape index: {}]   ;;  %s120_s1 = inlined_call_operand.vmem [shape: f32[256], index: 1, kind: output, shape index: {}]  }
   0x1   :  { %v61_v0 = vld [vmem:[%s119_s0 + $0x7] ss:$8 sm:%s7_s6]   ;;  %s75_s10 = smov 112   ;;  %v63_v1 = vld [vmem:[%s119_s0 + $0x5] ss:$8 sm:%s21_s9]   ;;  %s14_s13 = smov 3 }
   0x2   :  { %9 = vrot.lane.b32.xlu0 %v61_v0, %s75_s10  ;;  %s76_s14 = smov 80   ;;  %v62_v2 = vld [vmem:[%s119_s0 + $0x6] ss:$8 sm:%s14_s13]   ;;  %s28_s17 = smov 3  ;;  %vm32_vm4 = vcmask 654848   ;;  %vm39_vm5 = vcmask 523648  }
   0x3   :  { %23 = vrot.lane.b32.xlu1 %v63_v1, %s76_s14  ;;  %v64_v3 = vld [vmem:[%s119_s0 + $0x4] ss:$8 sm:%s28_s17]   ;;  %s35_s20 = smov 3  ;;  %s42_s21 = smov 3  ;;  %vm46_vm6 = vcmask 392448   ;;  %vm53_vm7 = vcmask 261248  }
   0x4   :  { %s77_s22 = smov 96   ;;  %s78_s23 = smov 64   ;;  %v65_v4 = vld [vmem:[%s119_s0 + $0x3] ss:$8 sm:%s35_s20]   ;;  %v66_v5 = vld [vmem:[%s119_s0 + $0x2] ss:$8 sm:%s42_s21]  }
   0x5   :  { %s2_s26 = smov 3  ;;  %s49_s29 = smov 3 }
   0x6   :  { %16 = vrot.lane.b32.xlu0 %v62_v2, %s77_s22  ;;  %v3_v6 = vld [vmem:[%s119_s0] ss:$8 sm:%s2_s26]   ;;  %s79_s3 = smov 48   ;;  %s80_s4 = smov 32  }
   0x7   :  { %30 = vrot.lane.b32.xlu1 %v64_v3, %s78_s23  ;;  %5 = vst.msk [vmem:[#allocation0] sm:$0x3] %vm4_vm0, %v3_v6   ;;  %v67_v7 = vld [vmem:[%s119_s0 + $0x1] ss:$8 sm:%s49_s29]   ;;  %s81_s0 = smov 16  }
   0xa   :  { %37 = vrot.lane.b32.xlu0 %v65_v4, %s79_s3 }
   0xb   :  { %44 = vrot.lane.b32.xlu1 %v66_v5, %s80_s4 }
   0xe   :  { %51 = vrot.lane.b32.xlu0 %v67_v7, %s81_s0 }
  0x74   :  { %v10_v8 = vpop.permute.xlu0 %9  }
  0x75   :  { %12 = vst.msk [vmem:[#allocation0] sm:$0x3] %vm11_vm1, %v10_v8   ;;  %v24_v9 = vpop.permute.xlu1 %23  }
  0x78   :  { %v17_v10 = vpop.permute.xlu0 %16  }
  0x79   :  { %19 = vst.msk [vmem:[#allocation0] sm:$0x3] %vm18_vm2, %v17_v10   ;;  %v31_v11 = vpop.permute.xlu1 %30  }
  0x7a   :  { %26 = vst.msk [vmem:[#allocation0] sm:$0x3] %vm25_vm3, %v24_v9  }
  0x7b   :  { %33 = vst.msk [vmem:[#allocation0] sm:$0x3] %vm32_vm4, %v31_v11  }
  0x7c   :  { %v38_v12 = vpop.permute.xlu0 %37  }
  0x7d   :  { %40 = vst.msk [vmem:[#allocation0] sm:$0x3] %vm39_vm5, %v38_v12   ;;  %v45_v13 = vpop.permute.xlu1 %44  }
  0x7e   :  { %47 = vst.msk [vmem:[#allocation0] sm:$0x3] %vm46_vm6, %v45_v13  }
  0x80   :  { %v52_v14 = vpop.permute.xlu0 %51  }
  0x81   :  { %54 = vst.msk [vmem:[#allocation0] sm:$0x3] %vm53_vm7, %v52_v14  }
  0x88   :  { %v58_v15 = vld [vmem:[#allocation0] sm:$0x3] }
  0x89   :  { %60 = vst [vmem:[%s120_s1] sm:$0x3] %v58_v15 }

// kernel: fwd.1
= control target key start
LH: loop header
LB: loop body
LE: loop exit
PB: predicated region body
PF: predicated region fallthrough
CT: control target
= control target key end

     0   :  { %s12138_s0 = inlined_call_operand.vmem [shape: f32[2,64,128], index: 0, kind: input, shape index: {}]   ;;  %s12139_s1 = inlined_call_operand.vmem [shape: f32[2,64,128], index: 1, kind: input, shape index: {}]   ;;  %s12140_s2 = inlined_call_operand.vmem [shape: f32[2,128,128], index: 2, kind: input, shape index: {}]   ;;  %s12141_s3 = inlined_call_operand.vmem [shape: bf16[3,384,256], index: 3, kind: input, shape index: {}]   ;;  %s12142_s4 = inlined_call_operand.vmem [shape: bf16[3,384,256], index: 4, kind: input, shape index: {}]   ;;  %s12143_s5 = inlined_call_operand.vmem [shape: bf16[3,384,256], index: 5, kind: input, shape index: {}]   ;;  %s12144_s6 = inlined_call_operand.vmem [shape: f32[1,256], index: 6, kind: input, shape index: {}]   ;;  %s12145_s7 = inlined_call_operand.vmem [shape: f32[1,256], index: 7, kind: input, shape index: {}]   ;;  %s12146_s8 = inlined_call_operand.vmem [shape: f32[1,256], index: 8, kind: input, shape index: {}]   ;;  %s12147_s9 = inlined_call_operand.vmem [shape: bf16[128,64], index: 9, kind: input, shape index: {}]   ;;  %s12148_s10 = inlined_call_operand.hbm [shape: f32[2,128,128], index: 10, kind: output, shape index: {}]  }
   0x1   :  { %12150 = sst [smem:[#allocation20_spill]] %s12138_s0 }
   0x2   :  { %15 = vsyncpa [#allocation4], 0 }
   0x3   :  { %17 = vsyncpa [#allocation4 + $0x1], 0  ;;  %s9418_s13 = smov 0   ;;  %s9420_s14 = smov 0  }
   0x4   :  { %s9422_s15 = smov 0   ;;  %s9424_s16 = smov 0  }
   0x5 LB: > { %s9439_s17 = sadd.s32 4294967295, %s9354_s16   ;;  %s6699_s18 = sadd.s32 4294967294, %s9354_s16   ;;  %s9354_s16 = sphi %s9424_s16, %s12196_s16   ;;  %s9350_s15 = sphi %s9422_s15, %s12195_s15   ;;  %s9346_s14 = sphi %s9420_s14, %s12194_s14   ;;  %s9342_s13 = sphi %s9418_s13, %s12193_s13  }
   0x6   : > { %s9443_s19 = sadd.s32 1, %s9354_s16   ;;  %s255_s20 = sadd.s32 1, %s9350_s15 }
   0x7   : > { %s252_s21 = ssub.s32 %s9354_s16, %s9443_s19  ;;  %p265_p0 = scmp.ne.s32.totalorder %s9350_s15, %s9346_s14 }
   0x8   : > { %p253_p1 = scmp.eq.s32.totalorder %s252_s21, 0  ;;  %p266_p2 = scmp.eq.s32.totalorder %s9439_s17, 1 }
   0x9   : > { %p271_p3 = scmp.ne.s32.totalorder %s9346_s14, %s9342_s13  ;;  %p272_p4 = scmp.eq.s32.totalorder %s6699_s18, 1 }
   0xa   : > { %s9454_s22 = scalar_select %p253_p1, %s9350_s15, %s255_s20  }
   0xb   : > { %p9456_p5 = por %p266_p2, %p265_p0  ;;  %p9460_p6 = por %p272_p4, %p271_p3 }
   0xc   : > { %p6702_p7 = scmp.ge.s32.totalorder %s9354_s16, 1  ;;  %p335_p8 = scmp.lt.s32.totalorder %s9354_s16, 3 }
   0xe   : > { %p336_p9 = pnand %p6702_p7, %p335_p8 }
  0x10   : > { %339 = sbr.rel (%p336_p9) target bundleno = 2026 (0x7ea), region = 60 }
  0x17   : > { %v8394_v0 = vld [vmem:[%s12141_s3 + $0x184] ss:$8 sps:$4 sm:$0xff]   ;;  %v8396_v1 = vld [vmem:[%s12141_s3 + $0x180] ss:$8 sps:$4 sm:$0xff]   ;;  %v8397_v2 = vld [vmem:[%s12141_s3 + $0x194] ss:$8 sps:$4 sm:$0xff]  }
  0x18   : > { %766 = vmatprep.subr.bf16.mxu0 %v8394_v0  ;;  %v8399_v3 = vld [vmem:[%s12141_s3 + $0x190] ss:$8 sps:$4 sm:$0xff]   ;;  %v8400_v4 = vld [vmem:[%s12141_s3 + $0x1a4] ss:$8 sps:$4 sm:$0xff]   ;;  %v8402_v5 = vld [vmem:[%s12141_s3 + $0x1a0] ss:$8 sps:$4 sm:$0xff]  }
  0x19   : > { %767 = vmatpush1.bf16.msra.mxu0 %v8396_v1  ;;  %p383_p10 = scmp.lt.s32.totalorder %s9439_s17, 1  ;;  %v8403_v6 = vld [vmem:[%s12141_s3 + $0x1b4] ss:$8 sps:$4 sm:$0xff]   ;;  %v8405_v7 = vld [vmem:[%s12141_s3 + $0x1b0] ss:$8 sps:$4 sm:$0xff]   ;;  %s12153_s0 = sld [smem:[#allocation20_spill]] }
  0x1a   : > { %768 = vmatprep.subr.bf16.mxu0 %v8397_v2  ;;  %v8406_v8 = vld [vmem:[%s12141_s3 + $0x1c4] ss:$8 sps:$4 sm:$0xff]   ;;  %v8408_v9 = vld [vmem:[%s12141_s3 + $0x1c0] ss:$8 sps:$4 sm:$0xff]   ;;  %v8409_v10 = vld [vmem:[%s12141_s3 + $0x1d4] ss:$8 sps:$4 sm:$0xff]  }
  0x1b   : > { %s9492_s30 = scalar_select %p383_p10, %s9439_s17, 1  ;;  %v8411_v11 = vld [vmem:[%s12141_s3 + $0x1d0] ss:$8 sps:$4 sm:$0xff]   ;;  %v8412_v12 = vld [vmem:[%s12141_s3 + $0x1e4] ss:$8 sps:$4 sm:$0xff]   ;;  %vm431_vm0 = vcmask 1040384  }
  0x1c   : > { %v8414_v15 = vld [vmem:[%s12141_s3 + $0x1e0] ss:$8 sps:$4 sm:$0xff]   ;;  %v8415_v17 = vld [vmem:[%s12141_s3 + $0x1f4] ss:$8 sps:$4 sm:$0xff]   ;;  %v8417_v18 = vld [vmem:[%s12141_s3 + $0x1f0] ss:$8 sps:$4 sm:$0xff]  }
  0x1d   : > { %769 = vmatpush1.bf16.msra.mxu0 %v8399_v3  ;;  %s12149_s21 = sshll.u32 %s9492_s30, 6  ;;  %v8418_v19 = vld [vmem:[%s12141_s3 + $0x204] ss:$8 sps:$4 sm:$0xff]   ;;  %v8420_v20 = vld [vmem:[%s12141_s3 + $0x200] ss:$8 sps:$4 sm:$0xff]   ;;  %vm9626_vm1 = vmneg %vm431_vm0  ;;  %vm456_vm3 = vcmask 1046528  }
  0x1e   : > { %770 = vmatprep.subr.bf16.mxu0 %v8400_v4  ;;  %v8421_v21 = vld [vmem:[%s12141_s3 + $0x214] ss:$8 sps:$4 sm:$0xff]   ;;  %v8423_v22 = vld [vmem:[%s12141_s3 + $0x210] ss:$8 sps:$4 sm:$0xff]   ;;  %v8424_v24 = vld [vmem:[%s12141_s3 + $0x224] ss:$8 sps:$4 sm:$0xff]  }
  0x1f   : > { %s9509_s29 = scalar_lea.vmem %s12153_s0, %s12149_s21  ;;  %v8426_v27 = vld [vmem:[%s12141_s3 + $0x220] ss:$8 sps:$4 sm:$0xff]   ;;  %v8427_v29 = vld [vmem:[%s12141_s3 + $0x234] ss:$8 sps:$4 sm:$0xff]   ;;  %v8429_v31 = vld [vmem:[%s12141_s3 + $0x230] ss:$8 sps:$4 sm:$0xff]  }
  0x20   : > { %v9518_v13 = vld [vmem:[%s9509_s29] sm:$0xff]  ;;  %v9521_v14 = vld [vmem:[%s9509_s29 + $0x8] sm:$0xff]  ;;  %v9547_v23 = vld [vmem:[%s9509_s29 + $0x10] sm:$0xff]  ;;  %vm9358_vm5 = vmmov 1   ;;  %vm2116_vm10 = vcmask 523264   ;;  %s7895_s12 = sshll.u32 %s9492_s30, 7 }
  0x21   : > { %771 = vmatpush1.bf16.msra.mxu0 %v8402_v5  ;;  %v466_v16 = vpack.c.bf16 %v9521_v14, %v9518_v13  ;;  %v416_v25 = vrot.slane %v9521_v14, 7  ;;  %v417_v26 = vrot.slane %v9547_v23, 7  ;;  %v9559_v28 = vpack.c.bf16 %v9547_v23, %v9521_v14  ;;  %v9570_v32 = vld [vmem:[%s9509_s29 + $0x18] sm:$0xff]  ;;  %v9573_v33 = vld [vmem:[%s9509_s29 + $0x20] sm:$0xff]  ;;  %v9596_v42 = vld [vmem:[%s9509_s29 + $0x28] sm:$0xff]  ;;  %s11132_s0 = scalar_lea.vmem %s12140_s2, %s7895_s12  ;;  %s7896_s26 = sshll.u32 %s9439_s17, 11 }
  0x22   : > { %772 = vmatprep.subr.bf16.mxu0 %v8403_v6  ;;  %v8430_v34 = vld [vmem:[%s12141_s3 + $0x244] ss:$8 sps:$4 sm:$0xff]   ;;  %v418_v35 = vrot.slane %v9570_v32, 7  ;;  %v419_v36 = vrot.slane %v9573_v33, 7  ;;  %v8432_v37 = vld [vmem:[%s12141_s3 + $0x240] ss:$8 sps:$4 sm:$0xff]   ;;  %v9585_v38 = vpack.c.bf16 %v9573_v33, %v9570_v32  ;;  %vm9638_vm2 = vmpackc.low %vm9626_vm1, %vm9626_vm1  ;;  %v469_v58 = vpack.c.bf16 %v9570_v32, %v9547_v23 }
  0x23   : > { %798 = vmatprep.mubr.bf16.mxu0 %v466_v16  ;;  %v9564_v30 = vpack.c.bf16 %v417_v26, %v416_v25  ;;  %v8433_v39 = vld [vmem:[%s12141_s3 + $0x254] ss:$8 sps:$4 sm:$0xff]   ;;  %v8435_v41 = vld [vmem:[%s12141_s3 + $0x250] ss:$8 sps:$4 sm:$0xff]   ;;  %v8436_v44 = vld [vmem:[%s12141_s3 + $0x264] ss:$8 sps:$4 sm:$0xff]   ;;  %v472_v0 = vpack.c.bf16 %v9596_v42, %v9573_v33 }
  0x24   : > { %v9590_v40 = vpack.c.bf16 %v419_v36, %v418_v35  ;;  %v9599_v43 = vld [vmem:[%s9509_s29 + $0x30] sm:$0xff]  ;;  %v420_v45 = vrot.slane %v9596_v42, 7  ;;  %v8438_v47 = vld [vmem:[%s12141_s3 + $0x260] ss:$8 sps:$4 sm:$0xff]   ;;  %v415_v51 = vrot.slane %v9518_v13, 7  ;;  %v6814_v62 = vpack.c.bf16 %v418_v35, %v417_v26  ;;  %v9672_v4 = vld [vmem:[%s9509_s29 + $0x38] sm:$0xff] }
  0x25   : > { %773 = vmatpush1.bf16.msra.mxu0 %v8405_v7  ;;  %v421_v46 = vrot.slane %v9599_v43, 7  ;;  %v9611_v48 = vpack.c.bf16 %v9599_v43, %v9596_v42  ;;  %v8439_v49 = vld [vmem:[%s12141_s3 + $0x274] ss:$8 sps:$4 sm:$0xff]   ;;  %v8441_v52 = vld [vmem:[%s12141_s3 + $0x270] ss:$8 sps:$4 sm:$0xff]   ;;  %vm9719_vm4 = vmpackc.low %vm456_vm3, %vm456_vm3  ;;  %s9360_s21 = smov [#allocation3]  }
  0x26   : > { %774 = vmatprep.subr.bf16.mxu0 %v8406_v8  ;;  %v8444_v53 = vld [vmem:[%s12141_s3 + $0x284] ss:$8 sps:$4 sm:$0xff]   ;;  %v8442_v55 = vld [vmem:[%s12141_s3 + $0x280] ss:$8 sps:$4 sm:$0xff]   ;;  %v6809_v56 = vpack.c.bf16 %v416_v25, %v415_v51  ;;  %v8447_v59 = vld [vmem:[%s12141_s3 + $0x294] ss:$8 sps:$4 sm:$0xff]   ;;  %v6819_v5 = vpack.c.bf16 %v420_v45, %v419_v36  ;;  %v475_v8 = vpack.c.bf16 %v9672_v4, %v9599_v43  ;;  %v1926_v25 = vlaneseq }
  0x27   : > { %v9616_v50 = vpack.c.bf16 %v421_v46, %v420_v45  ;;  %v8445_v60 = vld [vmem:[%s12141_s3 + $0x290] ss:$8 sps:$4 sm:$0xff]   ;;  %v8450_v61 = vld [vmem:[%s12141_s3 + $0x2a4] ss:$8 sps:$4 sm:$0xff]   ;;  %v8448_v63 = vld [vmem:[%s12141_s3 + $0x2a0] ss:$8 sps:$4 sm:$0xff]  }
  0x28   : > { %v8453_v1 = vld [vmem:[%s12141_s3 + $0x2b4] ss:$8 sps:$4 sm:$0xff]   ;;  %v8451_v2 = vld [vmem:[%s12141_s3 + $0x2b0] ss:$8 sps:$4 sm:$0xff]   ;;  %v8456_v3 = vld [vmem:[%s12141_s3 + $0x2c4] ss:$8 sps:$4 sm:$0xff]  }
  0x29   : > { %775 = vmatpush1.bf16.msra.mxu0 %v8408_v9  ;;  %v8454_v6 = vld [vmem:[%s12141_s3 + $0x2c0] ss:$8 sps:$4 sm:$0xff]   ;;  %v8459_v7 = vld [vmem:[%s12141_s3 + $0x2d4] ss:$8 sps:$4 sm:$0xff]   ;;  %v422_v9 = vrot.slane %v9672_v4, 7  ;;  %vm6887_vm6 = vmpackc.low %vm9626_vm1, %vm9358_vm5 }
  0x2a   : > { %776 = vmatprep.subr.bf16.mxu0 %v8409_v10  ;;  %v8457_v10 = vld [vmem:[%s12141_s3 + $0x2d0] ss:$8 sps:$4 sm:$0xff]   ;;  %v8465_v16 = vld [vmem:[%s12141_s3 + $0x2f4] ss:$8 sps:$4 sm:$0xff]   ;;  %v8472_v36 = vld [vmem:[%s12141_s3 + $0x20] ss:$8 sps:$4 sm:$0xff]  }
  0x2b   : > { %v8471_v26 = vld [vmem:[%s12141_s3 + $0x14] ss:$8 sps:$4 sm:$0xff]   ;;  %v8480_v45 = vld [vmem:[%s12141_s3 + $0x44] ss:$8 sps:$4 sm:$0xff]   ;;  %vm9906_vm7 = vmpackc.low %vm456_vm3, %vm9358_vm5 }
  0x2c   : > { %vm10107_vm8 = vmpackc.low %vm9358_vm5, %vm9626_vm1  ;;  %v8604_v57 = vld [vmem:[%s12141_s3 + $0x460] ss:$8 sps:$4 sm:$0xff]   ;;  %v8607_v54 = vld [vmem:[%s12141_s3 + $0x470] ss:$8 sps:$4 sm:$0xff]  }
  0x2d   : > { %777 = vmatpush1.bf16.msra.mxu0 %v8411_v11  ;;  %v8462_v11 = vld [vmem:[%s12141_s3 + $0x2e4] ss:$8 sps:$4 sm:$0xff]   ;;  %vm7041_vm9 = vmpackc.low %vm9358_vm5, %vm456_vm3 }
  0x2e   : > { %778 = vmatprep.subr.bf16.mxu0 %v8412_v12  ;;  %v6824_v12 = vpack.c.bf16 %v422_v9, %v421_v46 }
  0x31   : > { %779 = vmatpush1.bf16.msra.mxu0 %v8414_v15  ;;  %v8460_v15 = vld [vmem:[%s12141_s3 + $0x2e0] ss:$8 sps:$4 sm:$0xff]  }
  0x32   : > { %780 = vmatprep.subr.bf16.mxu0 %v8415_v17  ;;  %v440_v17 = vrot.slane %v9518_v13, 1 }
  0x35   : > { %781 = vmatpush1.bf16.msra.mxu0 %v8417_v18  ;;  %v441_v18 = vrot.slane %v9521_v14, 1  ;;  %v8552_v14 = vld [vmem:[%s12141_s3 + $0x344] ss:$8 sps:$4 sm:$0xff]  }
  0x36   : > { %782 = vmatprep.subr.bf16.mxu0 %v8418_v19  ;;  %v8463_v19 = vld [vmem:[%s12141_s3 + $0x2f0] ss:$8 sps:$4 sm:$0xff]  }
  0x39   : > { %783 = vmatpush1.bf16.msra.mxu0 %v8420_v20  ;;  %v9356_v20 = vmov 0  }
  0x3a   : > { %784 = vmatprep.subr.bf16.mxu0 %v8421_v21  ;;  %v8468_v21 = vld [vmem:[%s12141_s3 + $0x4] ss:$8 sps:$4 sm:$0xff]  }
  0x3d   : > { %785 = vmatpush1.bf16.msra.mxu0 %v8423_v22  ;;  %v8466_v22 = vld [vmem:[%s12141_s3] ss:$8 sps:$4 sm:$0xff]  }
  0x3e   : > { %786 = vmatprep.subr.bf16.mxu0 %v8424_v24  ;;  %v6827_v24 = vpack.c.bf16 %v441_v18, %v440_v17 }
  0x41   : > { %787 = vmatpush1.bf16.msra.mxu0 %v8426_v27  ;;  %v442_v27 = vrot.slane %v9547_v23, 1 }
  0x42   : > { %788 = vmatprep.subr.bf16.mxu0 %v8427_v29  ;;  %v443_v29 = vrot.slane %v9570_v32, 1  ;;  %v8553_v32 = vld [vmem:[%s12141_s3 + $0x350] ss:$8 sps:$4 sm:$0xff]  }
  0x44   : > { %v6830_v35 = vpack.c.bf16 %v443_v29, %v442_v27 }
  0x45   : > { %789 = vmatpush1.bf16.msra.mxu0 %v8429_v31  ;;  %v8469_v31 = vld [vmem:[%s12141_s3 + $0x10] ss:$8 sps:$4 sm:$0xff]  }
  0x46   : > { %790 = vmatprep.subr.bf16.mxu0 %v8430_v34  ;;  %v8474_v34 = vld [vmem:[%s12141_s3 + $0x24] ss:$8 sps:$4 sm:$0xff]  }
  0x49   : > { %791 = vmatpush1.bf16.msra.mxu0 %v8432_v37  ;;  %v8477_v37 = vld [vmem:[%s12141_s3 + $0x34] ss:$8 sps:$4 sm:$0xff]  }
  0x4a   : > { %792 = vmatprep.subr.bf16.mxu0 %v8433_v39  ;;  %v444_v39 = vrot.slane %v9573_v33, 1  ;;  %v8558_v33 = vld [vmem:[%s12141_s3 + $0x364] ss:$8 sps:$4 sm:$0xff]  }
  0x4c   : > { %v9964_v23 = vpack.c.bf16 %v444_v39, %v443_v29 }
  0x4d   : > { %793 = vmatpush1.bf16.msra.mxu0 %v8435_v41  ;;  %v445_v41 = vrot.slane %v9596_v42, 1  ;;  %v8559_v42 = vld [vmem:[%s12141_s3 + $0x370] ss:$8 sps:$4 sm:$0xff]  }
  0x4e   : > { %794 = vmatprep.subr.bf16.mxu0 %v8436_v44  ;;  %v8475_v44 = vld [vmem:[%s12141_s3 + $0x30] ss:$8 sps:$4 sm:$0xff]  }
  0x4f   : > { %v6833_v46 = vpack.c.bf16 %v445_v41, %v444_v39  ;;  %v8556_v39 = vld [vmem:[%s12141_s3 + $0x360] ss:$8 sps:$4 sm:$0xff]  }
  0x51   : > { %795 = vmatpush1.bf16.msra.mxu0 %v8438_v47  ;;  %v8478_v47 = vld [vmem:[%s12141_s3 + $0x40] ss:$8 sps:$4 sm:$0xff]  }
  0x52   : > { %796 = vmatprep.subr.bf16.mxu0 %v8439_v49  ;;  %v8483_v49 = vld [vmem:[%s12141_s3 + $0x54] ss:$8 sps:$4 sm:$0xff]  }
  0x55   : > { %797 = vmatpush1.bf16.msra.mxu0 %v8441_v52  ;;  %v446_v52 = vrot.slane %v9599_v43, 1  ;;  %v8564_v43 = vld [vmem:[%s12141_s3 + $0x384] ss:$8 sps:$4 sm:$0xff]  }
  0x56   : > { %839 = vmatprep.subr.bf16.mxu0 %v8444_v53  ;;  %v447_v53 = vrot.slane %v9672_v4, 1  ;;  %v1924_v4 = vld [vmem:[%s12144_s6] sm:$0x3] }
  0x57   : > { %v9986_v29 = vpack.c.bf16 %v446_v52, %v445_v41  ;;  %v8562_v41 = vld [vmem:[%s12141_s3 + $0x380] ss:$8 sps:$4 sm:$0xff]  }
  0x58   : > { %6810 = vmatmul.mubr.msk.bf16.vlgmr.msra.gmra.mrb[0].mxu0 %vm9638_vm2, %v6809_v56  ;;  %v8486_v56 = vld [vmem:[%s12141_s3 + $0x64] ss:$8 sps:$4 sm:$0xff]  }
  0x59   : > { %840 = vmatpush1.bf16.msra.mxu0 %v8442_v55  ;;  %808 = vmatprep.mubr.bf16.mxu0 %v469_v58  ;;  %v8481_v55 = vld [vmem:[%s12141_s3 + $0x50] ss:$8 sps:$4 sm:$0xff]   ;;  %v6836_v58 = vpack.c.bf16 %v447_v53, %v446_v52  ;;  %v8567_v52 = vld [vmem:[%s12141_s3 + $0x394] ss:$8 sps:$4 sm:$0xff]  }
  0x5a   : > { %841 = vmatprep.subr.bf16.mxu0 %v8447_v59  ;;  %v8484_v59 = vld [vmem:[%s12141_s3 + $0x60] ss:$8 sps:$4 sm:$0xff]  }
  0x5d   : > { %842 = vmatpush1.bf16.msra.mxu0 %v8445_v60  ;;  %v8489_v60 = vld [vmem:[%s12141_s3 + $0x74] ss:$8 sps:$4 sm:$0xff]  }
  0x5e   : > { %843 = vmatprep.subr.bf16.mxu0 %v8450_v61  ;;  %v9357_v61 = vmov 0.0  }
  0x60   : > { %6815 = vmatmul.mubr.msk.bf16.gmra.mrb[4].mxu0 %vm9638_vm2, %v6814_v62  ;;  %v945_v62 = vpack.c.bf16 %v9518_v13, %v9357_v61  ;;  %v8544_v13 = vld [vmem:[%s12141_s3 + $0x320] ss:$8 sps:$4 sm:$0xff]  }
  0x61   : > { %844 = vmatpush1.bf16.msra.mxu0 %v8448_v63  ;;  %818 = vmatprep.mubr.bf16.mxu0 %v472_v0  ;;  %v8487_v63 = vld [vmem:[%s12141_s3 + $0x70] ss:$8 sps:$4 sm:$0xff]   ;;  %v8492_v0 = vld [vmem:[%s12141_s3 + $0x84] ss:$8 sps:$4 sm:$0xff]  }
  0x62   : > { %845 = vmatprep.subr.bf16.mxu0 %v8453_v1  ;;  %v8490_v1 = vld [vmem:[%s12141_s3 + $0x80] ss:$8 sps:$4 sm:$0xff]  }
  0x65   : > { %846 = vmatpush1.bf16.msra.mxu0 %v8451_v2  ;;  %v8495_v2 = vld [vmem:[%s12141_s3 + $0x94] ss:$8 sps:$4 sm:$0xff]  }
  0x66   : > { %847 = vmatprep.subr.bf16.mxu0 %v8456_v3  ;;  %v8493_v3 = vld [vmem:[%s12141_s3 + $0x90] ss:$8 sps:$4 sm:$0xff]  }
  0x68   : > { %6820 = vmatmul.mubr.msk.bf16.gmra.mrb[8].mxu0 %vm9638_vm2, %v6819_v5  ;;  %v8498_v5 = vld [vmem:[%s12141_s3 + $0xa4] ss:$8 sps:$4 sm:$0xff]  }
  0x69   : > { %848 = vmatpush1.bf16.msra.mxu0 %v8454_v6  ;;  %828 = vmatprep.mubr.bf16.mxu0 %v475_v8  ;;  %v8496_v6 = vld [vmem:[%s12141_s3 + $0xa0] ss:$8 sps:$4 sm:$0xff]   ;;  %v8499_v8 = vld [vmem:[%s12141_s3 + $0xb0] ss:$8 sps:$4 sm:$0xff]  }
  0x6a   : > { %849 = vmatprep.subr.bf16.mxu0 %v8459_v7  ;;  %v8501_v7 = vld [vmem:[%s12141_s3 + $0xb4] ss:$8 sps:$4 sm:$0xff]  }
  0x6d   : > { %850 = vmatpush1.bf16.msra.mxu0 %v8457_v10  ;;  %v8504_v10 = vld [vmem:[%s12141_s3 + $0xc4] ss:$8 sps:$4 sm:$0xff]  }
  0x6e   : > { %851 = vmatprep.subr.bf16.mxu0 %v8462_v11  ;;  %v8502_v11 = vld [vmem:[%s12141_s3 + $0xc0] ss:$8 sps:$4 sm:$0xff]  }
  0x70   : > { %6825 = vmatmul.mubr.msk.bf16.gmra.mrb[12].mxu0 %vm9638_vm2, %v6824_v12  ;;  %v8507_v12 = vld [vmem:[%s12141_s3 + $0xd4] ss:$8 sps:$4 sm:$0xff]  }
  0x71   : > { %852 = vmatpush1.bf16.msra.mxu0 %v8460_v15  ;;  %871 = vmatprep.mubr.bf16.mxu0 %v9356_v20  ;;  %v8505_v15 = vld [vmem:[%s12141_s3 + $0xd0] ss:$8 sps:$4 sm:$0xff]  }
  0x72   : > { %853 = vmatprep.subr.bf16.mxu0 %v8465_v16  ;;  %v8510_v16 = vld [vmem:[%s12141_s3 + $0xe4] ss:$8 sps:$4 sm:$0xff]  }
  0x75   : > { %854 = vmatpush1.bf16.msra.mxu0 %v8463_v19  ;;  %v8508_v19 = vld [vmem:[%s12141_s3 + $0xe0] ss:$8 sps:$4 sm:$0xff]  }
  0x76   : > { %1244 = vmatprep.subr.bf16.mxu0 %v8468_v21  ;;  %v8513_v21 = vld [vmem:[%s12141_s3 + $0xf4] ss:$8 sps:$4 sm:$0xff]  }
  0x78   : > { %6828 = vmatmul.mubr.msk.bf16.vlgmr.msra.gmra.mrb[0].mxu0 %vm9719_vm4, %v6827_v24  ;;  %v8516_v24 = vld [vmem:[%s12141_s3 + $0x104] ss:$8 sps:$4 sm:$0xff]  }
  0x79   : > { %1245 = vmatpush1.bf16.msra.mxu0 %v8466_v22  ;;  %881 = vmatprep.mubr.bf16.mxu0 %v9356_v20  ;;  %v8511_v22 = vld [vmem:[%s12141_s3 + $0xf0] ss:$8 sps:$4 sm:$0xff]  }
  0x7a   : > { %1246 = vmatprep.subr.bf16.mxu0 %v8471_v26  ;;  %v8514_v26 = vld [vmem:[%s12141_s3 + $0x100] ss:$8 sps:$4 sm:$0xff]  }
  0x7d   : > { %1247 = vmatpush1.bf16.msra.mxu0 %v8469_v31  ;;  %v6888_v31 = vpack.c.bf16 %v415_v51, %v9357_v61  ;;  %v8520_v51 = vld [vmem:[%s12141_s3 + $0x120] ss:$8 sps:$4 sm:$0xff]  }
  0x7e   : > { %1248 = vmatprep.subr.bf16.mxu0 %v8474_v34  ;;  %v8519_v34 = vld [vmem:[%s12141_s3 + $0x114] ss:$8 sps:$4 sm:$0xff]  }
  0x80   : > { %6831 = vmatmul.mubr.msk.bf16.gmra.mrb[4].mxu0 %vm9719_vm4, %v6830_v35  ;;  %v8517_v35 = vld [vmem:[%s12141_s3 + $0x110] ss:$8 sps:$4 sm:$0xff]  }
  0x81   : > { %1249 = vmatpush1.bf16.msra.mxu0 %v8472_v36  ;;  %891 = vmatprep.mubr.bf16.mxu0 %v9356_v20  ;;  %v8522_v36 = vld [vmem:[%s12141_s3 + $0x124] ss:$8 sps:$4 sm:$0xff]  }
  0x82   : > { %1250 = vmatprep.subr.bf16.mxu0 %v8477_v37  ;;  %v8525_v37 = vld [vmem:[%s12141_s3 + $0x134] ss:$8 sps:$4 sm:$0xff]  }
  0x85   : > { %1251 = vmatpush1.bf16.msra.mxu0 %v8475_v44  ;;  %v8523_v44 = vld [vmem:[%s12141_s3 + $0x130] ss:$8 sps:$4 sm:$0xff]  }
  0x86   : > { %1252 = vmatprep.subr.bf16.mxu0 %v8480_v45  ;;  %v8528_v45 = vld [vmem:[%s12141_s3 + $0x144] ss:$8 sps:$4 sm:$0xff]  }
  0x88   : > { %6834 = vmatmul.mubr.msk.bf16.gmra.mrb[8].mxu0 %vm9719_vm4, %v6833_v46  ;;  %v8526_v46 = vld [vmem:[%s12141_s3 + $0x140] ss:$8 sps:$4 sm:$0xff]  }
  0x89   : > { %1253 = vmatpush1.bf16.msra.mxu0 %v8478_v47  ;;  %901 = vmatprep.mubr.bf16.mxu0 %v9356_v20  ;;  %v8531_v47 = vld [vmem:[%s12141_s3 + $0x154] ss:$8 sps:$4 sm:$0xff]  }
  0x8a   : > { %1254 = vmatprep.subr.bf16.mxu0 %v8483_v49  ;;  %v8529_v49 = vld [vmem:[%s12141_s3 + $0x150] ss:$8 sps:$4 sm:$0xff]  }
  0x8d   : > { %1255 = vmatpush1.bf16.msra.mxu0 %v8481_v55  ;;  %v8534_v55 = vld [vmem:[%s12141_s3 + $0x164] ss:$8 sps:$4 sm:$0xff]  }
  0x8e   : > { %1256 = vmatprep.subr.bf16.mxu0 %v8486_v56  ;;  %v8532_v56 = vld [vmem:[%s12141_s3 + $0x160] ss:$8 sps:$4 sm:$0xff]  }
  0x90   : > { %6837 = vmatmul.mubr.msk.bf16.gmra.mrb[12].mxu0 %vm9719_vm4, %v6836_v58  ;;  %v8537_v58 = vld [vmem:[%s12141_s3 + $0x174] ss:$8 sps:$4 sm:$0xff]  }
  0x91   : > { %1257 = vmatpush1.bf16.msra.mxu0 %v8484_v59  ;;  %1276 = vmatprep.mubr.bf16.mxu0 %v945_v62  ;;  %v8540_v62 = vld [vmem:[%s12141_s3 + $0x304] ss:$8 sps:$4 sm:$0xff]  }
  0x92   : > { %1258 = vmatprep.subr.bf16.mxu0 %v8489_v60  ;;  %v8535_v60 = vld [vmem:[%s12141_s3 + $0x170] ss:$8 sps:$4 sm:$0xff]  }
  0x95   : > { %1259 = vmatpush1.bf16.msra.mxu0 %v8487_v63  ;;  %v8538_v63 = vld [vmem:[%s12141_s3 + $0x300] ss:$8 sps:$4 sm:$0xff]  }
  0x96   : > { %1260 = vmatprep.subr.bf16.mxu0 %v8492_v0  ;;  %v6906_v0 = vpack.c.bf16 %v440_v17, %v9357_v61  ;;  %v8549_v17 = vld [vmem:[%s12141_s3 + $0x334] ss:$8 sps:$4 sm:$0xff]  }
  0x99   : > { %1261 = vmatpush1.bf16.msra.mxu0 %v8490_v1  ;;  %v8543_v1 = vld [vmem:[%s12141_s3 + $0x314] ss:$8 sps:$4 sm:$0xff]  }
  0x9a   : > { %1262 = vmatprep.subr.bf16.mxu0 %v8495_v2  ;;  %v8541_v2 = vld [vmem:[%s12141_s3 + $0x310] ss:$8 sps:$4 sm:$0xff]  }
  0x9d   : > { %1263 = vmatpush1.bf16.msra.mxu0 %v8493_v3  ;;  %v8546_v3 = vld [vmem:[%s12141_s3 + $0x324] ss:$8 sps:$4 sm:$0xff]  }
  0x9e   : > { %1264 = vmatprep.subr.bf16.mxu0 %v8498_v5  ;;  %v9948_v5 = vpack.c.bf16 %v442_v27, %v441_v18  ;;  %v8550_v18 = vld [vmem:[%s12141_s3 + $0x340] ss:$8 sps:$4 sm:$0xff]   ;;  %v8555_v27 = vld [vmem:[%s12141_s3 + $0x354] ss:$8 sps:$4 sm:$0xff]  }
  0xa1   : > { %1265 = vmatpush1.bf16.msra.mxu0 %v8496_v6  ;;  %v8547_v6 = vld [vmem:[%s12141_s3 + $0x330] ss:$8 sps:$4 sm:$0xff]  }
  0xa2   : > { %1266 = vmatprep.subr.bf16.mxu0 %v8501_v7  ;;  %v8561_v7 = vld [vmem:[%s12141_s3 + $0x374] ss:$8 sps:$4 sm:$0xff]  }
  0xa5   : > { %1267 = vmatpush1.bf16.msra.mxu0 %v8499_v8  ;;  %v8570_v8 = vld [vmem:[%s12141_s3 + $0x3a4] ss:$8 sps:$4 sm:$0xff]  }
  0xa6   : > { %1268 = vmatprep.subr.bf16.mxu0 %v8504_v10  ;;  %v8568_v10 = vld [vmem:[%s12141_s3 + $0x3a0] ss:$8 sps:$4 sm:$0xff]  }
  0xa9   : > { %1269 = vmatpush1.bf16.msra.mxu0 %v8502_v11  ;;  %v8573_v11 = vld [vmem:[%s12141_s3 + $0x3b4] ss:$8 sps:$4 sm:$0xff]  }
  0xaa   : > { %1270 = vmatprep.subr.bf16.mxu0 %v8507_v12  ;;  %v8571_v12 = vld [vmem:[%s12141_s3 + $0x3b0] ss:$8 sps:$4 sm:$0xff]  }
  0xad   : > { %1271 = vmatpush1.bf16.msra.mxu0 %v8505_v15  ;;  %v8576_v15 = vld [vmem:[%s12141_s3 + $0x3c4] ss:$8 sps:$4 sm:$0xff]  }
  0xae   : > { %1272 = vmatprep.subr.bf16.mxu0 %v8510_v16  ;;  %v8574_v16 = vld [vmem:[%s12141_s3 + $0x3c0] ss:$8 sps:$4 sm:$0xff]  }
  0xb1   : > { %1273 = vmatpush1.bf16.msra.mxu0 %v8508_v19  ;;  %v8579_v19 = vld [vmem:[%s12141_s3 + $0x3d4] ss:$8 sps:$4 sm:$0xff]  }
  0xb2   : > { %1274 = vmatprep.subr.bf16.mxu0 %v8513_v21  ;;  %v8577_v21 = vld [vmem:[%s12141_s3 + $0x3d0] ss:$8 sps:$4 sm:$0xff]  }
  0xb5   : > { %1275 = vmatpush1.bf16.msra.mxu0 %v8511_v22  ;;  %v8582_v22 = vld [vmem:[%s12141_s3 + $0x3e4] ss:$8 sps:$4 sm:$0xff]  }
  0xb6   : > { %1317 = vmatprep.subr.bf16.mxu0 %v8516_v24  ;;  %v8580_v24 = vld [vmem:[%s12141_s3 + $0x3e0] ss:$8 sps:$4 sm:$0xff]  }
  0xb8   : > { %6889 = vmatmul.mubr.msk.bf16.vlgmr.msra.gmra.mrb[0].mxu0 %vm6887_vm6, %v6888_v31  ;;  %v8583_v31 = vld [vmem:[%s12141_s3 + $0x3f0] ss:$8 sps:$4 sm:$0xff]  }
  0xb9   : > { %1318 = vmatpush1.bf16.msra.mxu0 %v8514_v26  ;;  %1286 = vmatprep.mubr.bf16.mxu0 %v9559_v28  ;;  %v8585_v26 = vld [vmem:[%s12141_s3 + $0x3f4] ss:$8 sps:$4 sm:$0xff]  }
  0xba   : > { %1319 = vmatprep.subr.bf16.mxu0 %v8519_v34  ;;  %v8588_v34 = vld [vmem:[%s12141_s3 + $0x404] ss:$8 sps:$4 sm:$0xff]  }
  0xbd   : > { %1320 = vmatpush1.bf16.msra.mxu0 %v8517_v35  ;;  %v8586_v35 = vld [vmem:[%s12141_s3 + $0x400] ss:$8 sps:$4 sm:$0xff]  }
  0xbe   : > { %1321 = vmatprep.subr.bf16.mxu0 %v8522_v36  ;;  %v8591_v36 = vld [vmem:[%s12141_s3 + $0x414] ss:$8 sps:$4 sm:$0xff]  }
  0xc0   : > { %6894 = vmatmul.mubr.msk.bf16.gmra.mrb[4].mxu0 %vm9638_vm2, %v9564_v30 }
  0xc1   : > { %1322 = vmatpush1.bf16.msra.mxu0 %v8520_v51  ;;  %1296 = vmatprep.mubr.bf16.mxu0 %v9585_v38  ;;  %v8589_v51 = vld [vmem:[%s12141_s3 + $0x410] ss:$8 sps:$4 sm:$0xff]  }
  0xc2   : > { %1323 = vmatprep.subr.bf16.mxu0 %v8525_v37  ;;  %v8594_v37 = vld [vmem:[%s12141_s3 + $0x424] ss:$8 sps:$4 sm:$0xff]  }
  0xc5   : > { %1324 = vmatpush1.bf16.msra.mxu0 %v8523_v44  ;;  %v8592_v44 = vld [vmem:[%s12141_s3 + $0x420] ss:$8 sps:$4 sm:$0xff]  }
  0xc6   : > { %1325 = vmatprep.subr.bf16.mxu0 %v8528_v45  ;;  %v8600_v45 = vld [vmem:[%s12141_s3 + $0x444] ss:$8 sps:$4 sm:$0xff]  }
  0xc8   : > { %6899 = vmatmul.mubr.msk.bf16.gmra.mrb[8].mxu0 %vm9638_vm2, %v9590_v40 }
  0xc9   : > { %1326 = vmatpush1.bf16.msra.mxu0 %v8526_v46  ;;  %1306 = vmatprep.mubr.bf16.mxu0 %v9611_v48  ;;  %v8598_v46 = vld [vmem:[%s12141_s3 + $0x440] ss:$8 sps:$4 sm:$0xff]  }
  0xca   : > { %1327 = vmatprep.subr.bf16.mxu0 %v8531_v47  ;;  %v9290_v47 = vld [vmem:[%s9509_s29 + $0x38] sm:$0xff]  ;;  %s12164_s29 = sshll.u32 %s9492_s30, 6  ;;  %s380_s30 = sand.u32 1, %s9346_s14  }
  0xcb   : > { %s10166_s18 = scalar_lea.vmem %s12139_s1, %s12164_s29  ;;  %s6703_s20 = sshll.u32 %s380_s30, 7 }
  0xcc   : > { %s12043_s25 = scalar_lea.vmem [#allocation3], %s6703_s20  ;;  %s12090_s29 = scalar_lea.hbm %s12148_s10, %s7896_s26 }
  0xcd   : > { %1328 = vmatpush1.bf16.msra.mxu0 %v8529_v49  ;;  %v8603_v49 = vld [vmem:[%s12141_s3 + $0x454] ss:$8 sps:$4 sm:$0xff]   ;;  %s6613_s27 = sshll.u32 %s12043_s25, 4  ;;  %s12097_s17 = scalar_lea.sflag [#allocation4], %s380_s30  ;;  %s12092_s27 = int_to_ptr.vmem [resolvable:$true] %s6613_s27 }
  0xce   : > { %1329 = vmatprep.subr.bf16.mxu0 %v8534_v55  ;;  %v8606_v55 = vld [vmem:[%s12141_s3 + $0x464] ss:$8 sps:$4 sm:$0xff]   ;;  %s9292_s12 = scalar_lea.vmem %s12092_s27, 2048 }
  0xcf   : > { %p9293_p11 = scmp.ne.s32.totalorder %s12092_s27, %s9292_s12 }
  0xd0   : > { %6904 = vmatmul.mubr.msk.bf16.gmra.mrb[12].mxu0 %vm9638_vm2, %v9616_v50 }
  0xd1   : > { %1330 = vmatpush1.bf16.msra.mxu0 %v8532_v56  ;;  %1349 = vmatprep.mubr.bf16.mxu0 %v9356_v20  ;;  %v7030_v56 = vpack.c.bf16 %v9357_v61, %v422_v9  ;;  %v7042_v9 = vpack.c.bf16 %v9357_v61, %v447_v53  ;;  %p9294_p12 = pnand %p9293_p11, %p9456_p5 }
  0xd2   : > { %1331 = vmatprep.subr.bf16.mxu0 %v8537_v58  ;;  %v8609_v58 = vld [vmem:[%s12141_s3 + $0x474] ss:$8 sps:$4 sm:$0xff]  }
  0xd3   : > { %p9295_p13 = pneg %p9294_p12 }
  0xd5   : > { %1332 = vmatpush1.bf16.msra.mxu0 %v8535_v60  ;;  %v8610_v60 = vld [vmem:[%s12147_s9] sm:$0xff]  }
  0xd6   : > { %1730 = vmatprep.subr.bf16.mxu0 %v8540_v62  ;;  %7917 = vmatprep.mubr.msk.bf16.mxu1 %vm2116_vm10, %v8610_v60  ;;  %v1927_v62 = vshrl.u32 %v1926_v25, 7 }
  0xd8   : > { %6907 = vmatmul.mubr.msk.bf16.vlgmr.msra.gmra.mrb[0].mxu0 %vm9906_vm7, %v6906_v0 }
  0xd9   : > { %1731 = vmatpush1.bf16.msra.mxu0 %v8538_v63  ;;  %1359 = vmatprep.mubr.bf16.mxu0 %v9356_v20  ;;  %v10145_v63 = vsub.s32 1, %v1927_v62 }
  0xda   : > { %1732 = vmatprep.subr.bf16.mxu0 %v8543_v1 }
  0xdb   : > { %v1933_v53 = vrot.slane %v1924_v4, %v10145_v63 }
  0xdd   : > { %1733 = vmatpush1.bf16.msra.mxu0 %v8541_v2 }
  0xde   : > { %1734 = vmatprep.subr.bf16.mxu0 %v8546_v3 }
  0xe0   : > { %6910 = vmatmul.mubr.msk.bf16.gmra.mrb[4].mxu0 %vm9719_vm4, %v9948_v5 }
  0xe1   : > { %1735 = vmatpush1.bf16.msra.mxu0 %v8544_v13  ;;  %1369 = vmatprep.mubr.bf16.mxu0 %v9356_v20 }
  0xe2   : > { %1736 = vmatprep.subr.bf16.mxu0 %v8549_v17 }
  0xe5   : > { %1737 = vmatpush1.bf16.msra.mxu0 %v8547_v6  ;;  %v10151_v6 = vsub.s32 0, %v1927_v62 }
  0xe6   : > { %1738 = vmatprep.subr.bf16.mxu0 %v8552_v14 }
  0xe8   : > { %6913 = vmatmul.mubr.msk.bf16.gmra.mrb[8].mxu0 %vm9719_vm4, %v9964_v23 }
  0xe9   : > { %1739 = vmatpush1.bf16.msra.mxu0 %v8550_v18  ;;  %1379 = vmatprep.mubr.bf16.mxu0 %v9356_v20 }
  0xea   : > { %1740 = vmatprep.subr.bf16.mxu0 %v8555_v27 }
  0xed   : > { %1741 = vmatpush1.bf16.msra.mxu0 %v8553_v32 }
  0xee   : > { %1742 = vmatprep.subr.bf16.mxu0 %v8558_v33  ;;  %v10154_v33 = vrot.slane %v1924_v4, %v10151_v6 }
  0xf0   : > { %6916 = vmatmul.mubr.msk.bf16.gmra.mrb[12].mxu0 %vm9719_vm4, %v9986_v29 }
  0xf1   : > { %1743 = vmatpush1.bf16.msra.mxu0 %v8556_v39  ;;  %1762 = vmatprep.mubr.bf16.mxu0 %v9559_v28  ;;  %v8565_v28 = vld [vmem:[%s12141_s3 + $0x390] ss:$8 sps:$4 sm:$0xff]  }
  0xf2   : > { %1744 = vmatprep.subr.bf16.mxu0 %v8561_v7 }
  0xf5   : > { %1745 = vmatpush1.bf16.msra.mxu0 %v8559_v42 }
  0xf6   : > { %1746 = vmatprep.subr.bf16.mxu0 %v8564_v43 }
  0xf9   : > { %1747 = vmatpush1.bf16.msra.mxu0 %v8562_v41 }
  0xfa   : > { %1748 = vmatprep.subr.bf16.mxu0 %v8567_v52 }
  0xfd   : > { %1749 = vmatpush1.bf16.msra.mxu0 %v8565_v28 }
  0xfe   : > { %1750 = vmatprep.subr.bf16.mxu0 %v8570_v8 }
 0x101   : > { %1751 = vmatpush1.bf16.msra.mxu0 %v8568_v10 }
 0x102   : > { %1752 = vmatprep.subr.bf16.mxu0 %v8573_v11 }
 0x105   : > { %1753 = vmatpush1.bf16.msra.mxu0 %v8571_v12 }
 0x106   : > { %1754 = vmatprep.subr.bf16.mxu0 %v8576_v15 }
 0x109   : > { %1755 = vmatpush1.bf16.msra.mxu0 %v8574_v16 }
 0x10a   : > { %1756 = vmatprep.subr.bf16.mxu0 %v8579_v19 }
 0x10d   : > { %1757 = vmatpush1.bf16.msra.mxu0 %v8577_v21 }
 0x10e   : > { %1758 = vmatprep.subr.bf16.mxu0 %v8582_v22 }
 0x111   : > { %1759 = vmatpush1.bf16.msra.mxu0 %v8580_v24 }
 0x112   : > { %1760 = vmatprep.subr.bf16.mxu0 %v8585_v26 }
 0x115   : > { %1761 = vmatpush1.bf16.msra.mxu0 %v8583_v31 }
 0x116   : > { %1803 = vmatprep.subr.bf16.mxu0 %v8588_v34 }
 0x118   : > { %7017 = vmatmul.mubr.msk.bf16.vlgmr.msra.gmra.mrb[0].mxu0 %vm9638_vm2, %v9564_v30  ;;  %v8597_v30 = vld [vmem:[%s12141_s3 + $0x434] ss:$8 sps:$4 sm:$0xff]  }
 0x119   : > { %1804 = vmatpush1.bf16.msra.mxu0 %v8586_v35  ;;  %1772 = vmatprep.mubr.bf16.mxu0 %v9585_v38  ;;  %v8595_v38 = vld [vmem:[%s12141_s3 + $0x430] ss:$8 sps:$4 sm:$0xff]  }
 0x11a   : > { %1805 = vmatprep.subr.bf16.mxu0 %v8591_v36 }
 0x11d   : > { %1806 = vmatpush1.bf16.msra.mxu0 %v8589_v51 }
 0x11e   : > { %1807 = vmatprep.subr.bf16.mxu0 %v8594_v37 }
 0x120   : > { %7022 = vmatmul.mubr.msk.bf16.gmra.mrb[4].mxu0 %vm9638_vm2, %v9590_v40  ;;  %v1439_v40 = vpack.c.bf16 %v9357_v61, %v9290_v47 }
 0x121   : > { %1808 = vmatpush1.bf16.msra.mxu0 %v8592_v44  ;;  %1782 = vmatprep.mubr.bf16.mxu0 %v9611_v48  ;;  %v8601_v48 = vld [vmem:[%s12141_s3 + $0x450] ss:$8 sps:$4 sm:$0xff]  }
 0x122   : > { %1809 = vmatprep.subr.bf16.mxu0 %v8597_v30 }
 0x125   : > { %1810 = vmatpush1.bf16.msra.mxu0 %v8595_v38 }
 0x126   : > { %1811 = vmatprep.subr.bf16.mxu0 %v8600_v45 }
 0x128   : > { %7027 = vmatmul.mubr.msk.bf16.gmra.mrb[8].mxu0 %vm9638_vm2, %v9616_v50 }
 0x129   : > { %1812 = vmatpush1.bf16.msra.mxu0 %v8598_v46  ;;  %1792 = vmatprep.mubr.bf16.mxu0 %v1439_v40 }
 0x12a   : > { %1813 = vmatprep.subr.bf16.mxu0 %v8603_v49 }
 0x12d   : > { %1814 = vmatpush1.bf16.msra.mxu0 %v8601_v48 }
 0x12e   : > { %1815 = vmatprep.subr.bf16.mxu0 %v8606_v55 }
 0x130   : > { %7031 = vmatmul.mubr.msk.bf16.gmra.mrb[12].mxu0 %vm10107_vm8, %v7030_v56 }
 0x131   : > { %1816 = vmatpush1.bf16.msra.mxu0 %v8604_v57  ;;  %1835 = vmatprep.mubr.bf16.mxu0 %v9356_v20 }
 0x132   : > { %1817 = vmatprep.subr.bf16.mxu0 %v8609_v58 }
 0x135   : > { %1818 = vmatpush1.bf16.msra.mxu0 %v8607_v54 }
 0x138   : > { %7034 = vmatmul.mubr.msk.bf16.vlgmr.msra.gmra.mrb[0].mxu0 %vm9719_vm4, %v9948_v5 }
 0x139   : > { %1845 = vmatprep.mubr.bf16.mxu0 %v9356_v20 }
 0x140   : > { %7037 = vmatmul.mubr.msk.bf16.gmra.mrb[4].mxu0 %vm9719_vm4, %v9964_v23 }
 0x141   : > { %1855 = vmatprep.mubr.bf16.mxu0 %v9356_v20 }
 0x148   : > { %7040 = vmatmul.mubr.msk.bf16.gmra.mrb[8].mxu0 %vm9719_vm4, %v9986_v29 }
 0x149   : > { %1865 = vmatprep.mubr.bf16.mxu0 %v9356_v20 }
 0x150   : > { %7043 = vmatmul.mubr.msk.bf16.gmra.mrb[12].mxu0 %vm7041_vm9, %v7042_v9 }
 0x151   : > { %4997 = vmatprep.mubr.bf16.mxu0 %v9356_v20 }
 0x20b   : > { %v1837_v61 = vpop.f32.mrb[0].mxu0 }
 0x20c   : > { %v1839_v0 = vpop.f32.mrb[1].mxu0  ;;  %v1936_v43 = vadd.f32 %v10154_v33, %v1837_v61 }
 0x20d   : > { %v1937_v1 = vadd.f32 %v1933_v53, %v1839_v0  ;;  %v1841_v2 = vpop.f32.mrb[2].mxu0 }
 0x20e   : > { %v1843_v3 = vpop.f32.mrb[3].mxu0  ;;  %v1938_v12 = vadd.f32 %v10154_v33, %v1841_v2  ;;  %v2040_v2 = vld [vmem:[%s10166_s18] sm:$0xff] }
 0x20f   : > { %v7044_v13 = vmul.f32 -1.442695, %v1937_v1  ;;  %v1939_v17 = vadd.f32 %v1933_v53, %v1843_v3 }
 0x211   : > { %9050 = vpow2.f32 %v7044_v13  ;;  %v7045_v5 = vmul.f32 -1.442695, %v1939_v17  ;;  %v2041_v13 = vld [vmem:[%s10166_s18 + $0x8] sm:$0xff] }
 0x213   : > { %9052 = vpow2.f32 %v7045_v5  ;;  %v1847_v14 = vpop.f32.mrb[4].mxu0 }
 0x214   : > { %v1849_v23 = vpop.f32.mrb[5].mxu0  ;;  %v1940_v26 = vadd.f32 %v10154_v33, %v1847_v14 }
 0x215   : > { %v1941_v18 = vadd.f32 %v1933_v53, %v1849_v23  ;;  %v1851_v27 = vpop.f32.mrb[6].mxu0 }
 0x216   : > { %v1853_v32 = vpop.f32.mrb[7].mxu0  ;;  %v1942_v44 = vadd.f32 %v10154_v33, %v1851_v27 }
 0x217   : > { %v7046_v29 = vmul.f32 -1.442695, %v1941_v18  ;;  %v1943_v39 = vadd.f32 %v1933_v53, %v1853_v32 }
 0x219   : > { %9054 = vpow2.f32 %v7046_v29  ;;  %v7047_v7 = vmul.f32 -1.442695, %v1943_v39 }
 0x21b   : > { %v9051_v42 = vpop.eup %9050  ;;  %9056 = vpow2.f32 %v7047_v7  ;;  %v1857_v41 = vpop.f32.mrb[8].mxu0 }
 0x21c   : > { %v1984_v52 = vadd.f32 1.0, %v9051_v42  ;;  %v1859_v28 = vpop.f32.mrb[9].mxu0  ;;  %v1944_v56 = vadd.f32 %v10154_v33, %v1857_v41 }
 0x21d   : > { %v9053_v8 = vpop.eup %9052  ;;  %v1945_v10 = vadd.f32 %v1933_v53, %v1859_v28  ;;  %v1861_v11 = vpop.f32.mrb[10].mxu0 }
 0x21e   : > { %9058 = vrcp.f32 %v1984_v52  ;;  %v1985_v15 = vadd.f32 1.0, %v9053_v8  ;;  %v1863_v16 = vpop.f32.mrb[11].mxu0  ;;  %v1946_v61 = vadd.f32 %v10154_v33, %v1861_v11 }
 0x21f   : > { %9060 = vtanh.f32 %v1936_v43  ;;  %v7048_v19 = vmul.f32 -1.442695, %v1945_v10  ;;  %v1947_v21 = vadd.f32 %v1933_v53, %v1863_v16  ;;  %v2042_v16 = vld [vmem:[%s10166_s18 + $0x10] sm:$0xff] }
 0x220   : > { %9062 = vrcp.f32 %v1985_v15 }
 0x221   : > { %9064 = vpow2.f32 %v7048_v19  ;;  %v7049_v22 = vmul.f32 -1.442695, %v1947_v21  ;;  %v2043_v21 = vld [vmem:[%s10166_s18 + $0x18] sm:$0xff] }
 0x222   : > { %9066 = vtanh.f32 %v1938_v12 }
 0x223   : > { %v9055_v24 = vpop.eup %9054  ;;  %9068 = vpow2.f32 %v7049_v22  ;;  %v1867_v31 = vpop.f32.mrb[12].mxu0 }
 0x224   : > { %v1986_v34 = vadd.f32 1.0, %v9055_v24  ;;  %v1869_v35 = vpop.f32.mrb[13].mxu0  ;;  %v1948_v18 = vadd.f32 %v10154_v33, %v1867_v31 }
 0x225   : > { %v9057_v36 = vpop.eup %9056  ;;  %v1949_v51 = vadd.f32 %v1933_v53, %v1869_v35  ;;  %v1871_v37 = vpop.f32.mrb[14].mxu0 }
 0x226   : > { %9070 = vrcp.f32 %v1986_v34  ;;  %v1987_v30 = vadd.f32 1.0, %v9057_v36  ;;  %v1873_v38 = vpop.f32.mrb[15].mxu0  ;;  %v1950_v11 = vadd.f32 %v10154_v33, %v1871_v37 }
 0x227   : > { %9072 = vtanh.f32 %v1940_v26  ;;  %v7050_v45 = vmul.f32 -1.442695, %v1949_v51  ;;  %v1951_v46 = vadd.f32 %v1933_v53, %v1873_v38 }
 0x228   : > { %v9059_v47 = vpop.eup %9058  ;;  %9074 = vrcp.f32 %v1987_v30 }
 0x229   : > { %v9061_v40 = vpop.eup %9060  ;;  %9076 = vpow2.f32 %v7050_v45  ;;  %v7051_v49 = vmul.f32 -1.442695, %v1951_v46  ;;  %v2009_v48 = vsub.f32 1.0, %v9059_v47  ;;  %v2008_v58 = vmul.f32 0.0, %v9059_v47  ;;  %v2044_v46 = vld [vmem:[%s10166_s18 + $0x20] sm:$0xff] }
 0x22a   : > { %v9063_v55 = vpop.eup %9062  ;;  %9078 = vtanh.f32 %v1942_v44 }
 0x22b   : > { %v9065_v57 = vpop.eup %9064  ;;  %9080 = vpow2.f32 %v7051_v49  ;;  %v2010_v54 = vmul.f32 %v9061_v40, %v2009_v48  ;;  %v2013_v9 = vsub.f32 1.0, %v9063_v55  ;;  %v2045_v40 = vld [vmem:[%s10166_s18 + $0x28] sm:$0xff] }
 0x22c   : > { %v9067_v60 = vpop.eup %9066  ;;  %v1988_v25 = vadd.f32 1.0, %v9065_v57 }
 0x22d   : > { %v9069_v62 = vpop.eup %9068  ;;  %v2011_v4 = vadd.f32 %v2010_v54, %v2008_v58  ;;  %v2014_v53 = vmul.f32 %v9067_v60, %v2013_v9 }
 0x22e   : > { %9082 = vrcp.f32 %v1988_v25  ;;  %v1989_v0 = vadd.f32 1.0, %v9069_v62 }
 0x22f   : > { %9084 = vtanh.f32 %v1944_v56  ;;  %v2012_v1 = vmul.f32 %v9063_v55, %v2011_v4  ;;  %v2048_v27 = vadd.f32 %v2040_v2, %v2011_v4 }
 0x230   : > { %v9071_v3 = vpop.eup %9070  ;;  %9086 = vrcp.f32 %v1989_v0  ;;  %v2046_v0 = vld [vmem:[%s10166_s18 + $0x30] sm:$0xff] }
 0x231   : > { %v9073_v17 = vpop.eup %9072  ;;  %v2015_v5 = vadd.f32 %v2014_v53, %v2012_v1  ;;  %v2017_v14 = vsub.f32 1.0, %v9071_v3  ;;  %9088 = vtanh.f32 %v1946_v61  ;;  %v2047_v1 = vld [vmem:[%s10166_s18 + $0x38] sm:$0xff]  ;;  %s9296_s18 = sshll.u32 %s9360_s21, 4  ;;  %s9297_s18 = int_to_ptr.vmem [resolvable:$false] %s9296_s18 }
 0x232   : > { %v9075_v23 = vpop.eup %9074  ;;  %p9299_p0 = scmp.lt.s32.totalorder %s12092_s27, %s9297_s18 }
 0x233   : > { %v9077_v32 = vpop.eup %9076  ;;  %v2016_v29 = vmul.f32 %v9071_v3, %v2015_v5  ;;  %v2049_v39 = vadd.f32 %v2041_v13, %v2015_v5  ;;  %v2018_v7 = vmul.f32 %v9073_v17, %v2017_v14  ;;  %v2021_v42 = vsub.f32 1.0, %v9075_v23  ;;  %v8620_v5 = vld [vmem:[%s12142_s4 + $0x184] ss:$8 sps:$4 sm:$0xff]  }
 0x234   : > { %v9079_v43 = vpop.eup %9078  ;;  %v1990_v41 = vadd.f32 1.0, %v9077_v32  ;;  %v8611_v14 = vld [vmem:[%s12147_s9 + $0x8] sm:$0xff]   ;;  %v8621_v32 = vld [vmem:[%s12142_s4 + $0x190] ss:$8 sps:$4 sm:$0xff]  }
 0x235   : > { %v9081_v52 = vpop.eup %9080  ;;  %v2072_v28 = vpack.c.bf16 %v2049_v39, %v2048_v27  ;;  %v2019_v8 = vadd.f32 %v2018_v7, %v2016_v29  ;;  %v2022_v10 = vmul.f32 %v9079_v43, %v2021_v42  ;;  %v8623_v27 = vld [vmem:[%s12142_s4 + $0x194] ss:$8 sps:$4 sm:$0xff]   ;;  %v8626_v29 = vld [vmem:[%s12142_s4 + $0x1a4] ss:$8 sps:$4 sm:$0xff]   ;;  %v8624_v42 = vld [vmem:[%s12142_s4 + $0x1a0] ss:$8 sps:$4 sm:$0xff]  }
 0x236   : > { %9090 = vrcp.f32 %v1990_v41  ;;  %v1991_v12 = vadd.f32 1.0, %v9081_v52  ;;  %v8613_v39 = vld [vmem:[%s12147_s9 + $0x18] sm:$0xff]   ;;  %v8614_v7 = vld [vmem:[%s12147_s9 + $0x20] sm:$0xff]  }
 0x237   : > { %9092 = vtanh.f32 %v1948_v18  ;;  %7909 = vmatprep.subr.bf16.mxu1 %v2072_v28  ;;  %v2020_v15 = vmul.f32 %v9075_v23, %v2019_v8  ;;  %v2050_v34 = vadd.f32 %v2042_v16, %v2019_v8  ;;  %v8612_v23 = vld [vmem:[%s12147_s9 + $0x10] sm:$0xff]   ;;  %v8618_v18 = vld [vmem:[%s12142_s4 + $0x180] ss:$8 sps:$4 sm:$0xff]   ;;  %v8632_v52 = vld [vmem:[%s12142_s4 + $0x1c4] ss:$8 sps:$4 sm:$0xff]  }
 0x238   : > { %v9083_v19 = vpop.eup %9082  ;;  %9094 = vrcp.f32 %v1991_v12  ;;  %7910 = vmatpush3.bf16.msra.mxu1 %v2072_v28  ;;  %v8629_v43 = vld [vmem:[%s12142_s4 + $0x1b4] ss:$8 sps:$4 sm:$0xff]   ;;  %v8627_v41 = vld [vmem:[%s12142_s4 + $0x1b0] ss:$8 sps:$4 sm:$0xff]   ;;  %v8615_v28 = vld [vmem:[%s12147_s9 + $0x28] sm:$0xff]  }
 0x239   : > { %v9085_v22 = vpop.eup %9084  ;;  %v2023_v24 = vadd.f32 %v2022_v10, %v2020_v15  ;;  %v2025_v26 = vsub.f32 1.0, %v9083_v19  ;;  %9096 = vtanh.f32 %v1950_v11  ;;  %v8616_v8 = vld [vmem:[%s12147_s9 + $0x30] sm:$0xff]   ;;  %v8630_v10 = vld [vmem:[%s12142_s4 + $0x1c0] ss:$8 sps:$4 sm:$0xff]   ;;  %v8638_v15 = vld [vmem:[%s12142_s4 + $0x1e4] ss:$8 sps:$4 sm:$0xff]  }
 0x23a   : > { %v9087_v31 = vpop.eup %9086  ;;  %v8635_v11 = vld [vmem:[%s12142_s4 + $0x1d4] ss:$8 sps:$4 sm:$0xff]   ;;  %v8633_v12 = vld [vmem:[%s12142_s4 + $0x1d0] ss:$8 sps:$4 sm:$0xff]  }
 0x23b   : > { %v2051_v35 = vadd.f32 %v2043_v21, %v2023_v24  ;;  %v2024_v36 = vmul.f32 %v9083_v19, %v2023_v24  ;;  %v2026_v33 = vmul.f32 %v9085_v22, %v2025_v26  ;;  %v2029_v51 = vsub.f32 1.0, %v9087_v31  ;;  %v9089_v37 = vpop.eup %9088  ;;  %v8617_v16 = vld [vmem:[%s12147_s9 + $0x38] sm:$0xff]   ;;  %v8636_v19 = vld [vmem:[%s12142_s4 + $0x1e0] ss:$8 sps:$4 sm:$0xff]   ;;  %v8644_v24 = vld [vmem:[%s12142_s4 + $0x204] ss:$8 sps:$4 sm:$0xff]  }
 0x23c   : > { %v8641_v21 = vld [vmem:[%s12142_s4 + $0x1f4] ss:$8 sps:$4 sm:$0xff]   ;;  %v8639_v22 = vld [vmem:[%s12142_s4 + $0x1f0] ss:$8 sps:$4 sm:$0xff]   ;;  %v8642_v26 = vld [vmem:[%s12142_s4 + $0x200] ss:$8 sps:$4 sm:$0xff]  }
 0x23d   : > { %v2073_v44 = vpack.c.bf16 %v2051_v35, %v2050_v34  ;;  %v2027_v30 = vadd.f32 %v2026_v33, %v2024_v36  ;;  %v2030_v38 = vmul.f32 %v9089_v37, %v2029_v51  ;;  %v8645_v34 = vld [vmem:[%s12142_s4 + $0x210] ss:$8 sps:$4 sm:$0xff]   ;;  %v8650_v35 = vld [vmem:[%s12142_s4 + $0x224] ss:$8 sps:$4 sm:$0xff]   ;;  %v8648_v36 = vld [vmem:[%s12142_s4 + $0x220] ss:$8 sps:$4 sm:$0xff]  }
 0x23e   : > { %v8653_v33 = vld [vmem:[%s12142_s4 + $0x234] ss:$8 sps:$4 sm:$0xff]   ;;  %v8651_v51 = vld [vmem:[%s12142_s4 + $0x230] ss:$8 sps:$4 sm:$0xff]   ;;  %v8656_v37 = vld [vmem:[%s12142_s4 + $0x244] ss:$8 sps:$4 sm:$0xff]  }
 0x23f   : > { %7911 = vmatprep.subr.bf16.mxu1 %v2073_v44  ;;  %v2028_v45 = vmul.f32 %v9087_v31, %v2027_v30  ;;  %v2052_v57 = vadd.f32 %v2044_v46, %v2027_v30  ;;  %v8647_v31 = vld [vmem:[%s12142_s4 + $0x214] ss:$8 sps:$4 sm:$0xff]   ;;  %v8660_v46 = vld [vmem:[%s12142_s4 + $0x260] ss:$8 sps:$4 sm:$0xff]  }
 0x240   : > { %v9091_v47 = vpop.eup %9090  ;;  %7912 = vmatpush3.bf16.msra.mxu1 %v2073_v44  ;;  %v8654_v44 = vld [vmem:[%s12142_s4 + $0x240] ss:$8 sps:$4 sm:$0xff]   ;;  %v8659_v30 = vld [vmem:[%s12142_s4 + $0x254] ss:$8 sps:$4 sm:$0xff]  }
 0x241   : > { %v9093_v49 = vpop.eup %9092  ;;  %v2031_v48 = vadd.f32 %v2030_v38, %v2028_v45  ;;  %v2033_v55 = vsub.f32 1.0, %v9091_v47  ;;  %v8657_v38 = vld [vmem:[%s12142_s4 + $0x250] ss:$8 sps:$4 sm:$0xff]   ;;  %v8662_v45 = vld [vmem:[%s12142_s4 + $0x264] ss:$8 sps:$4 sm:$0xff]  }
 0x242   : > { %v9095_v56 = vpop.eup %9094 }
 0x243   : > { %v2053_v58 = vadd.f32 %v2045_v40, %v2031_v48  ;;  %v2032_v54 = vmul.f32 %v9091_v47, %v2031_v48  ;;  %v2034_v9 = vmul.f32 %v9093_v49, %v2033_v55  ;;  %v2037_v60 = vsub.f32 1.0, %v9095_v56  ;;  %v9097_v25 = vpop.eup %9096  ;;  %v8665_v47 = vld [vmem:[%s12142_s4 + $0x274] ss:$8 sps:$4 sm:$0xff]   ;;  %v8663_v40 = vld [vmem:[%s12142_s4 + $0x270] ss:$8 sps:$4 sm:$0xff]  }
 0x244   : > { %v8668_v49 = vld [vmem:[%s12142_s4 + $0x284] ss:$8 sps:$4 sm:$0xff]  }
 0x245   : > { %v2074_v62 = vpack.c.bf16 %v2053_v58, %v2052_v57  ;;  %v2035_v4 = vadd.f32 %v2034_v9, %v2032_v54  ;;  %v2038_v53 = vmul.f32 %v9097_v25, %v2037_v60 }
 0x247   : > { %7913 = vmatprep.subr.bf16.mxu1 %v2074_v62  ;;  %v2036_v61 = vmul.f32 %v9095_v56, %v2035_v4  ;;  %v2054_v3 = vadd.f32 %v2046_v0, %v2035_v4 }
 0x248   : > { %7914 = vmatpush3.bf16.msra.mxu1 %v2074_v62 }
 0x249   : > { %v2039_v2 = vadd.f32 %v2038_v53, %v2036_v61 }
 0x24b   : > { %v2055_v13 = vadd.f32 %v2047_v1, %v2039_v2 }
 0x24d   : > { %v2075_v17 = vpack.c.bf16 %v2055_v13, %v2054_v3 }
 0x24f   : > { %7915 = vmatprep.subr.bf16.mxu1 %v2075_v17 }
 0x250   : > { %7916 = vmatpush3.bf16.msra.mxu1 %v2075_v17 }
 0x251   : > { %2663 = vmatprep.subr.bf16.mxu1 %v8620_v5  ;;  %v8666_v5 = vld [vmem:[%s12142_s4 + $0x280] ss:$8 sps:$4 sm:$0xff]  }
 0x253   : > { %7918 = vmatmul.mubr.msk.bf16.vlgmr.msra.gmra.mrb[0].mxu1 %vm2116_vm10, %v8611_v14 }
 0x254   : > { %7921 = vmatprep.mubr.msk.bf16.mxu1 %vm2116_vm10, %v8612_v23  ;;  %2664 = vmatpush1.bf16.msra.mxu1 %v8618_v18 }
 0x255   : > { %2665 = vmatprep.subr.bf16.mxu1 %v8623_v27  ;;  %v8671_v27 = vld [vmem:[%s12142_s4 + $0x294] ss:$8 sps:$4 sm:$0xff]  }
 0x258   : > { %2666 = vmatpush1.bf16.msra.mxu1 %v8621_v32 }
 0x259   : > { %2667 = vmatprep.subr.bf16.mxu1 %v8626_v29 }
 0x25b   : > { %7922 = vmatmul.mubr.msk.bf16.gmra.mrb[4].mxu1 %vm2116_vm10, %v8613_v39 }
 0x25c   : > { %7925 = vmatprep.mubr.msk.bf16.mxu1 %vm2116_vm10, %v8614_v7  ;;  %2668 = vmatpush1.bf16.msra.mxu1 %v8624_v42 }
 0x25d   : > { %2669 = vmatprep.subr.bf16.mxu1 %v8629_v43 }
 0x260   : > { %2670 = vmatpush1.bf16.msra.mxu1 %v8627_v41 }
 0x261   : > { %2671 = vmatprep.subr.bf16.mxu1 %v8632_v52  ;;  %v8669_v52 = vld [vmem:[%s12142_s4 + $0x290] ss:$8 sps:$4 sm:$0xff]  }
 0x263   : > { %7926 = vmatmul.mubr.msk.bf16.gmra.mrb[8].mxu1 %vm2116_vm10, %v8615_v28 }
 0x264   : > { %7929 = vmatprep.mubr.msk.bf16.mxu1 %vm2116_vm10, %v8616_v8  ;;  %2672 = vmatpush1.bf16.msra.mxu1 %v8630_v10 }
 0x265   : > { %2673 = vmatprep.subr.bf16.mxu1 %v8635_v11 }
 0x268   : > { %2674 = vmatpush1.bf16.msra.mxu1 %v8633_v12  ;;  %v8674_v12 = vld [vmem:[%s12142_s4 + $0x2a4] ss:$8 sps:$4 sm:$0xff]  }
 0x269   : > { %2675 = vmatprep.subr.bf16.mxu1 %v8638_v15 }
 0x26b   : > { %7930 = vmatmul.mubr.msk.bf16.gmra.mrb[12].mxu1 %vm2116_vm10, %v8617_v16 }
 0x26c   : > { %2676 = vmatpush1.bf16.msra.mxu1 %v8636_v19 }
 0x26d   : > { %2677 = vmatprep.subr.bf16.mxu1 %v8641_v21 }
 0x270   : > { %2678 = vmatpush1.bf16.msra.mxu1 %v8639_v22 }
 0x271   : > { %2679 = vmatprep.subr.bf16.mxu1 %v8644_v24 }
 0x274   : > { %2680 = vmatpush1.bf16.msra.mxu1 %v8642_v26 }
 0x275   : > { %2681 = vmatprep.subr.bf16.mxu1 %v8647_v31 }
 0x278   : > { %2682 = vmatpush1.bf16.msra.mxu1 %v8645_v34  ;;  %v8672_v34 = vld [vmem:[%s12142_s4 + $0x2a0] ss:$8 sps:$4 sm:$0xff]  }
 0x279   : > { %2683 = vmatprep.subr.bf16.mxu1 %v8650_v35 }
 0x27c   : > { %2684 = vmatpush1.bf16.msra.mxu1 %v8648_v36 }
 0x27d   : > { %2685 = vmatprep.subr.bf16.mxu1 %v8653_v33 }
 0x280   : > { %2686 = vmatpush1.bf16.msra.mxu1 %v8651_v51  ;;  %v8677_v51 = vld [vmem:[%s12142_s4 + $0x2b4] ss:$8 sps:$4 sm:$0xff]  }
 0x281   : > { %2687 = vmatprep.subr.bf16.mxu1 %v8656_v37 }
 0x284   : > { %2688 = vmatpush1.bf16.msra.mxu1 %v8654_v44 }
 0x285   : > { %2689 = vmatprep.subr.bf16.mxu1 %v8659_v30 }
 0x288   : > { %2690 = vmatpush1.bf16.msra.mxu1 %v8657_v38 }
 0x289   : > { %2691 = vmatprep.subr.bf16.mxu1 %v8662_v45 }
 0x28c   : > { %2692 = vmatpush1.bf16.msra.mxu1 %v8660_v46 }
 0x28d   : > { %2693 = vmatprep.subr.bf16.mxu1 %v8665_v47 }
 0x290   : > { %2694 = vmatpush1.bf16.msra.mxu1 %v8663_v40  ;;  %v8675_v40 = vld [vmem:[%s12142_s4 + $0x2b0] ss:$8 sps:$4 sm:$0xff]  }
 0x291   : > { %2776 = vmatprep.subr.bf16.mxu1 %v8668_v49 }
 0x326   : > { %v7919_v48 = vpop.f32.mrb[0].mxu1 }
 0x327   : > { %v2175_v55 = vpop.f32.mrb[1].mxu1  ;;  %v2257_v56 = vrot.slane %v7919_v48, 7  ;;  %v2305_v57 = vrot.slane %v7919_v48, 1 }
 0x328   : > { %v7920_v58 = vpop.f32.mrb[2].mxu1  ;;  %v2254_v54 = vrot.slane %v2175_v55, 7  ;;  %v2302_v4 = vrot.slane %v2175_v55, 1 }
 0x329   : > { %v2258_v9 = vrot.slane %v7920_v58, 7  ;;  %v2306_v60 = vrot.slane %v7920_v58, 1  ;;  %v10306_v25 = vpack.c.bf16 %v7920_v58, %v7919_v48  ;;  %v2178_v62 = vpop.f32.mrb[3].mxu1 }
 0x32a   : > { %v2255_v53 = vrot.slane %v2178_v62, 7  ;;  %v2303_v61 = vrot.slane %v2178_v62, 1  ;;  %v10308_v0 = vpack.c.bf16 %v2178_v62, %v2175_v55 }
 0x32b   : > { %v2259_v1 = vsel %vm431_vm0, %v2257_v56, %v2258_v9  ;;  %v2307_v2 = vsel %vm456_vm3, %v2305_v57, %v2306_v60  ;;  %v8680_v57 = vld [vmem:[%s12142_s4 + $0x2c4] ss:$8 sps:$4 sm:$0xff]  }
 0x32c   : > { %v10312_v3 = vpack.c.bf16 %v2306_v60, %v2307_v2  ;;  %v2256_v13 = vsel %vm431_vm0, %v2254_v54, %v2255_v53  ;;  %v2304_v17 = vsel %vm456_vm3, %v2302_v4, %v2303_v61  ;;  %2695 = vmatprep.mubr.bf16.mxu1 %v10308_v0  ;;  %v10320_v14 = vpack.c.bf16 %v2259_v1, %v2257_v56  ;;  %v8678_v1 = vld [vmem:[%s12142_s4 + $0x2c0] ss:$8 sps:$4 sm:$0xff]  }
 0x32d   : > { %v10322_v23 = vpack.c.bf16 %v2256_v13, %v2254_v54  ;;  %v10324_v18 = vpack.c.bf16 %v2303_v61, %v2304_v17 }
 0x32e   : > { %v7923_v32 = vpop.f32.mrb[4].mxu1 }
 0x32f   : > { %7167 = vmatmul.mubr.msk.bf16.vlgmr.msra.gmra.mrb[16].mxu1 %vm10107_vm8, %v10322_v23  ;;  %v2263_v29 = vrot.slane %v7923_v32, 7  ;;  %v2311_v39 = vrot.slane %v7923_v32, 1  ;;  %v2191_v7 = vpop.f32.mrb[5].mxu1 }
 0x330   : > { %2705 = vmatprep.mubr.bf16.mxu1 %v10306_v25  ;;  %2777 = vmatpush1.bf16.msra.mxu1 %v8666_v5  ;;  %v2260_v42 = vrot.slane %v2191_v7, 7  ;;  %v2308_v43 = vrot.slane %v2191_v7, 1  ;;  %v7924_v41 = vpop.f32.mrb[6].mxu1  ;;  %v8683_v5 = vld [vmem:[%s12142_s4 + $0x2d4] ss:$8 sps:$4 sm:$0xff]  }
 0x331   : > { %v2264_v28 = vrot.slane %v7924_v41, 7  ;;  %v2312_v8 = vrot.slane %v7924_v41, 1  ;;  %v10336_v10 = vpack.c.bf16 %v7924_v41, %v7923_v32  ;;  %v2194_v11 = vpop.f32.mrb[7].mxu1  ;;  %2778 = vmatprep.subr.bf16.mxu1 %v8671_v27  ;;  %v8681_v41 = vld [vmem:[%s12142_s4 + $0x2d0] ss:$8 sps:$4 sm:$0xff]  }
 0x332   : > { %v2261_v15 = vrot.slane %v2194_v11, 7  ;;  %v2309_v16 = vrot.slane %v2194_v11, 1  ;;  %v10341_v19 = vpack.c.bf16 %v2194_v11, %v2191_v7 }
 0x333   : > { %v2265_v21 = vsel %vm431_vm0, %v2263_v29, %v2264_v28  ;;  %v2313_v22 = vsel %vm456_vm3, %v2311_v39, %v2312_v8 }
 0x334   : > { %v10345_v24 = vpack.c.bf16 %v2312_v8, %v2313_v22  ;;  %v2262_v26 = vsel %vm431_vm0, %v2260_v42, %v2261_v15  ;;  %v2310_v31 = vsel %vm456_vm3, %v2308_v43, %v2309_v16  ;;  %2779 = vmatpush1.bf16.msra.mxu1 %v8669_v52  ;;  %v10352_v35 = vpack.c.bf16 %v2265_v21, %v2263_v29 }
 0x335   : > { %v10354_v36 = vpack.c.bf16 %v2309_v16, %v2310_v31  ;;  %v10356_v33 = vpack.c.bf16 %v2262_v26, %v2260_v42  ;;  %2780 = vmatprep.subr.bf16.mxu1 %v8674_v12  ;;  %v8686_v12 = vld [vmem:[%s12142_s4 + $0x2e4] ss:$8 sps:$4 sm:$0xff]  }
 0x336   : > { %v7927_v37 = vpop.f32.mrb[8].mxu1 }
 0x337   : > { %7171 = vmatmul.mubr.msk.bf16.gmra.mrb[20].mxu1 %vm10107_vm8, %v10320_v14  ;;  %v2269_v44 = vrot.slane %v7927_v37, 7  ;;  %v2317_v30 = vrot.slane %v7927_v37, 1  ;;  %v2207_v38 = vpop.f32.mrb[9].mxu1 }
 0x338   : > { %2715 = vmatprep.mubr.bf16.mxu1 %v10341_v19  ;;  %2781 = vmatpush1.bf16.msra.mxu1 %v8672_v34  ;;  %v2266_v45 = vrot.slane %v2207_v38, 7  ;;  %v2314_v46 = vrot.slane %v2207_v38, 1  ;;  %v7928_v47 = vpop.f32.mrb[10].mxu1 }
 0x339   : > { %v2270_v49 = vrot.slane %v7928_v47, 7  ;;  %v2318_v48 = vrot.slane %v7928_v47, 1  ;;  %v10368_v55 = vpack.c.bf16 %v7928_v47, %v7927_v37  ;;  %v2210_v56 = vpop.f32.mrb[11].mxu1  ;;  %2782 = vmatprep.subr.bf16.mxu1 %v8677_v51  ;;  %v8684_v37 = vld [vmem:[%s12142_s4 + $0x2e0] ss:$8 sps:$4 sm:$0xff]  }
 0x33a   : > { %v2267_v58 = vrot.slane %v2210_v56, 7  ;;  %v2315_v54 = vrot.slane %v2210_v56, 1  ;;  %v10373_v9 = vpack.c.bf16 %v2210_v56, %v2207_v38  ;;  %v8692_v47 = vld [vmem:[%s12142_s4 + $0x4] ss:$8 sps:$4 sm:$0xff]  }
 0x33b   : > { %v2271_v60 = vsel %vm431_vm0, %v2269_v44, %v2270_v49  ;;  %v2319_v62 = vsel %vm456_vm3, %v2317_v30, %v2318_v48  ;;  %v8695_v49 = vld [vmem:[%s12142_s4 + $0x14] ss:$8 sps:$4 sm:$0xff]   ;;  %v8698_v56 = vld [vmem:[%s12142_s4 + $0x24] ss:$8 sps:$4 sm:$0xff]  }
 0x33c   : > { %v10377_v4 = vpack.c.bf16 %v2318_v48, %v2319_v62  ;;  %v2268_v53 = vsel %vm431_vm0, %v2266_v45, %v2267_v58  ;;  %v2316_v61 = vsel %vm456_vm3, %v2314_v46, %v2315_v54  ;;  %2783 = vmatpush1.bf16.msra.mxu1 %v8675_v40  ;;  %v10384_v2 = vpack.c.bf16 %v2271_v60, %v2269_v44  ;;  %v8687_v46 = vld [vmem:[%s12142_s4 + $0x2f0] ss:$8 sps:$4 sm:$0xff]   ;;  %v8690_v40 = vld [vmem:[%s12142_s4] ss:$8 sps:$4 sm:$0xff]   ;;  %v8701_v58 = vld [vmem:[%s12142_s4 + $0x34] ss:$8 sps:$4 sm:$0xff]  }
 0x33d   : > { %v10386_v13 = vpack.c.bf16 %v2315_v54, %v2316_v61  ;;  %v10388_v17 = vpack.c.bf16 %v2268_v53, %v2266_v45  ;;  %2784 = vmatprep.subr.bf16.mxu1 %v8680_v57  ;;  %v8689_v45 = vld [vmem:[%s12142_s4 + $0x2f4] ss:$8 sps:$4 sm:$0xff]   ;;  %v8693_v48 = vld [vmem:[%s12142_s4 + $0x10] ss:$8 sps:$4 sm:$0xff]   ;;  %v8696_v57 = vld [vmem:[%s12142_s4 + $0x20] ss:$8 sps:$4 sm:$0xff]  }
 0x33e   : > { %v7931_v27 = vpop.f32.mrb[12].mxu1  ;;  %v8699_v54 = vld [vmem:[%s12142_s4 + $0x30] ss:$8 sps:$4 sm:$0xff]   ;;  %v8704_v60 = vld [vmem:[%s12142_s4 + $0x44] ss:$8 sps:$4 sm:$0xff]  }
 0x33f   : > { %7175 = vmatmul.mubr.msk.bf16.gmra.mrb[24].mxu1 %vm10107_vm8, %v10356_v33  ;;  %v2275_v32 = vrot.slane %v7931_v27, 7  ;;  %v2323_v29 = vrot.slane %v7931_v27, 1  ;;  %v2223_v39 = vpop.f32.mrb[13].mxu1  ;;  %v8702_v62 = vld [vmem:[%s12142_s4 + $0x40] ss:$8 sps:$4 sm:$0xff]  }
 0x340   : > { %2725 = vmatprep.mubr.bf16.mxu1 %v10336_v10  ;;  %2785 = vmatpush1.bf16.msra.mxu1 %v8678_v1  ;;  %v2272_v7 = vrot.slane %v2223_v39, 7  ;;  %v2320_v42 = vrot.slane %v2223_v39, 1  ;;  %v7932_v43 = vpop.f32.mrb[14].mxu1  ;;  %v8707_v53 = vld [vmem:[%s12142_s4 + $0x54] ss:$8 sps:$4 sm:$0xff]  }
 0x341   : > { %v2276_v52 = vrot.slane %v7932_v43, 7  ;;  %v2324_v28 = vrot.slane %v7932_v43, 1  ;;  %v10400_v8 = vpack.c.bf16 %v7932_v43, %v7931_v27  ;;  %v2226_v11 = vpop.f32.mrb[15].mxu1  ;;  %2786 = vmatprep.subr.bf16.mxu1 %v8683_v5  ;;  %v8705_v61 = vld [vmem:[%s12142_s4 + $0x50] ss:$8 sps:$4 sm:$0xff]  }
 0x342   : > { %v2273_v15 = vrot.slane %v2226_v11, 7  ;;  %v2321_v16 = vrot.slane %v2226_v11, 1  ;;  %v10405_v21 = vpack.c.bf16 %v2226_v11, %v2223_v39  ;;  %v8710_v1 = vld [vmem:[%s12142_s4 + $0x64] ss:$8 sps:$4 sm:$0xff]   ;;  %v8708_v5 = vld [vmem:[%s12142_s4 + $0x60] ss:$8 sps:$4 sm:$0xff]  }
 0x343   : > { %v2277_v22 = vsel %vm431_vm0, %v2275_v32, %v2276_v52  ;;  %v2325_v26 = vsel %vm456_vm3, %v2323_v29, %v2324_v28  ;;  %v8713_v27 = vld [vmem:[%s12142_s4 + $0x74] ss:$8 sps:$4 sm:$0xff]   ;;  %v8716_v29 = vld [vmem:[%s12142_s4 + $0x84] ss:$8 sps:$4 sm:$0xff]   ;;  %v8714_v39 = vld [vmem:[%s12142_s4 + $0x80] ss:$8 sps:$4 sm:$0xff]  }
 0x344   : > { %v10409_v31 = vpack.c.bf16 %v2324_v28, %v2325_v26  ;;  %v2274_v34 = vsel %vm431_vm0, %v2272_v7, %v2273_v15  ;;  %v2322_v51 = vsel %vm456_vm3, %v2320_v42, %v2321_v16  ;;  %2787 = vmatpush1.bf16.msra.mxu1 %v8681_v41  ;;  %v10416_v44 = vpack.c.bf16 %v2277_v22, %v2275_v32  ;;  %v8711_v32 = vld [vmem:[%s12142_s4 + $0x70] ss:$8 sps:$4 sm:$0xff]   ;;  %v8722_v43 = vld [vmem:[%s12142_s4 + $0xa4] ss:$8 sps:$4 sm:$0xff]   ;;  %v8720_v41 = vld [vmem:[%s12142_s4 + $0xa0] ss:$8 sps:$4 sm:$0xff]  }
 0x345   : > { %v10418_v30 = vpack.c.bf16 %v2321_v16, %v2322_v51  ;;  %v10420_v38 = vpack.c.bf16 %v2274_v34, %v2272_v7  ;;  %2788 = vmatprep.subr.bf16.mxu1 %v8686_v12  ;;  %v8719_v7 = vld [vmem:[%s12142_s4 + $0x94] ss:$8 sps:$4 sm:$0xff]   ;;  %v8717_v42 = vld [vmem:[%s12142_s4 + $0x90] ss:$8 sps:$4 sm:$0xff]   ;;  %v8728_v11 = vld [vmem:[%s12142_s4 + $0xc4] ss:$8 sps:$4 sm:$0xff]  }
 0x346   : > { %v8725_v52 = vld [vmem:[%s12142_s4 + $0xb4] ss:$8 sps:$4 sm:$0xff]   ;;  %v8723_v28 = vld [vmem:[%s12142_s4 + $0xb0] ss:$8 sps:$4 sm:$0xff]   ;;  %v8726_v12 = vld [vmem:[%s12142_s4 + $0xc0] ss:$8 sps:$4 sm:$0xff]  }
 0x347   : > { %7179 = vmatmul.mubr.msk.bf16.gmra.mrb[28].mxu1 %vm10107_vm8, %v10352_v35  ;;  %v8731_v15 = vld [vmem:[%s12142_s4 + $0xd4] ss:$8 sps:$4 sm:$0xff]   ;;  %v8729_v16 = vld [vmem:[%s12142_s4 + $0xd0] ss:$8 sps:$4 sm:$0xff]   ;;  %v8734_v22 = vld [vmem:[%s12142_s4 + $0xe4] ss:$8 sps:$4 sm:$0xff]  }
 0x348   : > { %2735 = vmatprep.mubr.bf16.mxu1 %v10373_v9  ;;  %2789 = vmatpush1.bf16.msra.mxu1 %v8684_v37  ;;  %v8732_v26 = vld [vmem:[%s12142_s4 + $0xe0] ss:$8 sps:$4 sm:$0xff]   ;;  %v8737_v34 = vld [vmem:[%s12142_s4 + $0xf4] ss:$8 sps:$4 sm:$0xff]   ;;  %v8735_v51 = vld [vmem:[%s12142_s4 + $0xf0] ss:$8 sps:$4 sm:$0xff]  }
 0x349   : > { %2790 = vmatprep.subr.bf16.mxu1 %v8689_v45  ;;  %v9359_v37 = vmov 0.0|0.0   ;;  %v8740_v45 = vld [vmem:[%s12142_s4 + $0x104] ss:$8 sps:$4 sm:$0xff]  }
 0x34c   : > { %2791 = vmatpush1.bf16.msra.mxu1 %v8687_v46  ;;  %v8738_v46 = vld [vmem:[%s12142_s4 + $0x100] ss:$8 sps:$4 sm:$0xff]  }
 0x34d   : > { %3242 = vmatprep.subr.bf16.mxu1 %v8692_v47  ;;  %v8743_v47 = vld [vmem:[%s12142_s4 + $0x114] ss:$8 sps:$4 sm:$0xff]  }
 0x34f   : > { %7183 = vmatmul.mubr.msk.bf16.gmra.mrb[32].mxu1 %vm10107_vm8, %v10388_v17 }
 0x350   : > { %2745 = vmatprep.mubr.bf16.mxu1 %v10368_v55 }
 0x357   : > { %7187 = vmatmul.mubr.msk.bf16.gmra.mrb[36].mxu1 %vm10107_vm8, %v10384_v2 }
 0x358   : > { %2755 = vmatprep.mubr.bf16.mxu1 %v10405_v21 }
 0x35f   : > { %7191 = vmatmul.mubr.msk.bf16.gmra.mrb[40].mxu1 %vm10107_vm8, %v10420_v38 }
 0x360   : > { %2765 = vmatprep.mubr.bf16.mxu1 %v10400_v8 }
 0x367   : > { %7195 = vmatmul.mubr.msk.bf16.gmra.mrb[44].mxu1 %vm10107_vm8, %v10416_v44 }
 0x368   : > { %2808 = vmatprep.mubr.bf16.mxu1 %v9356_v20 }
 0x36f   : > { %7198 = vmatmul.mubr.msk.bf16.vlgmr.msra.gmra.mrb[16].mxu1 %vm9906_vm7, %v10324_v18 }
 0x370   : > { %3243 = vmatpush1.bf16.msra.mxu1 %v8690_v40  ;;  %2818 = vmatprep.mubr.bf16.mxu1 %v9356_v20  ;;  %v8741_v40 = vld [vmem:[%s12142_s4 + $0x110] ss:$8 sps:$4 sm:$0xff]  }
 0x371   : > { %3244 = vmatprep.subr.bf16.mxu1 %v8695_v49  ;;  %v8746_v49 = vld [vmem:[%s12142_s4 + $0x124] ss:$8 sps:$4 sm:$0xff]  }
 0x374   : > { %3245 = vmatpush1.bf16.msra.mxu1 %v8693_v48  ;;  %v8744_v48 = vld [vmem:[%s12142_s4 + $0x120] ss:$8 sps:$4 sm:$0xff]  }
 0x375   : > { %3246 = vmatprep.subr.bf16.mxu1 %v8698_v56  ;;  %v8747_v56 = vld [vmem:[%s12142_s4 + $0x130] ss:$8 sps:$4 sm:$0xff]  }
 0x377   : > { %7201 = vmatmul.mubr.msk.bf16.gmra.mrb[20].mxu1 %vm9906_vm7, %v10312_v3 }
 0x378   : > { %3247 = vmatpush1.bf16.msra.mxu1 %v8696_v57  ;;  %2828 = vmatprep.mubr.bf16.mxu1 %v9356_v20  ;;  %v8752_v57 = vld [vmem:[%s12142_s4 + $0x144] ss:$8 sps:$4 sm:$0xff]  }
 0x379   : > { %3248 = vmatprep.subr.bf16.mxu1 %v8701_v58  ;;  %v8750_v58 = vld [vmem:[%s12142_s4 + $0x140] ss:$8 sps:$4 sm:$0xff]  }
 0x37c   : > { %3249 = vmatpush1.bf16.msra.mxu1 %v8699_v54  ;;  %v8753_v54 = vld [vmem:[%s12142_s4 + $0x150] ss:$8 sps:$4 sm:$0xff]  }
 0x37d   : > { %3250 = vmatprep.subr.bf16.mxu1 %v8704_v60  ;;  %v8758_v60 = vld [vmem:[%s12142_s4 + $0x164] ss:$8 sps:$4 sm:$0xff]  }
 0x37f   : > { %7204 = vmatmul.mubr.msk.bf16.gmra.mrb[24].mxu1 %vm9906_vm7, %v10354_v36 }
 0x380   : > { %3251 = vmatpush1.bf16.msra.mxu1 %v8702_v62  ;;  %2838 = vmatprep.mubr.bf16.mxu1 %v9356_v20  ;;  %v8756_v62 = vld [vmem:[%s12142_s4 + $0x160] ss:$8 sps:$4 sm:$0xff]  }
 0x381   : > { %3252 = vmatprep.subr.bf16.mxu1 %v8707_v53  ;;  %v8761_v53 = vld [vmem:[%s12142_s4 + $0x174] ss:$8 sps:$4 sm:$0xff]  }
 0x384   : > { %3253 = vmatpush1.bf16.msra.mxu1 %v8705_v61  ;;  %v8759_v61 = vld [vmem:[%s12142_s4 + $0x170] ss:$8 sps:$4 sm:$0xff]  }
 0x385   : > { %3254 = vmatprep.subr.bf16.mxu1 %v8710_v1  ;;  %v8764_v1 = vld [vmem:[%s12142_s4 + $0x304] ss:$8 sps:$4 sm:$0xff]  }
 0x387   : > { %7207 = vmatmul.mubr.msk.bf16.gmra.mrb[28].mxu1 %vm9906_vm7, %v10345_v24 }
 0x388   : > { %3255 = vmatpush1.bf16.msra.mxu1 %v8708_v5  ;;  %2848 = vmatprep.mubr.bf16.mxu1 %v9356_v20  ;;  %v8762_v5 = vld [vmem:[%s12142_s4 + $0x300] ss:$8 sps:$4 sm:$0xff]  }
 0x389   : > { %3256 = vmatprep.subr.bf16.mxu1 %v8713_v27  ;;  %v8767_v27 = vld [vmem:[%s12142_s4 + $0x314] ss:$8 sps:$4 sm:$0xff]  }
 0x38c   : > { %3257 = vmatpush1.bf16.msra.mxu1 %v8711_v32  ;;  %v8765_v32 = vld [vmem:[%s12142_s4 + $0x310] ss:$8 sps:$4 sm:$0xff]  }
 0x38d   : > { %3258 = vmatprep.subr.bf16.mxu1 %v8716_v29  ;;  %v8770_v29 = vld [vmem:[%s12142_s4 + $0x324] ss:$8 sps:$4 sm:$0xff]  }
 0x38f   : > { %7210 = vmatmul.mubr.msk.bf16.gmra.mrb[32].mxu1 %vm9906_vm7, %v10386_v13 }
 0x390   : > { %3259 = vmatpush1.bf16.msra.mxu1 %v8714_v39  ;;  %2858 = vmatprep.mubr.bf16.mxu1 %v9356_v20  ;;  %v8768_v39 = vld [vmem:[%s12142_s4 + $0x320] ss:$8 sps:$4 sm:$0xff]  }
 0x391   : > { %3260 = vmatprep.subr.bf16.mxu1 %v8719_v7  ;;  %v8773_v7 = vld [vmem:[%s12142_s4 + $0x334] ss:$8 sps:$4 sm:$0xff]  }
 0x394   : > { %3261 = vmatpush1.bf16.msra.mxu1 %v8717_v42  ;;  %v8771_v42 = vld [vmem:[%s12142_s4 + $0x330] ss:$8 sps:$4 sm:$0xff]  }
 0x395   : > { %3262 = vmatprep.subr.bf16.mxu1 %v8722_v43  ;;  %v8776_v43 = vld [vmem:[%s12142_s4 + $0x344] ss:$8 sps:$4 sm:$0xff]  }
 0x397   : > { %7213 = vmatmul.mubr.msk.bf16.gmra.mrb[36].mxu1 %vm9906_vm7, %v10377_v4 }
 0x398   : > { %3263 = vmatpush1.bf16.msra.mxu1 %v8720_v41  ;;  %2868 = vmatprep.mubr.bf16.mxu1 %v9356_v20  ;;  %v8774_v41 = vld [vmem:[%s12142_s4 + $0x340] ss:$8 sps:$4 sm:$0xff]  }
 0x399   : > { %3264 = vmatprep.subr.bf16.mxu1 %v8725_v52  ;;  %v8777_v52 = vld [vmem:[%s12142_s4 + $0x350] ss:$8 sps:$4 sm:$0xff]  }
 0x39c   : > { %3265 = vmatpush1.bf16.msra.mxu1 %v8723_v28  ;;  %v8782_v28 = vld [vmem:[%s12142_s4 + $0x364] ss:$8 sps:$4 sm:$0xff]  }
 0x39d   : > { %3266 = vmatprep.subr.bf16.mxu1 %v8728_v11  ;;  %v8780_v11 = vld [vmem:[%s12142_s4 + $0x360] ss:$8 sps:$4 sm:$0xff]  }
 0x39f   : > { %7216 = vmatmul.mubr.msk.bf16.gmra.mrb[40].mxu1 %vm9906_vm7, %v10418_v30 }
 0x3a0   : > { %3267 = vmatpush1.bf16.msra.mxu1 %v8726_v12  ;;  %2878 = vmatprep.mubr.bf16.mxu1 %v9356_v20  ;;  %v8785_v12 = vld [vmem:[%s12142_s4 + $0x374] ss:$8 sps:$4 sm:$0xff]  }
 0x3a1   : > { %3268 = vmatprep.subr.bf16.mxu1 %v8731_v15  ;;  %v8783_v15 = vld [vmem:[%s12142_s4 + $0x370] ss:$8 sps:$4 sm:$0xff]  }
 0x3a4   : > { %3269 = vmatpush1.bf16.msra.mxu1 %v8729_v16  ;;  %v8788_v16 = vld [vmem:[%s12142_s4 + $0x384] ss:$8 sps:$4 sm:$0xff]  }
 0x3a5   : > { %3270 = vmatprep.subr.bf16.mxu1 %v8734_v22  ;;  %v8786_v22 = vld [vmem:[%s12142_s4 + $0x380] ss:$8 sps:$4 sm:$0xff]  }
 0x3a7   : > { %7219 = vmatmul.mubr.msk.bf16.gmra.mrb[44].mxu1 %vm9906_vm7, %v10409_v31 }
 0x3a8   : > { %3271 = vmatpush1.bf16.msra.mxu1 %v8732_v26  ;;  %3274 = vmatprep.mubr.bf16.mxu1 %v9359_v37  ;;  %v8791_v26 = vld [vmem:[%s12142_s4 + $0x394] ss:$8 sps:$4 sm:$0xff]  }
 0x3a9   : > { %3272 = vmatprep.subr.bf16.mxu1 %v8737_v34  ;;  %v8789_v34 = vld [vmem:[%s12142_s4 + $0x390] ss:$8 sps:$4 sm:$0xff]  }
 0x3ac   : > { %3273 = vmatpush1.bf16.msra.mxu1 %v8735_v51  ;;  %v8794_v51 = vld [vmem:[%s12142_s4 + $0x3a4] ss:$8 sps:$4 sm:$0xff]  }
 0x3ad   : > { %3355 = vmatprep.subr.bf16.mxu1 %v8740_v45  ;;  %v8792_v45 = vld [vmem:[%s12142_s4 + $0x3a0] ss:$8 sps:$4 sm:$0xff]  }
 0x3af   : > { %3275 = vmatmul.mubr.bf16.vlgmr.msra.gmra.mrb[16].mxu1 %v9359_v37 }
 0x3b0   : > { %3284 = vmatprep.mubr.bf16.mxu1 %v10308_v0  ;;  %3356 = vmatpush1.bf16.msra.mxu1 %v8738_v46  ;;  %v8749_v0 = vld [vmem:[%s12142_s4 + $0x134] ss:$8 sps:$4 sm:$0xff]  }
 0x3b1   : > { %3357 = vmatprep.subr.bf16.mxu1 %v8743_v47  ;;  %v8797_v46 = vld [vmem:[%s12142_s4 + $0x3b4] ss:$8 sps:$4 sm:$0xff]   ;;  %v8795_v47 = vld [vmem:[%s12142_s4 + $0x3b0] ss:$8 sps:$4 sm:$0xff]  }
 0x3b4   : > { %3358 = vmatpush1.bf16.msra.mxu1 %v8741_v40  ;;  %v8800_v40 = vld [vmem:[%s12142_s4 + $0x3c4] ss:$8 sps:$4 sm:$0xff]  }
 0x3b5   : > { %3359 = vmatprep.subr.bf16.mxu1 %v8746_v49  ;;  %v8798_v49 = vld [vmem:[%s12142_s4 + $0x3c0] ss:$8 sps:$4 sm:$0xff]  }
 0x3b7   : > { %7271 = vmatmul.mubr.msk.bf16.gmra.mrb[20].mxu1 %vm10107_vm8, %v10322_v23  ;;  %v8755_v23 = vld [vmem:[%s12142_s4 + $0x154] ss:$8 sps:$4 sm:$0xff]  }
 0x3b8   : > { %3294 = vmatprep.mubr.bf16.mxu1 %v10306_v25  ;;  %3360 = vmatpush1.bf16.msra.mxu1 %v8744_v48  ;;  %v8803_v48 = vld [vmem:[%s12142_s4 + $0x3d4] ss:$8 sps:$4 sm:$0xff]  }
 0x3b9   : > { %3361 = vmatprep.subr.bf16.mxu1 %v8749_v0  ;;  %v8801_v0 = vld [vmem:[%s12142_s4 + $0x3d0] ss:$8 sps:$4 sm:$0xff]  }
 0x3bc   : > { %3362 = vmatpush1.bf16.msra.mxu1 %v8747_v56  ;;  %v8806_v56 = vld [vmem:[%s12142_s4 + $0x3e4] ss:$8 sps:$4 sm:$0xff]  }
 0x3bd   : > { %3363 = vmatprep.subr.bf16.mxu1 %v8752_v57  ;;  %v8804_v57 = vld [vmem:[%s12142_s4 + $0x3e0] ss:$8 sps:$4 sm:$0xff]  }
 0x3bf   : > { %7275 = vmatmul.mubr.msk.bf16.gmra.mrb[24].mxu1 %vm10107_vm8, %v10320_v14 }
 0x3c0   : > { %3304 = vmatprep.mubr.bf16.mxu1 %v10341_v19  ;;  %3364 = vmatpush1.bf16.msra.mxu1 %v8750_v58  ;;  %v8809_v58 = vld [vmem:[%s12142_s4 + $0x3f4] ss:$8 sps:$4 sm:$0xff]  }
 0x3c1   : > { %3365 = vmatprep.subr.bf16.mxu1 %v8755_v23  ;;  %v8807_v23 = vld [vmem:[%s12142_s4 + $0x3f0] ss:$8 sps:$4 sm:$0xff]  }
 0x3c4   : > { %3366 = vmatpush1.bf16.msra.mxu1 %v8753_v54  ;;  %v8812_v54 = vld [vmem:[%s12142_s4 + $0x404] ss:$8 sps:$4 sm:$0xff]  }
 0x3c5   : > { %3367 = vmatprep.subr.bf16.mxu1 %v8758_v60  ;;  %v8810_v60 = vld [vmem:[%s12142_s4 + $0x400] ss:$8 sps:$4 sm:$0xff]  }
 0x3c7   : > { %7279 = vmatmul.mubr.msk.bf16.gmra.mrb[28].mxu1 %vm10107_vm8, %v10356_v33 }
 0x3c8   : > { %3314 = vmatprep.mubr.bf16.mxu1 %v10336_v10  ;;  %3368 = vmatpush1.bf16.msra.mxu1 %v8756_v62  ;;  %v8815_v62 = vld [vmem:[%s12142_s4 + $0x414] ss:$8 sps:$4 sm:$0xff]  }
 0x3c9   : > { %3369 = vmatprep.subr.bf16.mxu1 %v8761_v53  ;;  %v8818_v53 = vld [vmem:[%s12142_s4 + $0x424] ss:$8 sps:$4 sm:$0xff]  }
 0x3cc   : > { %3370 = vmatpush1.bf16.msra.mxu1 %v8759_v61  ;;  %v8816_v61 = vld [vmem:[%s12142_s4 + $0x420] ss:$8 sps:$4 sm:$0xff]  }
 0x3cd   : > { %3853 = vmatprep.subr.bf16.mxu1 %v8764_v1  ;;  %v8824_v1 = vld [vmem:[%s12142_s4 + $0x444] ss:$8 sps:$4 sm:$0xff]  }
 0x3cf   : > { %7283 = vmatmul.mubr.msk.bf16.gmra.mrb[32].mxu1 %vm10107_vm8, %v10352_v35 }
 0x3d0   : > { %3324 = vmatprep.mubr.bf16.mxu1 %v10373_v9 }
 0x3d7   : > { %7287 = vmatmul.mubr.msk.bf16.gmra.mrb[36].mxu1 %vm10107_vm8, %v10388_v17 }
 0x3d8   : > { %3334 = vmatprep.mubr.bf16.mxu1 %v10368_v55 }
 0x3df   : > { %7291 = vmatmul.mubr.msk.bf16.gmra.mrb[40].mxu1 %vm10107_vm8, %v10384_v2 }
 0x3e0   : > { %3344 = vmatprep.mubr.bf16.mxu1 %v10405_v21 }
 0x3e7   : > { %7295 = vmatmul.mubr.msk.bf16.gmra.mrb[44].mxu1 %vm10107_vm8, %v10420_v38 }
 0x3e8   : > { %3387 = vmatprep.mubr.bf16.mxu1 %v9356_v20 }
 0x3ef   : > { %3388 = vmatmul.mubr.bf16.vlgmr.msra.gmra.mrb[16].mxu1 %v9359_v37 }
 0x3f0   : > { %3854 = vmatpush1.bf16.msra.mxu1 %v8762_v5  ;;  %3397 = vmatprep.mubr.bf16.mxu1 %v9356_v20  ;;  %v8822_v5 = vld [vmem:[%s12142_s4 + $0x440] ss:$8 sps:$4 sm:$0xff]  }
 0x3f1   : > { %3855 = vmatprep.subr.bf16.mxu1 %v8767_v27  ;;  %v8830_v27 = vld [vmem:[%s12142_s4 + $0x464] ss:$8 sps:$4 sm:$0xff]  }
 0x3f4   : > { %3856 = vmatpush1.bf16.msra.mxu1 %v8765_v32  ;;  %v8828_v32 = vld [vmem:[%s12142_s4 + $0x460] ss:$8 sps:$4 sm:$0xff]  }
 0x3f5   : > { %3857 = vmatprep.subr.bf16.mxu1 %v8770_v29  ;;  %v8857_v29 = vld [vmem:[%s12143_s5 + $0x1f4] ss:$8 sps:$4 sm:$0xff]  }
 0x3f7   : > { %7298 = vmatmul.mubr.msk.bf16.gmra.mrb[20].mxu1 %vm9906_vm7, %v10324_v18  ;;  %v8779_v18 = vld [vmem:[%s12142_s4 + $0x354] ss:$8 sps:$4 sm:$0xff]  }
 0x3f8   : > { %3858 = vmatpush1.bf16.msra.mxu1 %v8768_v39  ;;  %3407 = vmatprep.mubr.bf16.mxu1 %v9356_v20  ;;  %v8855_v39 = vld [vmem:[%s12143_s5 + $0x1f0] ss:$8 sps:$4 sm:$0xff]  }
 0x3f9   : > { %3859 = vmatprep.subr.bf16.mxu1 %v8773_v7  ;;  %v8860_v7 = vld [vmem:[%s12143_s5 + $0x204] ss:$8 sps:$4 sm:$0xff]  }
 0x3fc   : > { %3860 = vmatpush1.bf16.msra.mxu1 %v8771_v42  ;;  %v8863_v42 = vld [vmem:[%s12143_s5 + $0x284] ss:$8 sps:$4 sm:$0xff]  }
 0x3fd   : > { %3861 = vmatprep.subr.bf16.mxu1 %v8776_v43  ;;  %v8858_v43 = vld [vmem:[%s12143_s5 + $0x200] ss:$8 sps:$4 sm:$0xff]   ;;  %4965 = vmatprep.subr.bf16.mxu0 %v8863_v42 }
 0x3ff   : > { %7301 = vmatmul.mubr.msk.bf16.gmra.mrb[24].mxu1 %vm9906_vm7, %v10312_v3 }
 0x400   : > { %3862 = vmatpush1.bf16.msra.mxu1 %v8774_v41  ;;  %3417 = vmatprep.mubr.bf16.mxu1 %v9356_v20  ;;  %v8861_v41 = vld [vmem:[%s12143_s5 + $0x280] ss:$8 sps:$4 sm:$0xff]  }
 0x401   : > { %3863 = vmatprep.subr.bf16.mxu1 %v8779_v18  ;;  %4966 = vmatpush1.bf16.msra.mxu0 %v8861_v41  ;;  %v8866_v18 = vld [vmem:[%s12143_s5 + $0x214] ss:$8 sps:$4 sm:$0xff]  }
 0x404   : > { %3864 = vmatpush1.bf16.msra.mxu1 %v8777_v52  ;;  %v8869_v52 = vld [vmem:[%s12143_s5 + $0x294] ss:$8 sps:$4 sm:$0xff]  }
 0x405   : > { %3865 = vmatprep.subr.bf16.mxu1 %v8782_v28  ;;  %v8864_v28 = vld [vmem:[%s12143_s5 + $0x210] ss:$8 sps:$4 sm:$0xff]   ;;  %4967 = vmatprep.subr.bf16.mxu0 %v8869_v52 }
 0x407   : > { %7304 = vmatmul.mubr.msk.bf16.gmra.mrb[28].mxu1 %vm9906_vm7, %v10354_v36 }
 0x408   : > { %3866 = vmatpush1.bf16.msra.mxu1 %v8780_v11  ;;  %3427 = vmatprep.mubr.bf16.mxu1 %v9356_v20  ;;  %v8867_v11 = vld [vmem:[%s12143_s5 + $0x290] ss:$8 sps:$4 sm:$0xff]  }
 0x409   : > { %3867 = vmatprep.subr.bf16.mxu1 %v8785_v12  ;;  %v8872_v12 = vld [vmem:[%s12143_s5 + $0x224] ss:$8 sps:$4 sm:$0xff]   ;;  %4968 = vmatpush1.bf16.msra.mxu0 %v8867_v11 }
 0x40c   : > { %3868 = vmatpush1.bf16.msra.mxu1 %v8783_v15  ;;  %v8875_v15 = vld [vmem:[%s12143_s5 + $0x2a4] ss:$8 sps:$4 sm:$0xff]  }
 0x40d   : > { %3869 = vmatprep.subr.bf16.mxu1 %v8788_v16  ;;  %v8870_v16 = vld [vmem:[%s12143_s5 + $0x220] ss:$8 sps:$4 sm:$0xff]   ;;  %4969 = vmatprep.subr.bf16.mxu0 %v8875_v15 }
 0x40f   : > { %7307 = vmatmul.mubr.msk.bf16.gmra.mrb[32].mxu1 %vm9906_vm7, %v10345_v24 }
 0x410   : > { %3870 = vmatpush1.bf16.msra.mxu1 %v8786_v22  ;;  %3437 = vmatprep.mubr.bf16.mxu1 %v9356_v20  ;;  %v8873_v22 = vld [vmem:[%s12143_s5 + $0x2a0] ss:$8 sps:$4 sm:$0xff]  }
 0x411   : > { %3871 = vmatprep.subr.bf16.mxu1 %v8791_v26  ;;  %v8878_v26 = vld [vmem:[%s12143_s5 + $0x234] ss:$8 sps:$4 sm:$0xff]   ;;  %4970 = vmatpush1.bf16.msra.mxu0 %v8873_v22 }
 0x414   : > { %3872 = vmatpush1.bf16.msra.mxu1 %v8789_v34  ;;  %v8881_v34 = vld [vmem:[%s12143_s5 + $0x2b4] ss:$8 sps:$4 sm:$0xff]  }
 0x415   : > { %3873 = vmatprep.subr.bf16.mxu1 %v8794_v51  ;;  %v8876_v51 = vld [vmem:[%s12143_s5 + $0x230] ss:$8 sps:$4 sm:$0xff]   ;;  %4971 = vmatprep.subr.bf16.mxu0 %v8881_v34 }
 0x417   : > { %7310 = vmatmul.mubr.msk.bf16.gmra.mrb[36].mxu1 %vm9906_vm7, %v10386_v13 }
 0x418   : > { %3874 = vmatpush1.bf16.msra.mxu1 %v8792_v45  ;;  %3447 = vmatprep.mubr.bf16.mxu1 %v9356_v20  ;;  %v8879_v45 = vld [vmem:[%s12143_s5 + $0x2b0] ss:$8 sps:$4 sm:$0xff]  }
 0x419   : > { %3875 = vmatprep.subr.bf16.mxu1 %v8797_v46  ;;  %v8884_v46 = vld [vmem:[%s12143_s5 + $0x244] ss:$8 sps:$4 sm:$0xff]   ;;  %4972 = vmatpush1.bf16.msra.mxu0 %v8879_v45 }
 0x41c   : > { %3876 = vmatpush1.bf16.msra.mxu1 %v8795_v47  ;;  %v8887_v47 = vld [vmem:[%s12143_s5 + $0x2c4] ss:$8 sps:$4 sm:$0xff]  }
 0x41d   : > { %3877 = vmatprep.subr.bf16.mxu1 %v8800_v40  ;;  %v8882_v40 = vld [vmem:[%s12143_s5 + $0x240] ss:$8 sps:$4 sm:$0xff]   ;;  %4973 = vmatprep.subr.bf16.mxu0 %v8887_v47 }
 0x41f   : > { %7313 = vmatmul.mubr.msk.bf16.gmra.mrb[40].mxu1 %vm9906_vm7, %v10377_v4 }
 0x420   : > { %3878 = vmatpush1.bf16.msra.mxu1 %v8798_v49  ;;  %3457 = vmatprep.mubr.bf16.mxu1 %v9356_v20  ;;  %v8885_v49 = vld [vmem:[%s12143_s5 + $0x2c0] ss:$8 sps:$4 sm:$0xff]  }
 0x421   : > { %3879 = vmatprep.subr.bf16.mxu1 %v8803_v48  ;;  %v8890_v48 = vld [vmem:[%s12143_s5 + $0x254] ss:$8 sps:$4 sm:$0xff]   ;;  %4974 = vmatpush1.bf16.msra.mxu0 %v8885_v49 }
 0x424   : > { %3880 = vmatpush1.bf16.msra.mxu1 %v8801_v0  ;;  %v8893_v0 = vld [vmem:[%s12143_s5 + $0x2d4] ss:$8 sps:$4 sm:$0xff]  }
 0x425   : > { %3881 = vmatprep.subr.bf16.mxu1 %v8806_v56  ;;  %v8888_v56 = vld [vmem:[%s12143_s5 + $0x250] ss:$8 sps:$4 sm:$0xff]   ;;  %4975 = vmatprep.subr.bf16.mxu0 %v8893_v0 }
 0x427   : > { %7316 = vmatmul.mubr.msk.bf16.gmra.mrb[44].mxu1 %vm9906_vm7, %v10418_v30 }
 0x428   : > { %3882 = vmatpush1.bf16.msra.mxu1 %v8804_v57  ;;  %3885 = vmatprep.mubr.bf16.mxu1 %v10306_v25  ;;  %v8813_v25 = vld [vmem:[%s12142_s4 + $0x410] ss:$8 sps:$4 sm:$0xff]  }
 0x429   : > { %3883 = vmatprep.subr.bf16.mxu1 %v8809_v58  ;;  %v8891_v57 = vld [vmem:[%s12143_s5 + $0x2d0] ss:$8 sps:$4 sm:$0xff]   ;;  %v8896_v58 = vld [vmem:[%s12143_s5 + $0x264] ss:$8 sps:$4 sm:$0xff]  }
 0x42a   : > { %4976 = vmatpush1.bf16.msra.mxu0 %v8891_v57 }
 0x42c   : > { %3884 = vmatpush1.bf16.msra.mxu1 %v8807_v23  ;;  %v8899_v23 = vld [vmem:[%s12143_s5 + $0x2e4] ss:$8 sps:$4 sm:$0xff]  }
 0x42d   : > { %3966 = vmatprep.subr.bf16.mxu1 %v8812_v54  ;;  %v8894_v54 = vld [vmem:[%s12143_s5 + $0x260] ss:$8 sps:$4 sm:$0xff]   ;;  %4977 = vmatprep.subr.bf16.mxu0 %v8899_v23 }
 0x42f   : > { %7416 = vmatmul.mubr.msk.bf16.vlgmr.msra.gmra.mrb[16].mxu1 %vm10107_vm8, %v10320_v14  ;;  %v8821_v14 = vld [vmem:[%s12142_s4 + $0x434] ss:$8 sps:$4 sm:$0xff]  }
 0x430   : > { %3895 = vmatprep.mubr.bf16.mxu1 %v10341_v19  ;;  %3967 = vmatpush1.bf16.msra.mxu1 %v8810_v60  ;;  %v8819_v19 = vld [vmem:[%s12142_s4 + $0x430] ss:$8 sps:$4 sm:$0xff]   ;;  %v8897_v60 = vld [vmem:[%s12143_s5 + $0x2e0] ss:$8 sps:$4 sm:$0xff]  }
 0x431   : > { %3968 = vmatprep.subr.bf16.mxu1 %v8815_v62  ;;  %v8902_v62 = vld [vmem:[%s12143_s5 + $0x274] ss:$8 sps:$4 sm:$0xff]   ;;  %4978 = vmatpush1.bf16.msra.mxu0 %v8897_v60 }
 0x434   : > { %3969 = vmatpush1.bf16.msra.mxu1 %v8813_v25  ;;  %v8905_v25 = vld [vmem:[%s12143_s5 + $0x2f4] ss:$8 sps:$4 sm:$0xff]  }
 0x435   : > { %3970 = vmatprep.subr.bf16.mxu1 %v8818_v53  ;;  %v4175_v53 = vld [vmem:[%s12145_s7] sm:$0x3]  ;;  %4979 = vmatprep.subr.bf16.mxu0 %v8905_v25 }
 0x437   : > { %7420 = vmatmul.mubr.msk.bf16.gmra.mrb[20].mxu1 %vm10107_vm8, %v10356_v33  ;;  %v8825_v33 = vld [vmem:[%s12142_s4 + $0x450] ss:$8 sps:$4 sm:$0xff]  }
 0x438   : > { %3905 = vmatprep.mubr.bf16.mxu1 %v10336_v10  ;;  %3971 = vmatpush1.bf16.msra.mxu1 %v8816_v61  ;;  %v8827_v10 = vld [vmem:[%s12142_s4 + $0x454] ss:$8 sps:$4 sm:$0xff]   ;;  %v8900_v61 = vld [vmem:[%s12143_s5 + $0x270] ss:$8 sps:$4 sm:$0xff]  }
 0x439   : > { %3972 = vmatprep.subr.bf16.mxu1 %v8821_v14  ;;  %v8903_v14 = vld [vmem:[%s12143_s5 + $0x2f0] ss:$8 sps:$4 sm:$0xff]  }
 0x43a   : > { %4980 = vmatpush1.bf16.msra.mxu0 %v8903_v14 }
 0x43c   : > { %3973 = vmatpush1.bf16.msra.mxu1 %v8819_v19  ;;  %v11035_v19 = vrot.slane %v4175_v53, %v10145_v63 }
 0x43d   : > { %3974 = vmatprep.subr.bf16.mxu1 %v8824_v1 }
 0x43f   : > { %7424 = vmatmul.mubr.msk.bf16.gmra.mrb[24].mxu1 %vm10107_vm8, %v10352_v35  ;;  %v8833_v35 = vld [vmem:[%s12142_s4 + $0x474] ss:$8 sps:$4 sm:$0xff]  }
 0x440   : > { %3915 = vmatprep.mubr.bf16.mxu1 %v10373_v9  ;;  %3975 = vmatpush1.bf16.msra.mxu1 %v8822_v5  ;;  %v8831_v9 = vld [vmem:[%s12142_s4 + $0x470] ss:$8 sps:$4 sm:$0xff]  }
 0x441   : > { %3976 = vmatprep.subr.bf16.mxu1 %v8827_v10  ;;  %v8908_v10 = vld [vmem:[%s12143_s5 + $0x4] ss:$8 sps:$4 sm:$0xff]  }
 0x442   : > { %5430 = vmatprep.subr.bf16.mxu0 %v8908_v10 }
 0x444   : > { %3977 = vmatpush1.bf16.msra.mxu1 %v8825_v33 }
 0x445   : > { %3978 = vmatprep.subr.bf16.mxu1 %v8830_v27 }
 0x447   : > { %7428 = vmatmul.mubr.msk.bf16.gmra.mrb[28].mxu1 %vm10107_vm8, %v10388_v17  ;;  %v8843_v17 = vld [vmem:[%s12143_s5 + $0x1b0] ss:$8 sps:$4 sm:$0xff]  }
 0x448   : > { %3925 = vmatprep.mubr.bf16.mxu1 %v10368_v55  ;;  %3979 = vmatpush1.bf16.msra.mxu1 %v8828_v32  ;;  %v8837_v55 = vld [vmem:[%s12143_s5 + $0x190] ss:$8 sps:$4 sm:$0xff]  }
 0x449   : > { %3980 = vmatprep.subr.bf16.mxu1 %v8833_v35 }
 0x44c   : > { %3981 = vmatpush1.bf16.msra.mxu1 %v8831_v9 }
 0x44f   : > { %7432 = vmatmul.mubr.msk.bf16.gmra.mrb[32].mxu1 %vm10107_vm8, %v10384_v2  ;;  %v8840_v2 = vld [vmem:[%s12143_s5 + $0x1a0] ss:$8 sps:$4 sm:$0xff]  }
 0x450   : > { %3935 = vmatprep.mubr.bf16.mxu1 %v10405_v21  ;;  %v8846_v21 = vld [vmem:[%s12143_s5 + $0x1c0] ss:$8 sps:$4 sm:$0xff]  }
 0x457   : > { %7436 = vmatmul.mubr.msk.bf16.gmra.mrb[36].mxu1 %vm10107_vm8, %v10420_v38  ;;  %v8852_v38 = vld [vmem:[%s12143_s5 + $0x1e0] ss:$8 sps:$4 sm:$0xff]  }
 0x458   : > { %3945 = vmatprep.mubr.bf16.mxu1 %v10400_v8  ;;  %v8848_v8 = vld [vmem:[%s12143_s5 + $0x1c4] ss:$8 sps:$4 sm:$0xff]  }
 0x45f   : > { %7440 = vmatmul.mubr.msk.bf16.gmra.mrb[40].mxu1 %vm10107_vm8, %v10416_v44  ;;  %v8849_v44 = vld [vmem:[%s12143_s5 + $0x1d0] ss:$8 sps:$4 sm:$0xff]  }
 0x460   : > { %3955 = vmatprep.mubr.bf16.mxu1 %v9359_v37 }
 0x467   : > { %3956 = vmatmul.mubr.bf16.gmra.mrb[44].mxu1 %v9359_v37 }
 0x468   : > { %3998 = vmatprep.mubr.bf16.mxu1 %v9356_v20 }
 0x46f   : > { %7443 = vmatmul.mubr.msk.bf16.vlgmr.msra.gmra.mrb[16].mxu1 %vm9906_vm7, %v10312_v3  ;;  %v8836_v3 = vld [vmem:[%s12143_s5 + $0x184] ss:$8 sps:$4 sm:$0xff]  }
 0x470   : > { %4008 = vmatprep.mubr.bf16.mxu1 %v9356_v20  ;;  %4852 = vmatprep.subr.bf16.mxu1 %v8836_v3 }
 0x477   : > { %7446 = vmatmul.mubr.msk.bf16.gmra.mrb[20].mxu1 %vm9906_vm7, %v10354_v36  ;;  %v8839_v36 = vld [vmem:[%s12143_s5 + $0x194] ss:$8 sps:$4 sm:$0xff]  }
 0x478   : > { %4018 = vmatprep.mubr.bf16.mxu1 %v9356_v20 }
 0x47f   : > { %7449 = vmatmul.mubr.msk.bf16.gmra.mrb[24].mxu1 %vm9906_vm7, %v10345_v24  ;;  %v8834_v24 = vld [vmem:[%s12143_s5 + $0x180] ss:$8 sps:$4 sm:$0xff]  }
 0x480   : > { %4028 = vmatprep.mubr.bf16.mxu1 %v9356_v20  ;;  %4853 = vmatpush1.bf16.msra.mxu1 %v8834_v24 }
 0x481   : > { %4854 = vmatprep.subr.bf16.mxu1 %v8839_v36 }
 0x484   : > { %4855 = vmatpush1.bf16.msra.mxu1 %v8837_v55 }
 0x487   : > { %7452 = vmatmul.mubr.msk.bf16.gmra.mrb[28].mxu1 %vm9906_vm7, %v10386_v13  ;;  %v8845_v13 = vld [vmem:[%s12143_s5 + $0x1b4] ss:$8 sps:$4 sm:$0xff]  }
 0x488   : > { %4038 = vmatprep.mubr.bf16.mxu1 %v9356_v20 }
 0x48f   : > { %7455 = vmatmul.mubr.msk.bf16.gmra.mrb[32].mxu1 %vm9906_vm7, %v10377_v4  ;;  %v8842_v4 = vld [vmem:[%s12143_s5 + $0x1a4] ss:$8 sps:$4 sm:$0xff]  }
 0x490   : > { %4048 = vmatprep.mubr.bf16.mxu1 %v9356_v20  ;;  %4856 = vmatprep.subr.bf16.mxu1 %v8842_v4 }
 0x491   : > { %4857 = vmatpush1.bf16.msra.mxu1 %v8840_v2 }
 0x492   : > { %4858 = vmatprep.subr.bf16.mxu1 %v8845_v13  ;;  %v11044_v13 = vrot.slane %v4175_v53, %v10151_v6 }
 0x495   : > { %4859 = vmatpush1.bf16.msra.mxu1 %v8843_v17 }
 0x496   : > { %4860 = vmatprep.subr.bf16.mxu1 %v8848_v8 }
 0x497   : > { %7458 = vmatmul.mubr.msk.bf16.gmra.mrb[36].mxu1 %vm9906_vm7, %v10418_v30  ;;  %v8854_v30 = vld [vmem:[%s12143_s5 + $0x1e4] ss:$8 sps:$4 sm:$0xff]  }
 0x498   : > { %4058 = vmatprep.mubr.bf16.mxu1 %v9356_v20 }
 0x499   : > { %4861 = vmatpush1.bf16.msra.mxu1 %v8846_v21 }
 0x49f   : > { %7461 = vmatmul.mubr.msk.bf16.gmra.mrb[40].mxu1 %vm9906_vm7, %v10409_v31  ;;  %v8851_v31 = vld [vmem:[%s12143_s5 + $0x1d4] ss:$8 sps:$4 sm:$0xff]  }
 0x4a0   : > { %4068 = vmatprep.mubr.bf16.mxu1 %v9356_v20  ;;  %4862 = vmatprep.subr.bf16.mxu1 %v8851_v31 }
 0x4a1   : > { %4863 = vmatpush1.bf16.msra.mxu1 %v8849_v44 }
 0x4a2   : > { %4864 = vmatprep.subr.bf16.mxu1 %v8854_v30 }
 0x4a5   : > { %4865 = vmatpush1.bf16.msra.mxu1 %v8852_v38 }
 0x4a6   : > { %4866 = vmatprep.subr.bf16.mxu1 %v8857_v29 }
 0x4a7   : > { %4069 = vmatmul.mubr.bf16.gmra.mrb[44].mxu1 %v9359_v37 }
 0x4a9   : > { %4867 = vmatpush1.bf16.msra.mxu1 %v8855_v39 }
 0x4aa   : > { %4868 = vmatprep.subr.bf16.mxu1 %v8860_v7 }
 0x4ad   : > { %4869 = vmatpush1.bf16.msra.mxu1 %v8858_v43 }
 0x4ae   : > { %4870 = vmatprep.subr.bf16.mxu1 %v8866_v18 }
 0x4b1   : > { %4871 = vmatpush1.bf16.msra.mxu1 %v8864_v28 }
 0x4b2   : > { %4872 = vmatprep.subr.bf16.mxu1 %v8872_v12 }
 0x4b5   : > { %4873 = vmatpush1.bf16.msra.mxu1 %v8870_v16 }
 0x4b6   : > { %4874 = vmatprep.subr.bf16.mxu1 %v8878_v26 }
 0x4b9   : > { %4875 = vmatpush1.bf16.msra.mxu1 %v8876_v51 }
 0x4ba   : > { %4876 = vmatprep.subr.bf16.mxu1 %v8884_v46 }
 0x4bd   : > { %4877 = vmatpush1.bf16.msra.mxu1 %v8882_v40 }
 0x4be   : > { %4878 = vmatprep.subr.bf16.mxu1 %v8890_v48 }
 0x4c1   : > { %4879 = vmatpush1.bf16.msra.mxu1 %v8888_v56 }
 0x4c2   : > { %4880 = vmatprep.subr.bf16.mxu1 %v8896_v58 }
 0x4c5   : > { %4881 = vmatpush1.bf16.msra.mxu1 %v8894_v54 }
 0x4c6   : > { %4882 = vmatprep.subr.bf16.mxu1 %v8902_v62 }
 0x4c9   : > { %4883 = vmatpush1.bf16.msra.mxu1 %v8900_v61 }
 0x542   : > { %v4000_v1 = vpop.f32.mrb[16].mxu1 }
 0x543   : > { %v4002_v5 = vpop.f32.mrb[17].mxu1  ;;  %v4187_v44 = vadd.f32 %v11044_v13, %v4000_v1 }
 0x544   : > { %v4188_v33 = vadd.f32 %v11035_v19, %v4002_v5  ;;  %v4004_v27 = vpop.f32.mrb[18].mxu1 }
 0x545   : > { %v4006_v32 = vpop.f32.mrb[19].mxu1  ;;  %v4189_v43 = vadd.f32 %v11044_v13, %v4004_v27 }
 0x546   : > { %v7462_v35 = vmul.f32 -1.442695, %v4188_v33  ;;  %v4190_v9 = vadd.f32 %v11035_v19, %v4006_v32  ;;  %v8935_v32 = vld [vmem:[%s12143_s5 + $0x404] ss:$8 sps:$4 sm:$0xff]  }
 0x547   : > { %7933 = vmatprep.subr.bf16.mxu1 %v8935_v32 }
 0x548   : > { %9098 = vpow2.f32 %v7462_v35  ;;  %v7463_v3 = vmul.f32 -1.442695, %v4190_v9 }
 0x54a   : > { %9100 = vpow2.f32 %v7463_v3  ;;  %v4010_v24 = vpop.f32.mrb[20].mxu1 }
 0x54b   : > { %v4012_v36 = vpop.f32.mrb[21].mxu1  ;;  %v4191_v15 = vadd.f32 %v11044_v13, %v4010_v24 }
 0x54c   : > { %v4192_v55 = vadd.f32 %v11035_v19, %v4012_v36  ;;  %v4014_v4 = vpop.f32.mrb[22].mxu1 }
 0x54d   : > { %v4016_v2 = vpop.f32.mrb[23].mxu1  ;;  %v4193_v46 = vadd.f32 %v11044_v13, %v4014_v4 }
 0x54e   : > { %v7464_v17 = vmul.f32 -1.442695, %v4192_v55  ;;  %v4194_v8 = vadd.f32 %v11035_v19, %v4016_v2 }
 0x550   : > { %9102 = vpow2.f32 %v7464_v17  ;;  %v7465_v21 = vmul.f32 -1.442695, %v4194_v8 }
 0x552   : > { %v9099_v31 = vpop.eup %9098  ;;  %9104 = vpow2.f32 %v7465_v21  ;;  %v4020_v30 = vpop.f32.mrb[24].mxu1 }
 0x553   : > { %v4283_v38 = vadd.f32 1.0, %v9099_v31  ;;  %v4022_v29 = vpop.f32.mrb[25].mxu1  ;;  %v4195_v60 = vadd.f32 %v11044_v13, %v4020_v30 }
 0x554   : > { %v9101_v39 = vpop.eup %9100  ;;  %v4196_v7 = vadd.f32 %v11035_v19, %v4022_v29  ;;  %v4024_v42 = vpop.f32.mrb[26].mxu1 }
 0x555   : > { %9106 = vrcp.f32 %v4283_v38  ;;  %v4284_v41 = vadd.f32 1.0, %v9101_v39  ;;  %v4026_v18 = vpop.f32.mrb[27].mxu1  ;;  %v4197_v35 = vadd.f32 %v11044_v13, %v4024_v42 }
 0x556   : > { %9108 = vtanh.f32 %v4187_v44  ;;  %v7466_v52 = vmul.f32 -1.442695, %v4196_v7  ;;  %v4198_v28 = vadd.f32 %v11035_v19, %v4026_v18 }
 0x557   : > { %9110 = vrcp.f32 %v4284_v41 }
 0x558   : > { %9112 = vpow2.f32 %v7466_v52  ;;  %v7467_v11 = vmul.f32 -1.442695, %v4198_v28 }
 0x559   : > { %9114 = vtanh.f32 %v4189_v43 }
 0x55a   : > { %v9103_v12 = vpop.eup %9102  ;;  %9116 = vpow2.f32 %v7467_v11  ;;  %v4030_v16 = vpop.f32.mrb[28].mxu1 }
 0x55b   : > { %v4285_v22 = vadd.f32 1.0, %v9103_v12  ;;  %v4032_v26 = vpop.f32.mrb[29].mxu1  ;;  %v4199_v44 = vadd.f32 %v11044_v13, %v4030_v16 }
 0x55c   : > { %v9105_v34 = vpop.eup %9104  ;;  %v4200_v51 = vadd.f32 %v11035_v19, %v4032_v26  ;;  %v4034_v45 = vpop.f32.mrb[30].mxu1 }
 0x55d   : > { %9118 = vrcp.f32 %v4285_v22  ;;  %v4286_v47 = vadd.f32 1.0, %v9105_v34  ;;  %v4036_v40 = vpop.f32.mrb[31].mxu1  ;;  %v4201_v52 = vadd.f32 %v11044_v13, %v4034_v45 }
 0x55e   : > { %9120 = vtanh.f32 %v4191_v15  ;;  %v7468_v49 = vmul.f32 -1.442695, %v4200_v51  ;;  %v4202_v48 = vadd.f32 %v11035_v19, %v4036_v40 }
 0x55f   : > { %v11055_v0 = vpop.eup %9106  ;;  %9122 = vrcp.f32 %v4286_v47 }
 0x560   : > { %v9109_v56 = vpop.eup %9108  ;;  %9124 = vpow2.f32 %v7468_v49  ;;  %v7469_v57 = vmul.f32 -1.442695, %v4202_v48  ;;  %v4389_v58 = vsub.f32 1.0, %v11055_v0 }
 0x561   : > { %v11058_v23 = vpop.eup %9110  ;;  %9126 = vtanh.f32 %v4193_v46 }
 0x562   : > { %v9113_v54 = vpop.eup %9112  ;;  %9128 = vpow2.f32 %v7469_v57  ;;  %v4040_v62 = vpop.f32.mrb[32].mxu1  ;;  %v4390_v25 = vsub.f32 1.0, %v11058_v23  ;;  %v11062_v53 = vmul.f32 %v9109_v56, %v4389_v58 }
 0x563   : > { %v9115_v61 = vpop.eup %9114  ;;  %v4287_v14 = vadd.f32 1.0, %v9113_v54  ;;  %v4042_v1 = vpop.f32.mrb[33].mxu1  ;;  %v4203_v40 = vadd.f32 %v11044_v13, %v4040_v62 }
 0x564   : > { %v9117_v5 = vpop.eup %9116  ;;  %v4204_v10 = vadd.f32 %v11035_v19, %v4042_v1  ;;  %v4044_v33 = vpop.f32.mrb[34].mxu1  ;;  %v11065_v27 = vmul.f32 %v9115_v61, %v4390_v25 }
 0x565   : > { %9130 = vrcp.f32 %v4287_v14  ;;  %v4288_v9 = vadd.f32 1.0, %v9117_v5  ;;  %v4046_v3 = vpop.f32.mrb[35].mxu1  ;;  %v4205_v61 = vadd.f32 %v11044_v13, %v4044_v33 }
 0x566   : > { %9132 = vtanh.f32 %v4195_v60  ;;  %v7470_v24 = vmul.f32 -1.442695, %v4204_v10  ;;  %v4206_v36 = vadd.f32 %v11035_v19, %v4046_v3 }
 0x567   : > { %v11072_v55 = vpop.eup %9118  ;;  %9134 = vrcp.f32 %v4288_v9 }
 0x568   : > { %v9121_v4 = vpop.eup %9120  ;;  %v4381_v2 = vsub.f32 1.0, %v11072_v55  ;;  %9136 = vpow2.f32 %v7470_v24  ;;  %v7471_v17 = vmul.f32 -1.442695, %v4206_v36 }
 0x569   : > { %v11075_v8 = vpop.eup %9122  ;;  %9138 = vtanh.f32 %v4197_v35 }
 0x56a   : > { %v9125_v21 = vpop.eup %9124  ;;  %v4382_v31 = vsub.f32 1.0, %v11075_v8  ;;  %9140 = vpow2.f32 %v7471_v17  ;;  %v4050_v30 = vpop.f32.mrb[36].mxu1  ;;  %v11079_v38 = vmul.f32 %v9121_v4, %v4381_v2 }
 0x56b   : > { %v9127_v29 = vpop.eup %9126  ;;  %v4289_v39 = vadd.f32 1.0, %v9125_v21  ;;  %v4052_v7 = vpop.f32.mrb[37].mxu1  ;;  %v4207_v4 = vadd.f32 %v11044_v13, %v4050_v30 }
 0x56c   : > { %v9129_v42 = vpop.eup %9128  ;;  %v4208_v43 = vadd.f32 %v11035_v19, %v4052_v7  ;;  %v4054_v41 = vpop.f32.mrb[38].mxu1  ;;  %v11082_v18 = vmul.f32 %v9127_v29, %v4382_v31 }
 0x56d   : > { %9142 = vrcp.f32 %v4289_v39  ;;  %v4290_v28 = vadd.f32 1.0, %v9129_v42  ;;  %v4056_v11 = vpop.f32.mrb[39].mxu1  ;;  %v4209_v42 = vadd.f32 %v11044_v13, %v4054_v41 }
 0x56e   : > { %9144 = vtanh.f32 %v4199_v44  ;;  %v7472_v12 = vmul.f32 -1.442695, %v4208_v43  ;;  %v4210_v15 = vadd.f32 %v11035_v19, %v4056_v11 }
 0x56f   : > { %v11086_v16 = vpop.eup %9130  ;;  %9146 = vrcp.f32 %v4290_v28 }
 0x570   : > { %v9133_v22 = vpop.eup %9132  ;;  %v4373_v26 = vsub.f32 1.0, %v11086_v16  ;;  %9148 = vpow2.f32 %v7472_v12  ;;  %v7473_v34 = vmul.f32 -1.442695, %v4210_v15 }
 0x571   : > { %v11089_v51 = vpop.eup %9134  ;;  %9150 = vtanh.f32 %v4201_v52 }
 0x572   : > { %v9137_v46 = vpop.eup %9136  ;;  %v11091_v47 = vmul.f32 %v9133_v22, %v4373_v26  ;;  %v4374_v45 = vsub.f32 1.0, %v11089_v51  ;;  %9152 = vpow2.f32 %v7473_v34  ;;  %v4060_v49 = vpop.f32.mrb[40].mxu1 }
 0x573   : > { %v9139_v48 = vpop.eup %9138  ;;  %v4291_v56 = vadd.f32 1.0, %v9137_v46  ;;  %v4062_v57 = vpop.f32.mrb[41].mxu1 }
 0x574   : > { %v9141_v58 = vpop.eup %9140  ;;  %v11095_v54 = vmul.f32 %v9139_v48, %v4374_v45  ;;  %v4212_v60 = vadd.f32 %v11035_v19, %v4062_v57  ;;  %v4064_v25 = vpop.f32.mrb[42].mxu1  ;;  %v4211_v45 = vadd.f32 %v11044_v13, %v4060_v49 }
 0x575   : > { %9154 = vrcp.f32 %v4291_v56  ;;  %v4292_v14 = vadd.f32 1.0, %v9141_v58  ;;  %v4066_v1 = vpop.f32.mrb[43].mxu1  ;;  %v4213_v57 = vadd.f32 %v11044_v13, %v4064_v25 }
 0x576   : > { %9156 = vtanh.f32 %v4203_v40  ;;  %v7474_v5 = vmul.f32 -1.442695, %v4212_v60  ;;  %v4214_v62 = vadd.f32 %v11035_v19, %v4066_v1 }
 0x577   : > { %v11100_v10 = vpop.eup %9142  ;;  %9158 = vrcp.f32 %v4292_v14 }
 0x578   : > { %v9145_v32 = vpop.eup %9144  ;;  %v4365_v35 = vsub.f32 1.0, %v11100_v10  ;;  %9160 = vpow2.f32 %v7474_v5  ;;  %v7475_v9 = vmul.f32 -1.442695, %v4214_v62 }
 0x579   : > { %v11103_v3 = vpop.eup %9146  ;;  %9162 = vtanh.f32 %v4205_v61 }
 0x57a   : > { %v9149_v24 = vpop.eup %9148  ;;  %v11105_v36 = vmul.f32 %v9145_v32, %v4365_v35  ;;  %v4366_v33 = vsub.f32 1.0, %v11103_v3  ;;  %9164 = vpow2.f32 %v7475_v9  ;;  %v4070_v2 = vpop.f32.mrb[44].mxu1 }
 0x57b   : > { %v9151_v17 = vpop.eup %9150  ;;  %v4293_v21 = vadd.f32 1.0, %v9149_v24  ;;  %v4072_v31 = vpop.f32.mrb[45].mxu1  ;;  %v4215_v32 = vadd.f32 %v11044_v13, %v4070_v2 }
 0x57c   : > { %v9153_v44 = vpop.eup %9152  ;;  %v11109_v29 = vmul.f32 %v9151_v17, %v4366_v33  ;;  %v4216_v39 = vadd.f32 %v11035_v19, %v4072_v31  ;;  %v4074_v7 = vpop.f32.mrb[46].mxu1 }
 0x57d   : > { %9166 = vrcp.f32 %v4293_v21  ;;  %v4294_v43 = vadd.f32 1.0, %v9153_v44  ;;  %v4076_v52 = vpop.f32.mrb[47].mxu1  ;;  %v4217_v25 = vadd.f32 %v11044_v13, %v4074_v7 }
 0x57e   : > { %9168 = vtanh.f32 %v4207_v4  ;;  %v7476_v28 = vmul.f32 -1.442695, %v4216_v39  ;;  %v4218_v30 = vadd.f32 %v11035_v19, %v4076_v52 }
 0x57f   : > { %v11114_v11 = vpop.eup %9154  ;;  %9170 = vrcp.f32 %v4294_v43 }
 0x580   : > { %v9157_v12 = vpop.eup %9156  ;;  %v4357_v15 = vsub.f32 1.0, %v11114_v11  ;;  %9172 = vpow2.f32 %v7476_v28  ;;  %v7477_v22 = vmul.f32 -1.442695, %v4218_v30 }
 0x581   : > { %v11117_v26 = vpop.eup %9158  ;;  %9174 = vtanh.f32 %v4209_v42 }
 0x582   : > { %v9161_v34 = vpop.eup %9160  ;;  %v11119_v46 = vmul.f32 %v9157_v12, %v4357_v15  ;;  %v4358_v41 = vsub.f32 1.0, %v11117_v26  ;;  %9176 = vpow2.f32 %v7477_v22 }
 0x583   : > { %v9163_v19 = vpop.eup %9162  ;;  %v4295_v40 = vadd.f32 1.0, %v9161_v34  ;;  %v4409_v34 = vld [vmem:[%s11132_s0 + $0x70] sm:$0xff] }
 0x584   : > { %v9165_v48 = vpop.eup %9164  ;;  %v11123_v56 = vmul.f32 %v9163_v19, %v4358_v41 }
 0x585   : > { %9178 = vrcp.f32 %v4295_v40  ;;  %v4296_v58 = vadd.f32 1.0, %v9165_v48  ;;  %v4410_v40 = vld [vmem:[%s11132_s0 + $0x78] sm:$0xff] }
 0x586   : > { %9180 = vtanh.f32 %v4211_v45 }
 0x587   : > { %v9167_v60 = vpop.eup %9166  ;;  %9182 = vrcp.f32 %v4296_v58 }
 0x588   : > { %v9169_v61 = vpop.eup %9168  ;;  %v4349_v14 = vsub.f32 1.0, %v9167_v60  ;;  %9184 = vtanh.f32 %v4213_v57 }
 0x589   : > { %v9171_v1 = vpop.eup %9170 }
 0x58a   : > { %v9173_v5 = vpop.eup %9172  ;;  %v4351_v62 = vmul.f32 %v9169_v61, %v4349_v14  ;;  %v4350_v49 = vsub.f32 1.0, %v9171_v1  ;;  %v4407_v61 = vld [vmem:[%s11132_s0 + $0x60] sm:$0xff] }
 0x58b   : > { %v9175_v35 = vpop.eup %9174  ;;  %v4297_v9 = vadd.f32 1.0, %v9173_v5 }
 0x58c   : > { %v9177_v24 = vpop.eup %9176  ;;  %v4352_v33 = vmul.f32 %v9175_v35, %v4350_v49 }
 0x58d   : > { %9186 = vrcp.f32 %v4297_v9  ;;  %v4298_v4 = vadd.f32 1.0, %v9177_v24 }
 0x58e   : > { %9188 = vtanh.f32 %v4215_v32  ;;  %v4408_v32 = vld [vmem:[%s11132_s0 + $0x68] sm:$0xff] }
 0x58f   : > { %v9179_v17 = vpop.eup %9178  ;;  %9190 = vrcp.f32 %v4298_v4  ;;  %v4405_v4 = vld [vmem:[%s11132_s0 + $0x50] sm:$0xff] }
 0x590   : > { %v9181_v21 = vpop.eup %9180  ;;  %v4341_v31 = vsub.f32 1.0, %v9179_v17  ;;  %9192 = vtanh.f32 %v4217_v25 }
 0x591   : > { %v9183_v44 = vpop.eup %9182 }
 0x592   : > { %v4343_v39 = vmul.f32 %v9181_v21, %v4341_v31  ;;  %v4342_v42 = vsub.f32 1.0, %v9183_v44  ;;  %v9185_v43 = vpop.eup %9184 }
 0x594   : > { %v4344_v2 = vmul.f32 %v9185_v43, %v4342_v42 }
 0x597   : > { %v9187_v52 = vpop.eup %9186 }
 0x598   : > { %v9189_v28 = vpop.eup %9188  ;;  %v4333_v13 = vsub.f32 1.0, %v9187_v52  ;;  %v4331_v30 = vmul.f32 0.0, %v9187_v52 }
 0x599   : > { %v9191_v7 = vpop.eup %9190 }
 0x59a   : > { %v4335_v12 = vmul.f32 %v9189_v28, %v4333_v13  ;;  %v4334_v15 = vsub.f32 1.0, %v9191_v7  ;;  %v9193_v22 = vpop.eup %9192  ;;  %v4332_v45 = vmul.f32 0.0, %v9191_v7  ;;  %v4406_v13 = vld [vmem:[%s11132_s0 + $0x58] sm:$0xff] }
 0x59c   : > { %v4337_v41 = vadd.f32 %v4335_v12, %v4331_v30  ;;  %v4336_v19 = vmul.f32 %v9193_v22, %v4334_v15  ;;  %v4403_v22 = vld [vmem:[%s11132_s0 + $0x40] sm:$0xff] }
 0x59e   : > { %v4339_v48 = vmul.f32 %v9179_v17, %v4337_v41  ;;  %v4338_v57 = vadd.f32 %v4336_v19, %v4332_v45  ;;  %v4425_v58 = vadd.f32 %v4409_v34, %v4337_v41 }
 0x5a0   : > { %v4345_v14 = vadd.f32 %v4343_v39, %v4339_v48  ;;  %v4340_v5 = vmul.f32 %v9183_v44, %v4338_v57  ;;  %v4426_v49 = vadd.f32 %v4410_v40, %v4338_v57  ;;  %v4464_v21 = vrot.slane %v4425_v58, 7  ;;  %v4404_v48 = vld [vmem:[%s11132_s0 + $0x48] sm:$0xff] }
 0x5a1   : > { %v4512_v42 = vrot.slane %v4425_v58, 1 }
 0x5a2   : > { %v4347_v35 = vmul.f32 %v9167_v60, %v4345_v14  ;;  %v4346_v9 = vadd.f32 %v4344_v2, %v4340_v5  ;;  %v4423_v24 = vadd.f32 %v4407_v61, %v4345_v14  ;;  %v11138_v25 = vpack.c.bf16 %v4426_v49, %v4425_v58 }
 0x5a3   : > { %v4465_v31 = vrot.slane %v4426_v49, 7  ;;  %v4513_v43 = vrot.slane %v4426_v49, 1 }
 0x5a4   : > { %v4353_v17 = vadd.f32 %v4351_v62, %v4347_v35  ;;  %v4348_v52 = vmul.f32 %v9171_v1, %v4346_v9  ;;  %v4424_v28 = vadd.f32 %v4408_v32, %v4346_v9  ;;  %v4461_v39 = vrot.slane %v4423_v24, 7  ;;  %v4401_v32 = vld [vmem:[%s11132_s0 + $0x30] sm:$0xff] }
 0x5a5   : > { %v4509_v44 = vrot.slane %v4423_v24, 1  ;;  %v4466_v7 = vsel %vm431_vm0, %v4464_v21, %v4465_v31  ;;  %v4514_v60 = vsel %vm456_vm3, %v4512_v42, %v4513_v43  ;;  %v4402_v31 = vld [vmem:[%s11132_s0 + $0x38] sm:$0xff] }
 0x5a6   : > { %v4355_v2 = vmul.f32 %v11114_v11, %v4353_v17  ;;  %v4354_v30 = vadd.f32 %v4352_v33, %v4348_v52  ;;  %v4421_v12 = vadd.f32 %v4405_v4, %v4353_v17  ;;  %v11145_v15 = vpack.c.bf16 %v4424_v28, %v4423_v24 }
 0x5a7   : > { %v4462_v34 = vrot.slane %v4424_v28, 7  ;;  %v4510_v62 = vrot.slane %v4424_v28, 1  ;;  %v11148_v1 = vpack.c.bf16 %v4466_v7, %v4464_v21  ;;  %v11150_v41 = vpack.c.bf16 %v4513_v43, %v4514_v60 }
 0x5a8   : > { %v4356_v45 = vmul.f32 %v11117_v26, %v4354_v30  ;;  %v4361_v19 = vadd.f32 %v11119_v46, %v4355_v2  ;;  %v4422_v40 = vadd.f32 %v4406_v13, %v4354_v30  ;;  %v4458_v57 = vrot.slane %v4421_v12, 7 }
 0x5a9   : > { %v4506_v11 = vrot.slane %v4421_v12, 1  ;;  %v4463_v33 = vsel %vm431_vm0, %v4461_v39, %v4462_v34  ;;  %v4511_v58 = vsel %vm456_vm3, %v4509_v44, %v4510_v62 }
 0x5aa   : > { %v4362_v61 = vadd.f32 %v11123_v56, %v4356_v45  ;;  %v4363_v14 = vmul.f32 %v11100_v10, %v4361_v19  ;;  %v4419_v5 = vadd.f32 %v4403_v22, %v4361_v19  ;;  %v11159_v49 = vpack.c.bf16 %v4422_v40, %v4421_v12  ;;  %v4400_v12 = vld [vmem:[%s11132_s0 + $0x28] sm:$0xff] }
 0x5ab   : > { %v4459_v26 = vrot.slane %v4422_v40, 7  ;;  %v4507_v46 = vrot.slane %v4422_v40, 1  ;;  %v11162_v35 = vpack.c.bf16 %v4463_v33, %v4461_v39  ;;  %v11164_v9 = vpack.c.bf16 %v4510_v62, %v4511_v58  ;;  %v4399_v39 = vld [vmem:[%s11132_s0 + $0x20] sm:$0xff] }
 0x5ac   : > { %v4364_v24 = vmul.f32 %v11103_v3, %v4362_v61  ;;  %v4369_v4 = vadd.f32 %v11105_v36, %v4363_v14  ;;  %v4420_v21 = vadd.f32 %v4404_v48, %v4362_v61  ;;  %v4455_v56 = vrot.slane %v4419_v5, 7  ;;  %v4397_v48 = vld [vmem:[%s11132_s0 + $0x10] sm:$0xff]  ;;  %v4398_v14 = vld [vmem:[%s11132_s0 + $0x18] sm:$0xff] }
 0x5ad   : > { %v4503_v10 = vrot.slane %v4419_v5, 1  ;;  %v4460_v42 = vsel %vm431_vm0, %v4458_v57, %v4459_v26  ;;  %v4508_v43 = vsel %vm456_vm3, %v4506_v11, %v4507_v46 }
 0x5ae   : > { %v4370_v17 = vadd.f32 %v11109_v29, %v4364_v24  ;;  %v4371_v52 = vmul.f32 %v11086_v16, %v4369_v4  ;;  %v4417_v28 = vadd.f32 %v4401_v32, %v4369_v4  ;;  %v11173_v13 = vpack.c.bf16 %v4420_v21, %v4419_v5 }
 0x5af   : > { %v4456_v3 = vrot.slane %v4420_v21, 7  ;;  %v4504_v36 = vrot.slane %v4420_v21, 1  ;;  %v11176_v44 = vpack.c.bf16 %v4460_v42, %v4458_v57  ;;  %v11178_v7 = vpack.c.bf16 %v4507_v46, %v4508_v43  ;;  %v4395_v21 = vld [vmem:[%s11132_s0] sm:$0xff] }
 0x5b0   : > { %v4372_v60 = vmul.f32 %v11089_v51, %v4370_v17  ;;  %v4377_v2 = vadd.f32 %v11091_v47, %v4371_v52  ;;  %v4418_v30 = vadd.f32 %v4402_v31, %v4370_v17  ;;  %v4452_v29 = vrot.slane %v4417_v28, 7  ;;  %v4396_v17 = vld [vmem:[%s11132_s0 + $0x8] sm:$0xff]  ;;  %s9298_s0 = scalar_lea.vmem %s9297_s18, 4096 }
 0x5b1   : > { %v4500_v16 = vrot.slane %v4417_v28, 1  ;;  %v4457_v22 = vsel %vm431_vm0, %v4455_v56, %v4456_v3  ;;  %v4505_v34 = vsel %vm456_vm3, %v4503_v10, %v4504_v36  ;;  %p9300_p1 = scmp.lt.s32.totalorder %s9298_s0, %s9292_s12 }
 0x5b2   : > { %v4378_v62 = vadd.f32 %v11095_v54, %v4372_v60  ;;  %v4379_v45 = vmul.f32 %v11072_v55, %v4377_v2  ;;  %v4415_v19 = vadd.f32 %v4399_v39, %v4377_v2  ;;  %v11187_v40 = vpack.c.bf16 %v4418_v30, %v4417_v28 }
 0x5b3   : > { %v4453_v51 = vrot.slane %v4418_v30, 7  ;;  %v4501_v47 = vrot.slane %v4418_v30, 1  ;;  %v11190_v57 = vpack.c.bf16 %v4457_v22, %v4455_v56  ;;  %v11192_v11 = vpack.c.bf16 %v4504_v36, %v4505_v34  ;;  %p9301_p2 = por %p9300_p1, %p9299_p0 }
 0x5b4   : > { %v4380_v33 = vmul.f32 %v11075_v8, %v4378_v62  ;;  %v4385_v58 = vadd.f32 %v11079_v38, %v4379_v45  ;;  %v4416_v61 = vadd.f32 %v4400_v12, %v4378_v62  ;;  %v4449_v54 = vrot.slane %v4415_v19, 7 }
 0x5b5   : > { %v4497_v55 = vrot.slane %v4415_v19, 1  ;;  %v4454_v5 = vsel %vm431_vm0, %v4452_v29, %v4453_v51  ;;  %v4502_v32 = vsel %vm456_vm3, %v4500_v16, %v4501_v47  ;;  %p9302_p3 = pnand %p9301_p2, %p9295_p13 }
 0x5b6   : > { %v4386_v26 = vadd.f32 %v11082_v18, %v4380_v33  ;;  %v4387_v46 = vmul.f32 %v11055_v0, %v4385_v58  ;;  %v4413_v24 = vadd.f32 %v4397_v48, %v4385_v58  ;;  %v11201_v4 = vpack.c.bf16 %v4416_v61, %v4415_v19 }
 0x5b7   : > { %v4450_v8 = vrot.slane %v4416_v61, 7  ;;  %v4498_v31 = vrot.slane %v4416_v61, 1  ;;  %v11204_v38 = vpack.c.bf16 %v4454_v5, %v4452_v29  ;;  %v11206_v56 = vpack.c.bf16 %v4501_v47, %v4502_v32  ;;  %v8906_v47 = vld [vmem:[%s12143_s5] ss:$8 sps:$4 sm:$0xff]   ;;  %v8911_v61 = vld [vmem:[%s12143_s5 + $0x14] ss:$8 sps:$4 sm:$0xff]  }
 0x5b8   : > { %v4388_v10 = vmul.f32 %v11058_v23, %v4386_v26  ;;  %v4393_v42 = vadd.f32 %v11062_v53, %v4387_v46  ;;  %v4414_v43 = vadd.f32 %v4398_v14, %v4386_v26  ;;  %v4446_v52 = vrot.slane %v4413_v24, 7  ;;  %v11244_v14 = vld [vmem:[%s12143_s5 + $0x400] ss:$8 sps:$4 sm:$0xff]   ;;  %v8914_v5 = vld [vmem:[%s12143_s5 + $0x24] ss:$8 sps:$4 sm:$0xff]  }
 0x5b9   : > { %v4451_v18 = vsel %vm431_vm0, %v4449_v54, %v4450_v8  ;;  %v4499_v0 = vsel %vm456_vm3, %v4497_v55, %v4498_v31  ;;  %v4494_v60 = vrot.slane %v4413_v24, 1  ;;  %v8909_v55 = vld [vmem:[%s12143_s5 + $0x10] ss:$8 sps:$4 sm:$0xff]   ;;  %v8912_v26 = vld [vmem:[%s12143_s5 + $0x20] ss:$8 sps:$4 sm:$0xff]  }
 0x5ba   : > { %v4394_v28 = vadd.f32 %v11065_v27, %v4388_v10  ;;  %v4411_v39 = vadd.f32 %v4395_v21, %v4393_v42  ;;  %v11214_v3 = vpack.c.bf16 %v4414_v43, %v4413_v24  ;;  %v4447_v36 = vrot.slane %v4414_v43, 7  ;;  %v11269_v32 = vld [vmem:[%s12143_s5 + $0x410] ss:$8 sps:$4 sm:$0xff]   ;;  %v8917_v46 = vld [vmem:[%s12143_s5 + $0x34] ss:$8 sps:$4 sm:$0xff]  }
 0x5bb   : > { %v4495_v2 = vrot.slane %v4414_v43, 1  ;;  %v11216_v30 = vpack.c.bf16 %v4451_v18, %v4449_v54  ;;  %v11218_v23 = vpack.c.bf16 %v4498_v31, %v4499_v0  ;;  %v11255_v54 = vld [vmem:[%s12143_s5 + $0x414] ss:$8 sps:$4 sm:$0xff]   ;;  %v11282_v24 = vld [vmem:[%s12143_s5 + $0x424] ss:$8 sps:$4 sm:$0xff]  }
 0x5bc   : > { %v4412_v53 = vadd.f32 %v4396_v17, %v4394_v28  ;;  %v4448_v12 = vsel %vm431_vm0, %v4446_v52, %v4447_v36  ;;  %v4443_v29 = vrot.slane %v4411_v39, 7  ;;  %v4491_v16 = vrot.slane %v4411_v39, 1  ;;  %v11293_v21 = vld [vmem:[%s12143_s5 + $0x420] ss:$8 sps:$4 sm:$0xff]   ;;  %v8915_v8 = vld [vmem:[%s12143_s5 + $0x30] ss:$8 sps:$4 sm:$0xff]  }
 0x5bd   : > { %v11221_v22 = vpack.c.bf16 %v4448_v12, %v4446_v52  ;;  %v4496_v34 = vsel %vm456_vm3, %v4494_v60, %v4495_v2  ;;  %v11302_v31 = vld [vmem:[%s12143_s5 + $0x434] ss:$8 sps:$4 sm:$0xff]   ;;  %v8920_v10 = vld [vmem:[%s12143_s5 + $0x44] ss:$8 sps:$4 sm:$0xff]   ;;  %v8918_v42 = vld [vmem:[%s12143_s5 + $0x40] ss:$8 sps:$4 sm:$0xff]  }
 0x5be   : > { %v4444_v27 = vrot.slane %v4412_v53, 7  ;;  %v4492_v62 = vrot.slane %v4412_v53, 1  ;;  %v11224_v45 = vpack.c.bf16 %v4412_v53, %v4411_v39  ;;  %v11226_v19 = vpack.c.bf16 %v4495_v2, %v4496_v34  ;;  %v8923_v43 = vld [vmem:[%s12143_s5 + $0x54] ss:$8 sps:$4 sm:$0xff]   ;;  %v11320_v17 = vld [vmem:[%s12143_s5 + $0x430] ss:$8 sps:$4 sm:$0xff]  }
 0x5bf   : > { %v11331_v52 = vld [vmem:[%s12143_s5 + $0x444] ss:$8 sps:$4 sm:$0xff]   ;;  %v8921_v18 = vld [vmem:[%s12143_s5 + $0x50] ss:$8 sps:$4 sm:$0xff]   ;;  %v11345_v28 = vld [vmem:[%s12143_s5 + $0x440] ss:$8 sps:$4 sm:$0xff]  }
 0x5c0   : > { %v4445_v48 = vsel %vm431_vm0, %v4443_v29, %v4444_v27  ;;  %v4493_v51 = vsel %vm456_vm3, %v4491_v16, %v4492_v62  ;;  %4884 = vmatprep.mubr.bf16.mxu1 %v11224_v45  ;;  %v8926_v0 = vld [vmem:[%s12143_s5 + $0x64] ss:$8 sps:$4 sm:$0xff]   ;;  %v8924_v39 = vld [vmem:[%s12143_s5 + $0x60] ss:$8 sps:$4 sm:$0xff]   ;;  %v8929_v36 = vld [vmem:[%s12143_s5 + $0x74] ss:$8 sps:$4 sm:$0xff]  }
 0x5c1   : > { %v11234_v33 = vpack.c.bf16 %v4445_v48, %v4443_v29  ;;  %v11236_v58 = vpack.c.bf16 %v4492_v62, %v4493_v51  ;;  %v11358_v60 = vld [vmem:[%s12143_s5 + $0x454] ss:$8 sps:$4 sm:$0xff]   ;;  %v11369_v2 = vld [vmem:[%s12143_s5 + $0x450] ss:$8 sps:$4 sm:$0xff]   ;;  %v11378_v12 = vld [vmem:[%s12143_s5 + $0x464] ss:$8 sps:$4 sm:$0xff]  }
 0x5c2   : > { %v8927_v53 = vld [vmem:[%s12143_s5 + $0x70] ss:$8 sps:$4 sm:$0xff]   ;;  %v8932_v29 = vld [vmem:[%s12143_s5 + $0x84] ss:$8 sps:$4 sm:$0xff]   ;;  %v8930_v16 = vld [vmem:[%s12143_s5 + $0x80] ss:$8 sps:$4 sm:$0xff]  }
 0x5c3   : > { %7577 = vmatmul.mubr.msk.bf16.vlgmr.msra.gmra.mrb[48].mxu1 %vm10107_vm8, %v11234_v33  ;;  %7608 = vmatmul.mubr.msk.bf16.vlgmr.msra.gmra.mrb[16].mxu0 %vm9906_vm7, %v11236_v58  ;;  %v8938_v34 = vld [vmem:[%s12143_s5 + $0x94] ss:$8 sps:$4 sm:$0xff]   ;;  %v11396_v27 = vld [vmem:[%s12143_s5 + $0x460] ss:$8 sps:$4 sm:$0xff]   ;;  %v8936_v48 = vld [vmem:[%s12143_s5 + $0x90] ss:$8 sps:$4 sm:$0xff]  }
 0x5c4   : > { %4894 = vmatprep.mubr.bf16.mxu1 %v11214_v3  ;;  %5431 = vmatpush1.bf16.msra.mxu0 %v8906_v47  ;;  %v11407_v62 = vld [vmem:[%s12143_s5 + $0x474] ss:$8 sps:$4 sm:$0xff]   ;;  %v8944_v51 = vld [vmem:[%s12143_s5 + $0xa4] ss:$8 sps:$4 sm:$0xff]   ;;  %v11421_v47 = vld [vmem:[%s12143_s5 + $0x470] ss:$8 sps:$4 sm:$0xff]  }
 0x5c5   : > { %5432 = vmatprep.subr.bf16.mxu0 %v8911_v61  ;;  %5007 = vmatprep.mubr.bf16.mxu0 %v9356_v20  ;;  %v8942_v61 = vld [vmem:[%s12143_s5 + $0xa0] ss:$8 sps:$4 sm:$0xff]  }
 0x5c6   : > { %7941 = vmatpush1.bf16.msra.mxu1 %v11244_v14 }
 0x5c7   : > { %7934 = vmatprep.subr.bf16.mxu1 %v11255_v54 }
 0x5c8   : > { %5433 = vmatpush1.bf16.msra.mxu0 %v8909_v55  ;;  %v8950_v55 = vld [vmem:[%s12143_s5 + $0xb4] ss:$8 sps:$4 sm:$0xff]  }
 0x5c9   : > { %5434 = vmatprep.subr.bf16.mxu0 %v8914_v5  ;;  %v8948_v5 = vld [vmem:[%s12143_s5 + $0xb0] ss:$8 sps:$4 sm:$0xff]  }
 0x5ca   : > { %7942 = vmatpush1.bf16.msra.mxu1 %v11269_v32 }
 0x5cb   : > { %7581 = vmatmul.mubr.msk.bf16.gmra.mrb[52].mxu1 %vm10107_vm8, %v11221_v22  ;;  %7611 = vmatmul.mubr.msk.bf16.gmra.mrb[20].mxu0 %vm9906_vm7, %v11226_v19 }
 0x5cc   : > { %4904 = vmatprep.mubr.bf16.mxu1 %v11201_v4  ;;  %5435 = vmatpush1.bf16.msra.mxu0 %v8912_v26  ;;  %v8956_v26 = vld [vmem:[%s12143_s5 + $0xc4] ss:$8 sps:$4 sm:$0xff]  }
 0x5cd   : > { %5436 = vmatprep.subr.bf16.mxu0 %v8917_v46  ;;  %5017 = vmatprep.mubr.bf16.mxu0 %v9356_v20  ;;  %v8954_v46 = vld [vmem:[%s12143_s5 + $0xc0] ss:$8 sps:$4 sm:$0xff]  }
 0x5ce   : > { %7935 = vmatprep.subr.bf16.mxu1 %v11282_v24 }
 0x5cf   : > { %7943 = vmatpush1.bf16.msra.mxu1 %v11293_v21 }
 0x5d0   : > { %5437 = vmatpush1.bf16.msra.mxu0 %v8915_v8  ;;  %7936 = vmatprep.subr.bf16.mxu1 %v11302_v31  ;;  %v8962_v8 = vld [vmem:[%s12143_s5 + $0xd4] ss:$8 sps:$4 sm:$0xff]  }
 0x5d1   : > { %5438 = vmatprep.subr.bf16.mxu0 %v8920_v10  ;;  %v8960_v10 = vld [vmem:[%s12143_s5 + $0xd0] ss:$8 sps:$4 sm:$0xff]  }
 0x5d3   : > { %7585 = vmatmul.mubr.msk.bf16.gmra.mrb[56].mxu1 %vm10107_vm8, %v11216_v30  ;;  %7614 = vmatmul.mubr.msk.bf16.gmra.mrb[24].mxu0 %vm9906_vm7, %v11218_v23 }
 0x5d4   : > { %4914 = vmatprep.mubr.bf16.mxu1 %v11187_v40  ;;  %5439 = vmatpush1.bf16.msra.mxu0 %v8918_v42  ;;  %v8968_v42 = vld [vmem:[%s12143_s5 + $0xe4] ss:$8 sps:$4 sm:$0xff]  }
 0x5d5   : > { %5440 = vmatprep.subr.bf16.mxu0 %v8923_v43  ;;  %5027 = vmatprep.mubr.bf16.mxu0 %v9356_v20  ;;  %v8966_v43 = vld [vmem:[%s12143_s5 + $0xe0] ss:$8 sps:$4 sm:$0xff]  }
 0x5d6   : > { %7944 = vmatpush1.bf16.msra.mxu1 %v11320_v17 }
 0x5d7   : > { %7937 = vmatprep.subr.bf16.mxu1 %v11331_v52 }
 0x5d8   : > { %5441 = vmatpush1.bf16.msra.mxu0 %v8921_v18  ;;  %v8974_v18 = vld [vmem:[%s12143_s5 + $0xf4] ss:$8 sps:$4 sm:$0xff]  }
 0x5d9   : > { %5442 = vmatprep.subr.bf16.mxu0 %v8926_v0  ;;  %v8972_v0 = vld [vmem:[%s12143_s5 + $0xf0] ss:$8 sps:$4 sm:$0xff]  }
 0x5da   : > { %7945 = vmatpush1.bf16.msra.mxu1 %v11345_v28 }
 0x5db   : > { %7589 = vmatmul.mubr.msk.bf16.gmra.mrb[60].mxu1 %vm10107_vm8, %v11204_v38  ;;  %7617 = vmatmul.mubr.msk.bf16.gmra.mrb[28].mxu0 %vm9906_vm7, %v11206_v56 }
 0x5dc   : > { %4924 = vmatprep.mubr.bf16.mxu1 %v11173_v13  ;;  %5443 = vmatpush1.bf16.msra.mxu0 %v8924_v39  ;;  %v8980_v39 = vld [vmem:[%s12143_s5 + $0x104] ss:$8 sps:$4 sm:$0xff]  }
 0x5dd   : > { %5444 = vmatprep.subr.bf16.mxu0 %v8929_v36  ;;  %5037 = vmatprep.mubr.bf16.mxu0 %v9356_v20  ;;  %v8978_v36 = vld [vmem:[%s12143_s5 + $0x100] ss:$8 sps:$4 sm:$0xff]  }
 0x5de   : > { %7938 = vmatprep.subr.bf16.mxu1 %v11358_v60 }
 0x5df   : > { %7946 = vmatpush1.bf16.msra.mxu1 %v11369_v2 }
 0x5e0   : > { %5445 = vmatpush1.bf16.msra.mxu0 %v8927_v53  ;;  %7939 = vmatprep.subr.bf16.mxu1 %v11378_v12  ;;  %v8983_v53 = vld [vmem:[%s12143_s5 + $0x114] ss:$8 sps:$4 sm:$0xff]  }
 0x5e1   : > { %5446 = vmatprep.subr.bf16.mxu0 %v8932_v29  ;;  %v8981_v29 = vld [vmem:[%s12143_s5 + $0x110] ss:$8 sps:$4 sm:$0xff]  }
 0x5e3   : > { %7593 = vmatmul.mubr.msk.bf16.gmra.mrb[64].mxu1 %vm10107_vm8, %v11190_v57  ;;  %7620 = vmatmul.mubr.msk.bf16.gmra.mrb[32].mxu0 %vm9906_vm7, %v11192_v11 }
 0x5e4   : > { %4934 = vmatprep.mubr.bf16.mxu1 %v11159_v49  ;;  %5447 = vmatpush1.bf16.msra.mxu0 %v8930_v16  ;;  %v8986_v16 = vld [vmem:[%s12143_s5 + $0x124] ss:$8 sps:$4 sm:$0xff]  }
 0x5e5   : > { %5448 = vmatprep.subr.bf16.mxu0 %v8938_v34  ;;  %5047 = vmatprep.mubr.bf16.mxu0 %v9356_v20  ;;  %v8984_v34 = vld [vmem:[%s12143_s5 + $0x120] ss:$8 sps:$4 sm:$0xff]  }
 0x5e6   : > { %7947 = vmatpush1.bf16.msra.mxu1 %v11396_v27 }
 0x5e7   : > { %7940 = vmatprep.subr.bf16.mxu1 %v11407_v62 }
 0x5e8   : > { %5449 = vmatpush1.bf16.msra.mxu0 %v8936_v48  ;;  %v8987_v48 = vld [vmem:[%s12143_s5 + $0x130] ss:$8 sps:$4 sm:$0xff]  }
 0x5e9   : > { %5450 = vmatprep.subr.bf16.mxu0 %v8944_v51  ;;  %v8992_v51 = vld [vmem:[%s12143_s5 + $0x144] ss:$8 sps:$4 sm:$0xff]  }
 0x5ea   : > { %7948 = vmatpush1.bf16.msra.mxu1 %v11421_v47 }
 0x5eb   : > { %7597 = vmatmul.mubr.msk.bf16.gmra.mrb[68].mxu1 %vm10107_vm8, %v11176_v44  ;;  %7623 = vmatmul.mubr.msk.bf16.gmra.mrb[36].mxu0 %vm9906_vm7, %v11178_v7 }
 0x5ec   : > { %4944 = vmatprep.mubr.bf16.mxu1 %v11145_v15  ;;  %5451 = vmatpush1.bf16.msra.mxu0 %v8942_v61  ;;  %v8995_v61 = vld [vmem:[%s12143_s5 + $0x154] ss:$8 sps:$4 sm:$0xff]  }
 0x5ed   : > { %5452 = vmatprep.subr.bf16.mxu0 %v8950_v55  ;;  %5057 = vmatprep.mubr.bf16.mxu0 %v9356_v20  ;;  %v8993_v55 = vld [vmem:[%s12143_s5 + $0x150] ss:$8 sps:$4 sm:$0xff]  }
 0x5f0   : > { %5453 = vmatpush1.bf16.msra.mxu0 %v8948_v5  ;;  %v8998_v5 = vld [vmem:[%s12143_s5 + $0x164] ss:$8 sps:$4 sm:$0xff]  }
 0x5f1   : > { %5454 = vmatprep.subr.bf16.mxu0 %v8956_v26  ;;  %v8996_v26 = vld [vmem:[%s12143_s5 + $0x160] ss:$8 sps:$4 sm:$0xff]  }
 0x5f3   : > { %7601 = vmatmul.mubr.msk.bf16.gmra.mrb[72].mxu1 %vm10107_vm8, %v11162_v35  ;;  %7626 = vmatmul.mubr.msk.bf16.gmra.mrb[40].mxu0 %vm9906_vm7, %v11164_v9 }
 0x5f4   : > { %4954 = vmatprep.mubr.bf16.mxu1 %v11138_v25  ;;  %5455 = vmatpush1.bf16.msra.mxu0 %v8954_v46  ;;  %v9001_v46 = vld [vmem:[%s12143_s5 + $0x174] ss:$8 sps:$4 sm:$0xff]  }
 0x5f5   : > { %5456 = vmatprep.subr.bf16.mxu0 %v8962_v8  ;;  %5067 = vmatprep.mubr.bf16.mxu0 %v9356_v20  ;;  %v8999_v8 = vld [vmem:[%s12143_s5 + $0x170] ss:$8 sps:$4 sm:$0xff]  }
 0x5f8   : > { %5457 = vmatpush1.bf16.msra.mxu0 %v8960_v10  ;;  %v9004_v10 = vld [vmem:[%s12143_s5 + $0x304] ss:$8 sps:$4 sm:$0xff]  }
 0x5f9   : > { %5458 = vmatprep.subr.bf16.mxu0 %v8968_v42  ;;  %v9007_v42 = vld [vmem:[%s12143_s5 + $0x314] ss:$8 sps:$4 sm:$0xff]  }
 0x5fb   : > { %7605 = vmatmul.mubr.msk.bf16.gmra.mrb[76].mxu1 %vm10107_vm8, %v11148_v1  ;;  %7629 = vmatmul.mubr.msk.bf16.gmra.mrb[44].mxu0 %vm9906_vm7, %v11150_v41 }
 0x5fc   : > { %5459 = vmatpush1.bf16.msra.mxu0 %v8966_v43  ;;  %5462 = vmatprep.mubr.bf16.mxu0 %v9359_v37  ;;  %v9005_v43 = vld [vmem:[%s12143_s5 + $0x310] ss:$8 sps:$4 sm:$0xff]  }
 0x5fd   : > { %5460 = vmatprep.subr.bf16.mxu0 %v8974_v18  ;;  %6196 = vmatprep.mubr.bf16.mxu1 %v9356_v20  ;;  %v9010_v18 = vld [vmem:[%s12143_s5 + $0x324] ss:$8 sps:$4 sm:$0xff]  }
 0x600   : > { %5461 = vmatpush1.bf16.msra.mxu0 %v8972_v0  ;;  %v9008_v0 = vld [vmem:[%s12143_s5 + $0x320] ss:$8 sps:$4 sm:$0xff]  }
 0x601   : > { %5543 = vmatprep.subr.bf16.mxu0 %v8980_v39  ;;  %v9013_v39 = vld [vmem:[%s12143_s5 + $0x334] ss:$8 sps:$4 sm:$0xff]  }
 0x603   : > { %5463 = vmatmul.mubr.bf16.vlgmr.msra.gmra.mrb[16].mxu0 %v9359_v37  ;;  %7856 = vmatmul.mubr.msk.bf16.vlgmr.msra.gmra.mrb[80].mxu1 %vm9906_vm7, %v11218_v23 }
 0x604   : > { %5472 = vmatprep.mubr.bf16.mxu0 %v11224_v45  ;;  %5544 = vmatpush1.bf16.msra.mxu0 %v8978_v36  ;;  %v8989_v45 = vld [vmem:[%s12143_s5 + $0x134] ss:$8 sps:$4 sm:$0xff]   ;;  %v9011_v36 = vld [vmem:[%s12143_s5 + $0x330] ss:$8 sps:$4 sm:$0xff]  }
 0x605   : > { %6206 = vmatprep.mubr.bf16.mxu1 %v9356_v20  ;;  %5545 = vmatprep.subr.bf16.mxu0 %v8983_v53  ;;  %v9016_v53 = vld [vmem:[%s12143_s5 + $0x344] ss:$8 sps:$4 sm:$0xff]  }
 0x608   : > { %5546 = vmatpush1.bf16.msra.mxu0 %v8981_v29  ;;  %v9014_v29 = vld [vmem:[%s12143_s5 + $0x340] ss:$8 sps:$4 sm:$0xff]  }
 0x609   : > { %5547 = vmatprep.subr.bf16.mxu0 %v8986_v16  ;;  %v9017_v16 = vld [vmem:[%s12143_s5 + $0x350] ss:$8 sps:$4 sm:$0xff]  }
 0x60b   : > { %7681 = vmatmul.mubr.msk.bf16.gmra.mrb[20].mxu0 %vm10107_vm8, %v11234_v33  ;;  %7859 = vmatmul.mubr.msk.bf16.gmra.mrb[84].mxu1 %vm9906_vm7, %v11206_v56  ;;  %v8990_v33 = vld [vmem:[%s12143_s5 + $0x140] ss:$8 sps:$4 sm:$0xff]  }
 0x60c   : > { %5482 = vmatprep.mubr.bf16.mxu0 %v11214_v3  ;;  %6216 = vmatprep.mubr.bf16.mxu1 %v9356_v20 }
 0x60d   : > { %5548 = vmatpush1.bf16.msra.mxu0 %v8984_v34  ;;  %v9022_v34 = vld [vmem:[%s12143_s5 + $0x364] ss:$8 sps:$4 sm:$0xff]  }
 0x60e   : > { %5549 = vmatprep.subr.bf16.mxu0 %v8989_v45  ;;  %v9020_v45 = vld [vmem:[%s12143_s5 + $0x360] ss:$8 sps:$4 sm:$0xff]  }
 0x611   : > { %5550 = vmatpush1.bf16.msra.mxu0 %v8987_v48  ;;  %v9025_v48 = vld [vmem:[%s12143_s5 + $0x374] ss:$8 sps:$4 sm:$0xff]  }
 0x612   : > { %5551 = vmatprep.subr.bf16.mxu0 %v8992_v51  ;;  %v9023_v51 = vld [vmem:[%s12143_s5 + $0x370] ss:$8 sps:$4 sm:$0xff]  }
 0x613   : > { %7685 = vmatmul.mubr.msk.bf16.gmra.mrb[24].mxu0 %vm10107_vm8, %v11221_v22  ;;  %7862 = vmatmul.mubr.msk.bf16.gmra.mrb[88].mxu1 %vm9906_vm7, %v11192_v11 }
 0x614   : > { %5492 = vmatprep.mubr.bf16.mxu0 %v11201_v4  ;;  %6226 = vmatprep.mubr.bf16.mxu1 %v9356_v20 }
 0x615   : > { %5552 = vmatpush1.bf16.msra.mxu0 %v8990_v33  ;;  %v9028_v33 = vld [vmem:[%s12143_s5 + $0x384] ss:$8 sps:$4 sm:$0xff]  }
 0x616   : > { %5553 = vmatprep.subr.bf16.mxu0 %v8995_v61  ;;  %v9026_v61 = vld [vmem:[%s12143_s5 + $0x380] ss:$8 sps:$4 sm:$0xff]  }
 0x619   : > { %5554 = vmatpush1.bf16.msra.mxu0 %v8993_v55  ;;  %v9029_v55 = vld [vmem:[%s12143_s5 + $0x390] ss:$8 sps:$4 sm:$0xff]  }
 0x61a   : > { %5555 = vmatprep.subr.bf16.mxu0 %v8998_v5  ;;  %v9034_v5 = vld [vmem:[%s12143_s5 + $0x3a4] ss:$8 sps:$4 sm:$0xff]  }
 0x61b   : > { %7689 = vmatmul.mubr.msk.bf16.gmra.mrb[28].mxu0 %vm10107_vm8, %v11216_v30  ;;  %7865 = vmatmul.mubr.msk.bf16.gmra.mrb[92].mxu1 %vm9906_vm7, %v11178_v7 }
 0x61c   : > { %5502 = vmatprep.mubr.bf16.mxu0 %v11187_v40  ;;  %6236 = vmatprep.mubr.bf16.mxu1 %v9356_v20 }
 0x61d   : > { %5556 = vmatpush1.bf16.msra.mxu0 %v8996_v26  ;;  %v9032_v26 = vld [vmem:[%s12143_s5 + $0x3a0] ss:$8 sps:$4 sm:$0xff]  }
 0x61e   : > { %5557 = vmatprep.subr.bf16.mxu0 %v9001_v46  ;;  %v9035_v46 = vld [vmem:[%s12143_s5 + $0x3b0] ss:$8 sps:$4 sm:$0xff]  }
 0x621   : > { %5558 = vmatpush1.bf16.msra.mxu0 %v8999_v8  ;;  %v9040_v8 = vld [vmem:[%s12143_s5 + $0x3c4] ss:$8 sps:$4 sm:$0xff]  }
 0x622   : > { %6041 = vmatprep.subr.bf16.mxu0 %v9004_v10  ;;  %v9038_v10 = vld [vmem:[%s12143_s5 + $0x3c0] ss:$8 sps:$4 sm:$0xff]  }
 0x623   : > { %7693 = vmatmul.mubr.msk.bf16.gmra.mrb[32].mxu0 %vm10107_vm8, %v11204_v38  ;;  %7868 = vmatmul.mubr.msk.bf16.gmra.mrb[96].mxu1 %vm9906_vm7, %v11164_v9 }
 0x624   : > { %5512 = vmatprep.mubr.bf16.mxu0 %v11173_v13  ;;  %6246 = vmatprep.mubr.bf16.mxu1 %v9356_v20 }
 0x62b   : > { %7697 = vmatmul.mubr.msk.bf16.gmra.mrb[36].mxu0 %vm10107_vm8, %v11190_v57  ;;  %7871 = vmatmul.mubr.msk.bf16.gmra.mrb[100].mxu1 %vm9906_vm7, %v11150_v41  ;;  %v9002_v41 = vld [vmem:[%s12143_s5 + $0x300] ss:$8 sps:$4 sm:$0xff]  }
 0x62c   : > { %5522 = vmatprep.mubr.bf16.mxu0 %v11159_v49  ;;  %6256 = vmatprep.mubr.bf16.mxu1 %v9356_v20 }
 0x633   : > { %7701 = vmatmul.mubr.msk.bf16.gmra.mrb[40].mxu0 %vm10107_vm8, %v11176_v44  ;;  %6257 = vmatmul.mubr.bf16.gmra.mrb[104].mxu1 %v9359_v37 }
 0x634   : > { %5532 = vmatprep.mubr.bf16.mxu0 %v11145_v15 }
 0x63b   : > { %7705 = vmatmul.mubr.msk.bf16.gmra.mrb[44].mxu0 %vm10107_vm8, %v11162_v35 }
 0x63c   : > { %5575 = vmatprep.mubr.bf16.mxu0 %v9356_v20 }
 0x643   : > { %5576 = vmatmul.mubr.bf16.vlgmr.msra.gmra.mrb[16].mxu0 %v9359_v37 }
 0x644   : > { %6042 = vmatpush1.bf16.msra.mxu0 %v9002_v41  ;;  %5585 = vmatprep.mubr.bf16.mxu0 %v9356_v20  ;;  %v9041_v41 = vld [vmem:[%s12143_s5 + $0x3d0] ss:$8 sps:$4 sm:$0xff]  }
 0x645   : > { %6043 = vmatprep.subr.bf16.mxu0 %v9007_v42  ;;  %v9046_v42 = vld [vmem:[%s12143_s5 + $0x3e4] ss:$8 sps:$4 sm:$0xff]  }
 0x648   : > { %6044 = vmatpush1.bf16.msra.mxu0 %v9005_v43  ;;  %v9044_v43 = vld [vmem:[%s12143_s5 + $0x3e0] ss:$8 sps:$4 sm:$0xff]  }
 0x649   : > { %6045 = vmatprep.subr.bf16.mxu0 %v9010_v18  ;;  %v9047_v18 = vld [vmem:[%s12143_s5 + $0x3f0] ss:$8 sps:$4 sm:$0xff]  }
 0x64b   : > { %7708 = vmatmul.mubr.msk.bf16.gmra.mrb[20].mxu0 %vm9906_vm7, %v11236_v58  ;;  %v9019_v58 = vld [vmem:[%s12143_s5 + $0x354] ss:$8 sps:$4 sm:$0xff]  }
 0x64c   : > { %6046 = vmatpush1.bf16.msra.mxu0 %v9008_v0  ;;  %5595 = vmatprep.mubr.bf16.mxu0 %v9356_v20  ;;  %v9291_v0 = vld [vmem:[%s12143_s5 + $0x404] ss:$8 sps:$4 sm:$0xff]  }
 0x64d   : > { %6047 = vmatprep.subr.bf16.mxu0 %v9013_v39 }
 0x650   : > { %6048 = vmatpush1.bf16.msra.mxu0 %v9011_v36 }
 0x651   : > { %6049 = vmatprep.subr.bf16.mxu0 %v9016_v53 }
 0x653   : > { %7711 = vmatmul.mubr.msk.bf16.gmra.mrb[24].mxu0 %vm9906_vm7, %v11226_v19 }
 0x654   : > { %6050 = vmatpush1.bf16.msra.mxu0 %v9014_v29  ;;  %5605 = vmatprep.mubr.bf16.mxu0 %v9356_v20 }
 0x655   : > { %6051 = vmatprep.subr.bf16.mxu0 %v9019_v58 }
 0x658   : > { %6052 = vmatpush1.bf16.msra.mxu0 %v9017_v16 }
 0x659   : > { %6053 = vmatprep.subr.bf16.mxu0 %v9022_v34 }
 0x65b   : > { %7714 = vmatmul.mubr.msk.bf16.gmra.mrb[28].mxu0 %vm9906_vm7, %v11218_v23  ;;  %v9031_v23 = vld [vmem:[%s12143_s5 + $0x394] ss:$8 sps:$4 sm:$0xff]  }
 0x65c   : > { %6054 = vmatpush1.bf16.msra.mxu0 %v9020_v45  ;;  %5615 = vmatprep.mubr.bf16.mxu0 %v9356_v20 }
 0x65d   : > { %6055 = vmatprep.subr.bf16.mxu0 %v9025_v48 }
 0x660   : > { %6056 = vmatpush1.bf16.msra.mxu0 %v9023_v51 }
 0x661   : > { %6057 = vmatprep.subr.bf16.mxu0 %v9028_v33 }
 0x663   : > { %7717 = vmatmul.mubr.msk.bf16.gmra.mrb[32].mxu0 %vm9906_vm7, %v11206_v56  ;;  %v9037_v56 = vld [vmem:[%s12143_s5 + $0x3b4] ss:$8 sps:$4 sm:$0xff]  }
 0x664   : > { %6058 = vmatpush1.bf16.msra.mxu0 %v9026_v61  ;;  %5625 = vmatprep.mubr.bf16.mxu0 %v9356_v20 }
 0x665   : > { %6059 = vmatprep.subr.bf16.mxu0 %v9031_v23 }
 0x668   : > { %6060 = vmatpush1.bf16.msra.mxu0 %v9029_v55 }
 0x669   : > { %6061 = vmatprep.subr.bf16.mxu0 %v9034_v5 }
 0x66b   : > { %7720 = vmatmul.mubr.msk.bf16.gmra.mrb[36].mxu0 %vm9906_vm7, %v11192_v11  ;;  %v9043_v11 = vld [vmem:[%s12143_s5 + $0x3d4] ss:$8 sps:$4 sm:$0xff]  }
 0x66c   : > { %6062 = vmatpush1.bf16.msra.mxu0 %v9032_v26  ;;  %5635 = vmatprep.mubr.bf16.mxu0 %v9356_v20 }
 0x66d   : > { %6063 = vmatprep.subr.bf16.mxu0 %v9037_v56 }
 0x670   : > { %6064 = vmatpush1.bf16.msra.mxu0 %v9035_v46 }
 0x671   : > { %6065 = vmatprep.subr.bf16.mxu0 %v9040_v8 }
 0x673   : > { %7723 = vmatmul.mubr.msk.bf16.gmra.mrb[40].mxu0 %vm9906_vm7, %v11178_v7  ;;  %v9049_v7 = vld [vmem:[%s12143_s5 + $0x3f4] ss:$8 sps:$4 sm:$0xff]  }
 0x674   : > { %6066 = vmatpush1.bf16.msra.mxu0 %v9038_v10  ;;  %5645 = vmatprep.mubr.bf16.mxu0 %v9356_v20 }
 0x675   : > { %6067 = vmatprep.subr.bf16.mxu0 %v9043_v11 }
 0x678   : > { %6068 = vmatpush1.bf16.msra.mxu0 %v9041_v41 }
 0x679   : > { %6069 = vmatprep.subr.bf16.mxu0 %v9046_v42 }
 0x67b   : > { %7726 = vmatmul.mubr.msk.bf16.gmra.mrb[44].mxu0 %vm9906_vm7, %v11164_v9 }
 0x67c   : > { %6070 = vmatpush1.bf16.msra.mxu0 %v9044_v43  ;;  %6073 = vmatprep.mubr.bf16.mxu0 %v11214_v3 }
 0x67d   : > { %6071 = vmatprep.subr.bf16.mxu0 %v9049_v7 }
 0x680   : > { %6072 = vmatpush1.bf16.msra.mxu0 %v9047_v18  ;;  %v6363_v18 = vld [vmem:[%s12146_s8] sm:$0x3] }
 0x681   : > { %6154 = vmatprep.subr.bf16.mxu0 %v9291_v0 }
 0x683   : > { %7826 = vmatmul.mubr.msk.bf16.vlgmr.msra.gmra.mrb[16].mxu0 %vm10107_vm8, %v11221_v22 }
 0x684   : > { %6083 = vmatprep.mubr.bf16.mxu0 %v11201_v4  ;;  %6155 = vmatpush1.bf16.msra.mxu0 %v11244_v14 }
 0x685   : > { %6156 = vmatprep.subr.bf16.mxu0 %v11255_v54 }
 0x688   : > { %6157 = vmatpush1.bf16.msra.mxu0 %v11269_v32 }
 0x689   : > { %6158 = vmatprep.subr.bf16.mxu0 %v11282_v24 }
 0x68b   : > { %7830 = vmatmul.mubr.msk.bf16.gmra.mrb[20].mxu0 %vm10107_vm8, %v11216_v30 }
 0x68c   : > { %6093 = vmatprep.mubr.bf16.mxu0 %v11187_v40  ;;  %6159 = vmatpush1.bf16.msra.mxu0 %v11293_v21 }
 0x68d   : > { %6160 = vmatprep.subr.bf16.mxu0 %v11302_v31 }
 0x690   : > { %6161 = vmatpush1.bf16.msra.mxu0 %v11320_v17 }
 0x691   : > { %6162 = vmatprep.subr.bf16.mxu0 %v11331_v52 }
 0x693   : > { %7834 = vmatmul.mubr.msk.bf16.gmra.mrb[24].mxu0 %vm10107_vm8, %v11204_v38 }
 0x694   : > { %6103 = vmatprep.mubr.bf16.mxu0 %v11173_v13  ;;  %6163 = vmatpush1.bf16.msra.mxu0 %v11345_v28 }
 0x695   : > { %6164 = vmatprep.subr.bf16.mxu0 %v11358_v60 }
 0x696   : > { %v11736_v9 = vpop.f32.mrb[48].mxu1 }
 0x697   : > { %12165 = vst [vmem:[#allocation6_spill] sm:$0xff] %v11736_v9  ;;  %v11738_v40 = vpop.f32.mrb[49].mxu1  ;;  %v11872_v9 = vrot.slane %v6363_v18, %v10145_v63 }
 0x698   : > { %12166 = vst [vmem:[#allocation7_spill] sm:$0xff] %v11738_v40  ;;  %v11740_v4 = vpop.f32.mrb[50].mxu1  ;;  %6165 = vmatpush1.bf16.msra.mxu0 %v11369_v2 }
 0x699   : > { %12167 = vst [vmem:[#allocation8_spill] sm:$0xff] %v11740_v4  ;;  %v11743_v3 = vpop.f32.mrb[51].mxu1  ;;  %6166 = vmatprep.subr.bf16.mxu0 %v11378_v12 }
 0x69a   : > { %12168 = vst [vmem:[#allocation9_spill] sm:$0xff] %v11743_v3 }
 0x69b   : > { %7838 = vmatmul.mubr.msk.bf16.gmra.mrb[28].mxu0 %vm10107_vm8, %v11190_v57 }
 0x69c   : > { %6113 = vmatprep.mubr.bf16.mxu0 %v11159_v49  ;;  %6167 = vmatpush1.bf16.msra.mxu0 %v11396_v27 }
 0x69d   : > { %6168 = vmatprep.subr.bf16.mxu0 %v11407_v62 }
 0x69e   : > { %v11752_v13 = vpop.f32.mrb[52].mxu1 }
 0x69f   : > { %v11754_v38 = vpop.f32.mrb[53].mxu1 }
 0x6a0   : > { %v11756_v30 = vpop.f32.mrb[54].mxu1  ;;  %6169 = vmatpush1.bf16.msra.mxu0 %v11421_v47 }
 0x6a1   : > { %v11759_v22 = vpop.f32.mrb[55].mxu1 }
 0x6a3   : > { %7842 = vmatmul.mubr.msk.bf16.gmra.mrb[32].mxu0 %vm10107_vm8, %v11176_v44 }
 0x6a4   : > { %6123 = vmatprep.mubr.bf16.mxu0 %v11145_v15 }
 0x6a6   : > { %v11765_v49 = vpop.f32.mrb[56].mxu1 }
 0x6a7   : > { %v11767_v57 = vpop.f32.mrb[57].mxu1 }
 0x6a8   : > { %v11769_v14 = vpop.f32.mrb[58].mxu1 }
 0x6a9   : > { %v11771_v54 = vpop.f32.mrb[59].mxu1 }
 0x6ab   : > { %7846 = vmatmul.mubr.msk.bf16.gmra.mrb[36].mxu0 %vm10107_vm8, %v11162_v35 }
 0x6ac   : > { %6133 = vmatprep.mubr.bf16.mxu0 %v11138_v25 }
 0x6ae   : > { %v11777_v32 = vpop.f32.mrb[60].mxu1 }
 0x6af   : > { %v11779_v24 = vpop.f32.mrb[61].mxu1 }
 0x6b0   : > { %v11781_v44 = vpop.f32.mrb[62].mxu1 }
 0x6b1   : > { %v11783_v15 = vpop.f32.mrb[63].mxu1 }
 0x6b3   : > { %7850 = vmatmul.mubr.msk.bf16.gmra.mrb[40].mxu0 %vm10107_vm8, %v11148_v1 }
 0x6b4   : > { %6143 = vmatprep.mubr.bf16.mxu0 %v9359_v37 }
 0x6b6   : > { %v11789_v21 = vpop.f32.mrb[64].mxu1 }
 0x6b7   : > { %v11791_v31 = vpop.f32.mrb[65].mxu1 }
 0x6b8   : > { %v11793_v35 = vpop.f32.mrb[66].mxu1 }
 0x6b9   : > { %v11795_v25 = vpop.f32.mrb[67].mxu1 }
 0x6bb   : > { %6144 = vmatmul.mubr.bf16.gmra.mrb[44].mxu0 %v9359_v37 }
 0x6bc   : > { %6186 = vmatprep.mubr.bf16.mxu0 %v9356_v20 }
 0x6be   : > { %v11799_v17 = vpop.f32.mrb[68].mxu1 }
 0x6bf   : > { %v11801_v52 = vpop.f32.mrb[69].mxu1 }
 0x6c0   : > { %v11803_v50 = vpop.f32.mrb[70].mxu1 }
 0x6c1   : > { %v11805_v1 = vpop.f32.mrb[71].mxu1 }
 0x6c3   : > { %7853 = vmatmul.mubr.msk.bf16.vlgmr.msra.gmra.mrb[16].mxu0 %vm9906_vm7, %v11226_v19 }
 0x6c6   : > { %v11810_v28 = vpop.f32.mrb[72].mxu1 }
 0x6c7   : > { %v11812_v60 = vpop.f32.mrb[73].mxu1 }
 0x6c8   : > { %v11814_v2 = vpop.f32.mrb[74].mxu1 }
 0x6c9   : > { %v11816_v37 = vpop.f32.mrb[75].mxu1 }
 0x6ce   : > { %v11818_v20 = vpop.f32.mrb[76].mxu1 }
 0x6cf   : > { %12169 = vst [vmem:[#allocation10_spill] sm:$0xff] %v11818_v20  ;;  %v11820_v12 = vpop.f32.mrb[77].mxu1 }
 0x6d0   : > { %12170 = vst [vmem:[#allocation11_spill] sm:$0xff] %v11820_v12  ;;  %v11822_v27 = vpop.f32.mrb[78].mxu1 }
 0x6d1   : > { %12171 = vst [vmem:[#allocation12_spill] sm:$0xff] %v11822_v27  ;;  %v11824_v62 = vpop.f32.mrb[79].mxu1 }
 0x6d2   : > { %12172 = vst [vmem:[#allocation13_spill] sm:$0xff] %v11824_v62 }
 0x6d6   : > { %v6198_v47 = vpop.f32.mrb[80].mxu1 }
 0x6d7   : > { %v6200_v39 = vpop.f32.mrb[81].mxu1 }
 0x6d8   : > { %v6202_v59 = vpop.f32.mrb[82].mxu1 }
 0x6d9   : > { %v6204_v19 = vpop.f32.mrb[83].mxu1 }
 0x6de   : > { %v6208_v36 = vpop.f32.mrb[84].mxu1 }
 0x6df   : > { %v6210_v53 = vpop.f32.mrb[85].mxu1 }
 0x6e0   : > { %v6212_v29 = vpop.f32.mrb[86].mxu1 }
 0x6e1   : > { %v6214_v58 = vpop.f32.mrb[87].mxu1 }
 0x6e6   : > { %v11826_v16 = vpop.f32.mrb[88].mxu1 }
 0x6e7   : > { %v11828_v34 = vpop.f32.mrb[89].mxu1 }
 0x6e8   : > { %v11830_v45 = vpop.f32.mrb[90].mxu1 }
 0x6e9   : > { %v11832_v48 = vpop.f32.mrb[91].mxu1 }
 0x6ee   : > { %v11834_v51 = vpop.f32.mrb[92].mxu1 }
 0x6ef   : > { %v11836_v33 = vpop.f32.mrb[93].mxu1 }
 0x6f0   : > { %v11838_v61 = vpop.f32.mrb[94].mxu1 }
 0x6f1   : > { %v11840_v23 = vpop.f32.mrb[95].mxu1 }
 0x6f6   : > { %v11842_v55 = vpop.f32.mrb[96].mxu1 }
 0x6f7   : > { %v11844_v5 = vpop.f32.mrb[97].mxu1 }
 0x6f8   : > { %v11846_v26 = vpop.f32.mrb[98].mxu1 }
 0x6f9   : > { %v11848_v56 = vpop.f32.mrb[99].mxu1 }
 0x6fe   : > { %v11850_v46 = vpop.f32.mrb[100].mxu1 }
 0x6ff   : > { %v11852_v8 = vpop.f32.mrb[101].mxu1 }
 0x700   : > { %v11854_v10 = vpop.f32.mrb[102].mxu1 }
 0x701   : > { %12173 = vst [vmem:[#allocation14_spill] sm:$0xff] %v11854_v10  ;;  %v11856_v11 = vpop.f32.mrb[103].mxu1 }
 0x702   : > { %12174 = vst [vmem:[#allocation15_spill] sm:$0xff] %v11856_v11 }
 0x706   : > { %v11858_v41 = vpop.f32.mrb[104].mxu1 }
 0x707   : > { %12175 = vst [vmem:[#allocation16_spill] sm:$0xff] %v11858_v41  ;;  %v11860_v42 = vpop.f32.mrb[105].mxu1 }
 0x708   : > { %12176 = vst [vmem:[#allocation17_spill] sm:$0xff] %v11860_v42  ;;  %v11862_v43 = vpop.f32.mrb[106].mxu1 }
 0x709   : > { %12177 = vst [vmem:[#allocation18_spill] sm:$0xff] %v11862_v43  ;;  %v11864_v7 = vpop.f32.mrb[107].mxu1 }
 0x70a   : > { %12178 = vst [vmem:[#allocation19_spill] sm:$0xff] %v11864_v7 }
 0x75e   : > { %v6085_v0 = vpop.f32.mrb[20].mxu0 }
 0x75f   : > { %v7953_v3 = vadd.f32 %v6085_v0, %v11752_v13  ;;  %v6087_v4 = vpop.f32.mrb[21].mxu0 }
 0x760   : > { %v7955_v40 = vadd.f32 %v6087_v4, %v11754_v38  ;;  %v6089_v62 = vpop.f32.mrb[22].mxu0 }
 0x761   : > { %v7954_v41 = vadd.f32 %v7953_v3, %v6198_v47  ;;  %v7957_v42 = vadd.f32 %v6089_v62, %v11756_v30  ;;  %v6091_v43 = vpop.f32.mrb[23].mxu0 }
 0x762   : > { %v7956_v27 = vadd.f32 %v7955_v40, %v6200_v39  ;;  %v7959_v7 = vadd.f32 %v6091_v43, %v11759_v22 }
 0x763   : > { %v7958_v12 = vadd.f32 %v7957_v42, %v6202_v59 }
 0x764   : > { %v6380_v20 = vadd.f32 %v7956_v27, %v11872_v9  ;;  %v7960_v11 = vadd.f32 %v7959_v7, %v6204_v19 }
 0x766   : > { %v7874_v10 = vmul.f32 -1.442695, %v6380_v20  ;;  %v6382_v13 = vadd.f32 %v7960_v11, %v11872_v9  ;;  %v6095_v0 = vpop.f32.mrb[24].mxu0 }
 0x767   : > { %v7961_v4 = vadd.f32 %v6095_v0, %v11765_v49  ;;  %v6097_v63 = vpop.f32.mrb[25].mxu0  ;;  %v11884_v49 = vrot.slane %v6363_v18, %v10151_v6 }
 0x768   : > { %9194 = vpow2.f32 %v7874_v10  ;;  %v7875_v38 = vmul.f32 -1.442695, %v6382_v13  ;;  %v7963_v3 = vadd.f32 %v6097_v63, %v11767_v57  ;;  %v6099_v30 = vpop.f32.mrb[26].mxu0 }
 0x769   : > { %v7962_v62 = vadd.f32 %v7961_v4, %v6208_v36  ;;  %v7965_v40 = vadd.f32 %v6099_v30, %v11769_v14  ;;  %v6101_v22 = vpop.f32.mrb[27].mxu0  ;;  %v6379_v6 = vadd.f32 %v7954_v41, %v11884_v49 }
 0x76a   : > { %9196 = vpow2.f32 %v7875_v38  ;;  %v7964_v47 = vadd.f32 %v7963_v3, %v6210_v53  ;;  %v7967_v27 = vadd.f32 %v6101_v22, %v11771_v54 }
 0x76b   : > { %v7966_v20 = vadd.f32 %v7965_v40, %v6212_v29 }
 0x76c   : > { %v6384_v39 = vadd.f32 %v7964_v47, %v11872_v9  ;;  %v7968_v59 = vadd.f32 %v7967_v27, %v6214_v58  ;;  %v6383_v47 = vadd.f32 %v7962_v62, %v11884_v49 }
 0x76e   : > { %v7876_v19 = vmul.f32 -1.442695, %v6384_v39  ;;  %v6386_v10 = vadd.f32 %v7968_v59, %v11872_v9  ;;  %v6105_v57 = vpop.f32.mrb[28].mxu0 }
 0x76f   : > { %v7969_v36 = vadd.f32 %v6105_v57, %v11777_v32  ;;  %v6107_v11 = vpop.f32.mrb[29].mxu0 }
 0x770   : > { %9198 = vpow2.f32 %v7876_v19  ;;  %v7877_v14 = vmul.f32 -1.442695, %v6386_v10  ;;  %v7971_v53 = vadd.f32 %v6107_v11, %v11779_v24  ;;  %v6109_v42 = vpop.f32.mrb[30].mxu0 }
 0x771   : > { %v7970_v54 = vadd.f32 %v7969_v36, %v11826_v16  ;;  %v7973_v29 = vadd.f32 %v6109_v42, %v11781_v44  ;;  %v6111_v58 = vpop.f32.mrb[31].mxu0  ;;  %v6381_v44 = vadd.f32 %v7958_v12, %v11884_v49 }
 0x772   : > { %v9195_v43 = vpop.eup %9194  ;;  %9200 = vpow2.f32 %v7877_v14  ;;  %v7972_v7 = vadd.f32 %v7971_v53, %v11828_v34  ;;  %v7975_v18 = vadd.f32 %v6111_v58, %v11783_v15 }
 0x773   : > { %v6473_v32 = vadd.f32 1.0, %v9195_v43  ;;  %v7974_v13 = vadd.f32 %v7973_v29, %v11830_v45 }
 0x774   : > { %v9197_v0 = vpop.eup %9196  ;;  %v6388_v24 = vadd.f32 %v7972_v7, %v11872_v9  ;;  %v7976_v4 = vadd.f32 %v7975_v18, %v11832_v48 }
 0x775   : > { %9202 = vrcp.f32 %v6473_v32  ;;  %v6474_v16 = vadd.f32 1.0, %v9197_v0  ;;  %v6389_v58 = vadd.f32 %v7974_v13, %v11884_v49 }
 0x776   : > { %9204 = vtanh.f32 %v6379_v6  ;;  %v7878_v63 = vmul.f32 -1.442695, %v6388_v24  ;;  %v6390_v41 = vadd.f32 %v7976_v4, %v11872_v9  ;;  %v6115_v38 = vpop.f32.mrb[32].mxu0 }
 0x777   : > { %9206 = vrcp.f32 %v6474_v16  ;;  %v7977_v15 = vadd.f32 %v6115_v38, %v11789_v21  ;;  %v6117_v34 = vpop.f32.mrb[33].mxu0 }
 0x778   : > { %9208 = vpow2.f32 %v7878_v63  ;;  %v7879_v45 = vmul.f32 -1.442695, %v6390_v41  ;;  %v7979_v3 = vadd.f32 %v6117_v34, %v11791_v31  ;;  %v6119_v30 = vpop.f32.mrb[34].mxu0 }
 0x779   : > { %9210 = vtanh.f32 %v6381_v44  ;;  %v11902_v48 = vadd.f32 %v7977_v15, %v11834_v51  ;;  %v7981_v12 = vadd.f32 %v6119_v30, %v11793_v35  ;;  %v6121_v40 = vpop.f32.mrb[35].mxu0  ;;  %v6385_v35 = vadd.f32 %v7966_v20, %v11884_v49 }
 0x77a   : > { %v9199_v22 = vpop.eup %9198  ;;  %9212 = vpow2.f32 %v7879_v45  ;;  %v7980_v27 = vadd.f32 %v7979_v3, %v11836_v33  ;;  %v7983_v21 = vadd.f32 %v6121_v40, %v11795_v25  ;;  %v6387_v25 = vadd.f32 %v7970_v54, %v11884_v49 }
 0x77b   : > { %v6475_v39 = vadd.f32 1.0, %v9199_v22  ;;  %v11909_v59 = vadd.f32 %v7981_v12, %v11838_v61 }
 0x77c   : > { %v9201_v31 = vpop.eup %9200  ;;  %v6392_v19 = vadd.f32 %v7980_v27, %v11872_v9  ;;  %v7984_v51 = vadd.f32 %v7983_v21, %v11840_v23 }
 0x77d   : > { %9214 = vrcp.f32 %v6475_v39  ;;  %v6476_v10 = vadd.f32 1.0, %v9201_v31 }
 0x77e   : > { %9216 = vtanh.f32 %v6383_v47  ;;  %v7880_v62 = vmul.f32 -1.442695, %v6392_v19  ;;  %v6394_v57 = vadd.f32 %v7984_v51, %v11872_v9  ;;  %v6125_v33 = vpop.f32.mrb[36].mxu0  ;;  %v12179_v51 = vld [vmem:[#allocation14_spill] sm:$0xff] }
 0x77f   : > { %v11915_v36 = vpop.eup %9202  ;;  %9218 = vrcp.f32 %v6476_v10  ;;  %v7985_v61 = vadd.f32 %v6125_v33, %v11799_v17  ;;  %v6127_v11 = vpop.f32.mrb[37].mxu0  ;;  %v12180_v10 = vld [vmem:[#allocation15_spill] sm:$0xff] }
 0x780   : > { %v9205_v14 = vpop.eup %9204  ;;  %v6531_v23 = vsub.f32 1.0, %v11915_v36  ;;  %9220 = vpow2.f32 %v7880_v62  ;;  %v7881_v53 = vmul.f32 -1.442695, %v6394_v57  ;;  %v7987_v20 = vadd.f32 %v6127_v11, %v11801_v52  ;;  %v6129_v42 = vpop.f32.mrb[38].mxu0 }
 0x781   : > { %v11921_v29 = vpop.eup %9206  ;;  %9222 = vtanh.f32 %v6385_v35  ;;  %v11925_v43 = vadd.f32 %v7985_v61, %v11842_v55  ;;  %v7989_v54 = vadd.f32 %v6129_v42, %v11803_v50  ;;  %v6131_v17 = vpop.f32.mrb[39].mxu0  ;;  %v6393_v57 = vadd.f32 %v11909_v59, %v11884_v49 }
 0x782   : > { %v9209_v6 = vpop.eup %9208  ;;  %v11928_v7 = vmul.f32 %v9205_v14, %v6531_v23  ;;  %v6532_v18 = vsub.f32 1.0, %v11921_v29  ;;  %9224 = vpow2.f32 %v7881_v53  ;;  %v7988_v52 = vadd.f32 %v7987_v20, %v11844_v5  ;;  %v12181_v14 = vld [vmem:[#allocation10_spill] sm:$0xff] }
 0x783   : > { %v9211_v32 = vpop.eup %9210  ;;  %v6477_v0 = vadd.f32 1.0, %v9209_v6  ;;  %v11933_v24 = vadd.f32 %v7989_v54, %v11846_v26  ;;  %v7991_v13 = vadd.f32 %v6131_v17, %v11805_v1  ;;  %9226 = vtanh.f32 %v6387_v25  ;;  %v12182_v54 = vld [vmem:[#allocation11_spill] sm:$0xff] }
 0x784   : > { %v9213_v55 = vpop.eup %9212  ;;  %v11936_v4 = vmul.f32 %v9211_v32, %v6532_v18  ;;  %v6396_v50 = vadd.f32 %v7988_v52, %v11872_v9  ;;  %v6395_v18 = vadd.f32 %v11925_v43, %v11884_v49  ;;  %v12183_v52 = vld [vmem:[#allocation12_spill] sm:$0xff] }
 0x785   : > { %9228 = vrcp.f32 %v6477_v0  ;;  %v6478_v44 = vadd.f32 1.0, %v9213_v55  ;;  %v7992_v16 = vadd.f32 %v7991_v13, %v11848_v56  ;;  %v6391_v56 = vadd.f32 %v11902_v48, %v11884_v49  ;;  %v12184_v0 = vld [vmem:[#allocation16_spill] sm:$0xff] }
 0x786   : > { %9230 = vtanh.f32 %v6389_v58  ;;  %v7882_v63 = vmul.f32 -1.442695, %v6396_v50  ;;  %v6135_v5 = vpop.f32.mrb[40].mxu0 }
 0x787   : > { %v11940_v41 = vpop.eup %9214  ;;  %9232 = vrcp.f32 %v6478_v44  ;;  %v6398_v26 = vadd.f32 %v7992_v16, %v11872_v9  ;;  %v7993_v1 = vadd.f32 %v6135_v5, %v11810_v28  ;;  %v6137_v38 = vpop.f32.mrb[41].mxu0 }
 0x788   : > { %v9217_v15 = vpop.eup %9216  ;;  %v6541_v34 = vsub.f32 1.0, %v11940_v41  ;;  %9234 = vpow2.f32 %v7882_v63  ;;  %v7995_v45 = vadd.f32 %v6137_v38, %v11812_v60  ;;  %v6139_v3 = vpop.f32.mrb[42].mxu0  ;;  %v12185_v63 = vld [vmem:[#allocation13_spill] sm:$0xff] }
 0x789   : > { %v11946_v30 = vpop.eup %9218  ;;  %v7883_v12 = vmul.f32 -1.442695, %v6398_v26  ;;  %v7994_v40 = vadd.f32 %v7993_v1, %v11850_v46  ;;  %v7997_v22 = vadd.f32 %v6139_v3, %v11814_v2  ;;  %v6141_v47 = vpop.f32.mrb[43].mxu0  ;;  %v6397_v1 = vadd.f32 %v11933_v24, %v11884_v49  ;;  %v12186_v38 = vld [vmem:[#allocation17_spill] sm:$0xff]  ;;  %v12188_v3 = vld [vmem:[#allocation19_spill] sm:$0xff] }
 0x78a   : > { %v9221_v28 = vpop.eup %9220  ;;  %v11952_v27 = vmul.f32 %v9217_v15, %v6541_v34  ;;  %v6542_v21 = vsub.f32 1.0, %v11946_v30  ;;  %v7996_v39 = vadd.f32 %v7995_v45, %v11852_v8  ;;  %v7999_v60 = vadd.f32 %v6141_v47, %v11816_v37  ;;  %v12187_v15 = vld [vmem:[#allocation18_spill] sm:$0xff] }
 0x78b   : > { %v9223_v31 = vpop.eup %9222  ;;  %v6479_v19 = vadd.f32 1.0, %v9221_v28  ;;  %9236 = vpow2.f32 %v7883_v12  ;;  %v11958_v48 = vadd.f32 %v7997_v22, %v12179_v51  ;;  %v6399_v24 = vadd.f32 %v7994_v40, %v11884_v49 }
 0x78c   : > { %v9225_v35 = vpop.eup %9224  ;;  %v11960_v46 = vmul.f32 %v9223_v31, %v6542_v21  ;;  %v6400_v2 = vadd.f32 %v7996_v39, %v11872_v9  ;;  %v8000_v62 = vadd.f32 %v7999_v60, %v12180_v10  ;;  %v12189_v31 = vld [vmem:[#allocation6_spill] sm:$0xff] }
 0x78d   : > { %9238 = vrcp.f32 %v6479_v19  ;;  %v6480_v8 = vadd.f32 1.0, %v9225_v35  ;;  %v9227_v33 = vpop.eup %9226 }
 0x78e   : > { %9240 = vtanh.f32 %v6391_v56  ;;  %v7884_v37 = vmul.f32 -1.442695, %v6400_v2  ;;  %v6402_v25 = vadd.f32 %v8000_v62, %v11872_v9  ;;  %v6145_v61 = vpop.f32.mrb[44].mxu0  ;;  %v12190_v62 = vld [vmem:[#allocation7_spill] sm:$0xff] }
 0x78f   : > { %v11967_v11 = vpop.eup %9228  ;;  %9242 = vrcp.f32 %v6480_v8  ;;  %v8001_v23 = vadd.f32 %v6145_v61, %v12181_v14  ;;  %v6147_v53 = vpop.f32.mrb[45].mxu0 }
 0x790   : > { %v9231_v20 = vpop.eup %9230  ;;  %v6551_v42 = vsub.f32 1.0, %v11967_v11  ;;  %9244 = vpow2.f32 %v7884_v37  ;;  %v7885_v58 = vmul.f32 -1.442695, %v6402_v25  ;;  %v8003_v59 = vadd.f32 %v6147_v53, %v12182_v54  ;;  %v6149_v17 = vpop.f32.mrb[46].mxu0  ;;  %v12191_v37 = vld [vmem:[#allocation8_spill] sm:$0xff] }
 0x791   : > { %v11972_v6 = vpop.eup %9232  ;;  %9246 = vtanh.f32 %v6393_v57  ;;  %v8005_v32 = vadd.f32 %v6149_v17, %v12183_v52  ;;  %v11978_v13 = vadd.f32 %v8001_v23, %v12184_v0  ;;  %v6151_v55 = vpop.f32.mrb[47].mxu0 }
 0x792   : > { %v9235_v50 = vpop.eup %9234  ;;  %v11980_v44 = vmul.f32 %v9227_v33, %v6551_v42  ;;  %v6552_v16 = vsub.f32 1.0, %v11972_v6  ;;  %9248 = vpow2.f32 %v7885_v58  ;;  %v8007_v5 = vadd.f32 %v6151_v55, %v12185_v63  ;;  %v12192_v58 = vld [vmem:[#allocation9_spill] sm:$0xff] }
 0x793   : > { %v6481_v26 = vadd.f32 1.0, %v9235_v50  ;;  %v8004_v43 = vadd.f32 %v8003_v59, %v12186_v38  ;;  %v8006_v34 = vadd.f32 %v8005_v32, %v12187_v15 }
 0x794   : > { %v11988_v45 = vmul.f32 %v9231_v20, %v6552_v16  ;;  %v8008_v56 = vadd.f32 %v8007_v5, %v12188_v3 }
 0x795   : > { %v9237_v12 = vpop.eup %9236  ;;  %9250 = vrcp.f32 %v6481_v26  ;;  %v6404_v22 = vadd.f32 %v8004_v43, %v11872_v9 }
 0x796   : > { %9252 = vtanh.f32 %v6395_v18  ;;  %v6482_v47 = vadd.f32 1.0, %v9237_v12  ;;  %v6406_v28 = vadd.f32 %v8008_v56, %v11872_v9  ;;  %v6188_v21 = vpop.f32.mrb[16].mxu0  ;;  %v6401_v18 = vadd.f32 %v11958_v48, %v11884_v49 }
 0x797   : > { %v11993_v39 = vpop.eup %9238  ;;  %9254 = vtanh.f32 %v6397_v1  ;;  %v7886_v60 = vmul.f32 -1.442695, %v6404_v22  ;;  %v7949_v19 = vadd.f32 %v6188_v21, %v12189_v31  ;;  %v6190_v51 = vpop.f32.mrb[17].mxu0  ;;  %v6405_v56 = vadd.f32 %v8006_v34, %v11884_v49 }
 0x798   : > { %v9241_v35 = vpop.eup %9240  ;;  %v6561_v2 = vsub.f32 1.0, %v11993_v39  ;;  %9256 = vrcp.f32 %v6482_v47  ;;  %v7887_v10 = vmul.f32 -1.442695, %v6406_v28  ;;  %v7950_v57 = vadd.f32 %v6190_v51, %v12190_v62  ;;  %v6192_v8 = vpop.f32.mrb[18].mxu0 }
 0x799   : > { %v11999_v33 = vpop.eup %9242  ;;  %9258 = vpow2.f32 %v7886_v60  ;;  %v7951_v25 = vadd.f32 %v6192_v8, %v12191_v37  ;;  %v6194_v61 = vpop.f32.mrb[19].mxu0 }
 0x79a   : > { %v9245_v14 = vpop.eup %9244  ;;  %v12002_v40 = vmul.f32 %v9241_v35, %v6561_v2  ;;  %v6562_v23 = vsub.f32 1.0, %v11999_v33  ;;  %9260 = vpow2.f32 %v7887_v10  ;;  %v6376_v53 = vadd.f32 %v7950_v57, %v11872_v9 }
 0x79b   : > { %v9247_v20 = vpop.eup %9246  ;;  %v6483_v42 = vadd.f32 1.0, %v9245_v14  ;;  %v7952_v54 = vadd.f32 %v6194_v61, %v12192_v58  ;;  %9262 = vtanh.f32 %v6399_v24  ;;  %v6377_v10 = vadd.f32 %v7951_v25, %v11884_v49 }
 0x79c   : > { %v9249_v59 = vpop.eup %9248  ;;  %v12007_v17 = vmul.f32 %v9247_v20, %v6562_v23  ;;  %v7872_v52 = vmul.f32 -1.442695, %v6376_v53 }
 0x79d   : > { %9264 = vrcp.f32 %v6483_v42  ;;  %v6484_v32 = vadd.f32 1.0, %v9249_v59  ;;  %v6378_v0 = vadd.f32 %v7952_v54, %v11872_v9  ;;  %v6403_v9 = vadd.f32 %v11978_v13, %v11884_v49 }
 0x79e   : > { %9266 = vpow2.f32 %v7872_v52  ;;  %v6375_v13 = vadd.f32 %v7949_v19, %v11884_v49 }
 0x79f   : > { %v12012_v55 = vpop.eup %9250  ;;  %9268 = vrcp.f32 %v6484_v32  ;;  %v7873_v50 = vmul.f32 -1.442695, %v6378_v0 }
 0x7a0   : > { %v9253_v16 = vpop.eup %9252  ;;  %v6571_v63 = vsub.f32 1.0, %v12012_v55  ;;  %9270 = vtanh.f32 %v6401_v18 }
 0x7a1   : > { %v9255_v5 = vpop.eup %9254  ;;  %9272 = vpow2.f32 %v7873_v50 }
 0x7a2   : > { %v12015_v26 = vpop.eup %9256  ;;  %v12017_v1 = vmul.f32 %v9253_v16, %v6571_v63 }
 0x7a3   : > { %v9259_v48 = vpop.eup %9258  ;;  %v6572_v38 = vsub.f32 1.0, %v12015_v26 }
 0x7a4   : > { %v9261_v43 = vpop.eup %9260  ;;  %v6485_v15 = vadd.f32 1.0, %v9259_v48 }
 0x7a5   : > { %v12022_v3 = vmul.f32 %v9255_v5, %v6572_v38  ;;  %v6486_v12 = vadd.f32 1.0, %v9261_v43  ;;  %v9263_v22 = vpop.eup %9262 }
 0x7a6   : > { %9274 = vrcp.f32 %v6485_v15 }
 0x7a7   : > { %v12025_v47 = vpop.eup %9264  ;;  %9276 = vrcp.f32 %v6486_v12 }
 0x7a8   : > { %v9267_v28 = vpop.eup %9266  ;;  %v6581_v21 = vsub.f32 1.0, %v12025_v47  ;;  %9278 = vtanh.f32 %v6403_v9 }
 0x7a9   : > { %v12028_v24 = vpop.eup %9268  ;;  %9280 = vtanh.f32 %v6405_v56  ;;  %v6471_v60 = vadd.f32 1.0, %v9267_v28 }
 0x7aa   : > { %v9271_v31 = vpop.eup %9270  ;;  %v12031_v51 = vmul.f32 %v9263_v22, %v6581_v21  ;;  %v6582_v34 = vsub.f32 1.0, %v12028_v24 }
 0x7ab   : > { %v9273_v35 = vpop.eup %9272  ;;  %9282 = vrcp.f32 %v6471_v60 }
 0x7ac   : > { %v12034_v2 = vmul.f32 %v9271_v31, %v6582_v34  ;;  %v6472_v62 = vadd.f32 1.0, %v9273_v35  ;;  %9284 = vtanh.f32 %v6375_v13 }
 0x7ae   : > { %9286 = vrcp.f32 %v6472_v62 }
 0x7af   : > { %9288 = vtanh.f32 %v6377_v10 }
 0x7b0   : > { %v9275_v57 = vpop.eup %9274 }
 0x7b1   : > { %v12037_v19 = vpop.eup %9276  ;;  %v6591_v8 = vsub.f32 1.0, %v9275_v57 }
 0x7b2   : > { %v9279_v37 = vpop.eup %9278  ;;  %v6592_v61 = vsub.f32 1.0, %v12037_v19 }
 0x7b3   : > { %v9281_v14 = vpop.eup %9280  ;;  %v6593_v23 = vmul.f32 %v9279_v37, %v6591_v8 }
 0x7b4   : > { %v6594_v53 = vmul.f32 %v9281_v14, %v6592_v61 }
 0x7b5   : > { %v9283_v20 = vpop.eup %9282 }
 0x7b6   : > { %v6521_v42 = vsub.f32 1.0, %v9283_v20  ;;  %v9285_v49 = vpop.eup %9284  ;;  %v6519_v58 = vmul.f32 0.0, %v9283_v20 }
 0x7b8   : > { %v9287_v25 = vpop.eup %9286  ;;  %v6523_v54 = vmul.f32 %v9285_v49, %v6521_v42 }
 0x7b9   : > { %v6522_v59 = vsub.f32 1.0, %v9287_v25  ;;  %v9289_v18 = vpop.eup %9288  ;;  %v6520_v32 = vmul.f32 0.0, %v9287_v25 }
 0x7ba   : > { %v6525_v52 = vadd.f32 %v6523_v54, %v6519_v58 }
 0x7bb   : > { %v6524_v0 = vmul.f32 %v9289_v18, %v6522_v59 }
 0x7bc   : > { %6527 = vst [vmem:[%s12043_s25] sm:$0xff] %v6525_v52  ;;  %v6529_v50 = vmul.f32 %v11915_v36, %v6525_v52 }
 0x7bd   : > { %v6526_v16 = vadd.f32 %v6524_v0, %v6520_v32 }
 0x7be   : > { %v6535_v63 = vadd.f32 %v11928_v7, %v6529_v50 }
 0x7bf   : > { %6528 = vst [vmem:[%s12043_s25 + $0x8] sm:$0xff] %v6526_v16  ;;  %v6530_v5 = vmul.f32 %v11921_v29, %v6526_v16 }
 0x7c0   : > { %6537 = vst [vmem:[%s12043_s25 + $0x10] sm:$0xff] %v6535_v63  ;;  %v6539_v48 = vmul.f32 %v11940_v41, %v6535_v63 }
 0x7c1   : > { %v6536_v38 = vadd.f32 %v11936_v4, %v6530_v5 }
 0x7c2   : > { %v6545_v43 = vadd.f32 %v11952_v27, %v6539_v48 }
 0x7c3   : > { %6538 = vst [vmem:[%s12043_s25 + $0x18] sm:$0xff] %v6536_v38  ;;  %v6540_v9 = vmul.f32 %v11946_v30, %v6536_v38 }
 0x7c4   : > { %6547 = vst [vmem:[%s12043_s25 + $0x20] sm:$0xff] %v6545_v43  ;;  %v6549_v36 = vmul.f32 %v11967_v11, %v6545_v43 }
 0x7c5   : > { %v6546_v7 = vadd.f32 %v11960_v46, %v6540_v9 }
 0x7c6   : > { %v6555_v29 = vadd.f32 %v11980_v44, %v6549_v36 }
 0x7c7   : > { %6548 = vst [vmem:[%s12043_s25 + $0x28] sm:$0xff] %v6546_v7  ;;  %v6550_v41 = vmul.f32 %v11972_v6, %v6546_v7 }
 0x7c8   : > { %6557 = vst [vmem:[%s12043_s25 + $0x30] sm:$0xff] %v6555_v29  ;;  %v6559_v4 = vmul.f32 %v11993_v39, %v6555_v29 }
 0x7c9   : > { %v6556_v27 = vadd.f32 %v11988_v45, %v6550_v41 }
 0x7ca   : > { %v6565_v30 = vadd.f32 %v12002_v40, %v6559_v4 }
 0x7cb   : > { %6558 = vst [vmem:[%s12043_s25 + $0x38] sm:$0xff] %v6556_v27  ;;  %v6560_v11 = vmul.f32 %v11999_v33, %v6556_v27 }
 0x7cc   : > { %6567 = vst [vmem:[%s12043_s25 + $0x40] sm:$0xff] %v6565_v30  ;;  %v6569_v46 = vmul.f32 %v12012_v55, %v6565_v30 }
 0x7cd   : > { %v6566_v44 = vadd.f32 %v12007_v17, %v6560_v11 }
 0x7ce   : > { %v6575_v6 = vadd.f32 %v12017_v1, %v6569_v46 }
 0x7cf   : > { %6568 = vst [vmem:[%s12043_s25 + $0x48] sm:$0xff] %v6566_v44  ;;  %v6570_v45 = vmul.f32 %v12015_v26, %v6566_v44 }
 0x7d0   : > { %6577 = vst [vmem:[%s12043_s25 + $0x50] sm:$0xff] %v6575_v6  ;;  %v6579_v39 = vmul.f32 %v12025_v47, %v6575_v6 }
 0x7d1   : > { %v6576_v40 = vadd.f32 %v12022_v3, %v6570_v45 }
 0x7d2   : > { %v6585_v33 = vadd.f32 %v12031_v51, %v6579_v39 }
 0x7d3   : > { %6578 = vst [vmem:[%s12043_s25 + $0x58] sm:$0xff] %v6576_v40  ;;  %v6580_v55 = vmul.f32 %v12028_v24, %v6576_v40 }
 0x7d4   : > { %6587 = vst [vmem:[%s12043_s25 + $0x60] sm:$0xff] %v6585_v33  ;;  %v6589_v17 = vmul.f32 %v9275_v57, %v6585_v33 }
 0x7d5   : > { %v6586_v1 = vadd.f32 %v12034_v2, %v6580_v55 }
 0x7d6   : > { %v6595_v26 = vadd.f32 %v6593_v23, %v6589_v17 }
 0x7d7   : > { %6588 = vst [vmem:[%s12043_s25 + $0x68] sm:$0xff] %v6586_v1  ;;  %v6590_v15 = vmul.f32 %v12037_v19, %v6586_v1 }
 0x7d8   : > { %6597 = vst [vmem:[%s12043_s25 + $0x70] sm:$0xff] %v6595_v26 }
 0x7d9   : > { %v6596_v3 = vadd.f32 %v6594_v53, %v6590_v15 }
 0x7db   : > { %6598 = vst [vmem:[%s12043_s25 + $0x78] sm:$0xff] %v6596_v3 }
 0x7dc   : > { %9305 = shalt.err (!%p9302_p3)
}
 0x7dd   : > { %s9306_s30 = scalar_lea.hbm %s12090_s29, 2048  ;;  %s9310_s26 = scalar_lea.hbm %s12148_s10, 4096 }
 0x7de   : > { %p9307_p4 = scmp.ne.s32.totalorder %s12090_s29, %s9306_s30  ;;  %p9311_p9 = scmp.lt.u32.totalorder %s12090_s29, %s12148_s10 }
 0x7df   : > { %p9312_p10 = scmp.lt.u32.totalorder %s9310_s26, %s9306_s30  ;;  %p9314_p12 = scmp.lt.u32.totalorder %s9306_s30, %s12090_s29 }
 0x7e0   : > { %p9308_p7 = pnand %p9307_p4, %p9456_p5 }
 0x7e1   : > { %p9313_p11 = por %p9312_p10, %p9311_p9 }
 0x7e2   : > { %p9309_p8 = pneg %p9308_p7 }
 0x7e3   : > { %p9315_p13 = por %p9314_p12, %p9313_p11 }
 0x7e5   : > { %p9316_p0 = pnand %p9315_p13, %p9309_p8 }
 0x7e7   : > { %9319 = shalt.err (!%p9316_p0)
}
 0x7e8   : > { %s9361_s12 = smov 128   ;;  %s9362_s21 = smov 8  }
 0x7e9   : > { %8349 = dma.vmem_to_hbm [thread:$0]  (%p9456_p5), %s12092_s27, 2048, %s12090_s29, %s12097_s17, %s9361_s12, %s9361_s12, %s9362_s21  }
 0x7ea PF: > { %p8355_p1 = scmp.ge.s32.totalorder %s9354_s16, 2  ;;  %s6628_s18 = sand.u32 1, %s9342_s13  }
 0x7eb   : > { %s6629_s0 = scalar_lea.sflag [#allocation4], %s6628_s18 }
 0x7ec   : > { %p8352_p2 = pnand %p8355_p1, %p9460_p6 }
 0x7ee   : > { %9337 = dma.done.wait (!%p8352_p2), %s6629_s0, 2048  }
 0x7ef   : > { %9339 = vsyncadd (!%p8352_p2), %s6629_s0, 4294965248  ;;  %p20_p3 = scmp.ge.s32.totalorder %s9443_s19, 4   ;;  %s12193_s13 = smov %s9346_s14 }
 0x7f0   : > { %s12194_s14 = smov %s9350_s15  ;;  %s12195_s15 = smov %s9454_s22 }
 0x7f1   : > { %s12196_s16 = smov %s9443_s19  ;;  %22 = sbr.rel (!%p20_p3) target bundleno = 5 (0x5), region = 107 }
 0x7f8   :  { %6634 = vsyncpa [#allocation4], 1 }
 0x7f9   :  { %6636 = vsyncpa [#allocation4 + $0x1], 1 }

</bundles_post_ra>
